<compile_context>
chip_gen: v7x
topology: tpu7x:2x2x1
jax: 0.10.0
libtpu: 0.0.40
codegen_flags: <defaults>
</compile_context>

<pallas_src>
import functools

import jax
import jax.numpy as jnp
from jax import lax
from jax.experimental import pallas as pl
from jax.experimental.pallas import tpu as pltpu


# ----------------------------------------------------------------------------
# helpers
# ----------------------------------------------------------------------------
def _round_up(x, m):
    return ((x + m - 1) // m) * m


def _leaky(z, slope=0.2):
    # LeakyReLU(0.2) == max(z, 0.2*z) for slope in (0, 1)
    return jnp.maximum(z, slope * z)


def _elu(z):
    return jnp.where(z > 0.0, z, jnp.exp(z) - 1.0)


# ----------------------------------------------------------------------------
# fused Pallas kernel: fc1 -> hop x (attention propagation) -> fc2
# grid = (hop,)  ("arbitrary": h/x state carried in VMEM scratch across steps)
# ----------------------------------------------------------------------------
def _hetgtan_kernel(edge_src, edge_tgt, num_node_types, target_idx,
                    xraw_ref,   # [NT, N_pad, D_pad]   raw features (padded)
                    w1_ref,     # [NT, D_pad, H_pad]   fc1 weights
                    b1_ref,     # [NT, 1,     H_pad]   fc1 bias
                    adj_ref,    # [ET, N_pad, N_pad]   dense adjacency per edge type
                    attn1_ref,  # [1,  ET,    H_pad]   this hop's attn1 vectors
                    attn2_ref,  # [1,  ET,    H_pad]   this hop's attn2 vectors
                    w2_ref,     # [H_pad, O_pad]       fc2 weights
                    b2_ref,     # [1,     O_pad]       fc2 bias
                    out_ref,    # [N_pad, O_pad]
                    x_st,       # scratch: fc1 outputs (x_dict), resident
                    h_st):      # scratch: hidden state (h_dict), resident
    hop_i = pl.program_id(0)
    NT = num_node_types
    ET = len(edge_src)
    contract_last = (((1,), (1,)), ((), ()))   # contract last dims (A @ B^T)

    # --- first hop: fc1 + relu for every node type (dropout == identity) ----
    @pl.when(hop_i == 0)
    def _init():
        for nt in range(NT):
            y = jnp.dot(xraw_ref[nt], w1_ref[nt],
                        preferred_element_type=jnp.float32)
            y = jnp.maximum(y + b1_ref[nt], 0.0)
            x_st[nt] = y
            h_st[nt] = y

    # --- one GTAN propagation hop over all edge types, fully in VMEM --------
    att1 = attn1_ref[0]                       # [ET, H]
    att2 = attn2_ref[0]                       # [ET, H]
    xs = [x_st[nt] for nt in range(NT)]       # fc1 outputs   (fixed)
    hs = [h_st[nt] for nt in range(NT)]       # previous hop hidden
    agg = [None] * NT
    div = [None] * NT

    for e in range(ET):                       # static unroll (few edge types)
        si, ti = edge_src[e], edge_tgt[e]
        x, h = xs[si], hs[ti]
        a1 = att1[e:e + 1, :]                 # [1, H]
        a2 = att2[e:e + 1, :]                 # [1, H]

        x1 = jnp.sum(x * a1, axis=1, keepdims=True)          # attn1(x)   [N,1]
        x2 = jnp.sum(x * a2, axis=1, keepdims=True)          # attn2(x)   [N,1]
        h1 = lax.dot_general(a2, h, contract_last,            # attn2(h)^T [1,N]
                             preferred_element_type=jnp.float32)

        w2v = jnp.exp(_leaky(x1 + x2))                        # self weight [N,1]
        wmat = adj_ref[e] * jnp.exp(_leaky(x1 + h1))          # edge weights [N,N]

        agg_e = jnp.dot(wmat, h, preferred_element_type=jnp.float32) + w2v * x
        div_e = jnp.sum(wmat, axis=1, keepdims=True) + w2v

        agg[si] = agg_e if agg[si] is None else agg[si] + agg_e
        div[si] = div_e if div[si] is None else div[si] + div_e

    h_new = []
    for nt in range(NT):
        z = agg[nt] / div[nt]
        hn = _elu(z)                          # attn-dropout == identity
        h_new.append(hn)
        h_st[nt] = hn

    # --- last hop: fc2 on the target node type ------------------------------
    @pl.when(hop_i == pl.num_programs(0) - 1)
    def _final():
        y = jnp.dot(h_new[target_idx], w2_ref[...],
                    preferred_element_type=jnp.float32)
        out_ref[...] = y + b2_ref[...]


# ----------------------------------------------------------------------------
# wrapper: pack / pad operands once, launch one fused kernel
# ----------------------------------------------------------------------------
def hetgtan_nosem_forward(params, x_dict_input, edge_index_dict, edge_types,
                          target_node_type, hop):
    node_types = list(x_dict_input.keys())
    nt_index = {nt: i for i, nt in enumerate(node_types)}
    NT, ET = len(node_types), len(edge_types)

    n_nodes = {nt: x_dict_input[nt].shape[0] for nt in node_types}
    n_hid = params["fc1"][node_types[0]][0].shape[1]
    n_out = params["fc2"][0].shape[1]
    d_in_max = max(x.shape[1] for x in x_dict_input.values())

    LANE = 128
    N_pad = _round_up(max(n_nodes.values()), LANE)
    D_pad = _round_up(d_in_max, LANE)
    H_pad = _round_up(n_hid, LANE)
    O_pad = _round_up(n_out, LANE)
    f32 = jnp.float32

    # ---- pack + zero-pad (hoisted out of the hop loop; built exactly once) --
    xraw = jnp.zeros((NT, N_pad, D_pad), f32)
    w1 = jnp.zeros((NT, D_pad, H_pad), f32)
    b1 = jnp.zeros((NT, 1, H_pad), f32)
    for nt in node_types:
        i = nt_index[nt]
        x = x_dict_input[nt].astype(f32)
        w, b = params["fc1"][nt]
        xraw = xraw.at[i, :x.shape[0], :x.shape[1]].set(x)
        w1 = w1.at[i, :w.shape[0], :w.shape[1]].set(w.astype(f32))
        b1 = b1.at[i, 0, :b.shape[0]].set(b.astype(f32))

    # dense adjacency (with multiplicity) per edge type; rows = "source" nodes
    # the PyTorch scatter aggregates into, cols = neighbor ("target") nodes.
    adj = jnp.zeros((ET, N_pad, N_pad), f32)
    edge_src, edge_tgt = [], []
    for e, et in enumerate(edge_types):
        s_idx, t_idx = edge_index_dict[et]
        edge_src.append(nt_index[et[0]])
        edge_tgt.append(nt_index[et[-1]])
        adj = adj.at[e, s_idx, t_idx].add(1.0)
    assert set(edge_src) == set(range(NT)), \
        "every node type must be the source of at least one edge type"

    attn1 = jnp.zeros((hop, ET, H_pad), f32).at[:, :, :n_hid].set(
        params["attn1"].astype(f32))
    attn2 = jnp.zeros((hop, ET, H_pad), f32).at[:, :, :n_hid].set(
        params["attn2"].astype(f32))

    w2p, b2p = params["fc2"]
    w2 = jnp.zeros((H_pad, O_pad), f32).at[:n_hid, :n_out].set(w2p.astype(f32))
    b2 = jnp.zeros((1, O_pad), f32).at[0, :n_out].set(b2p.astype(f32))

    kernel = functools.partial(_hetgtan_kernel, tuple(edge_src),
                               tuple(edge_tgt), NT, nt_index[target_node_type])

    full3 = lambda i: (0, 0, 0)
    full2 = lambda i: (0, 0)
    out = pl.pallas_call(
        kernel,
        out_shape=jax.ShapeDtypeStruct((N_pad, O_pad), f32),
        grid=(hop,),
        in_specs=[
            pl.BlockSpec((NT, N_pad, D_pad), full3),          # raw features
            pl.BlockSpec((NT, D_pad, H_pad), full3),          # fc1 weights
            pl.BlockSpec((NT, 1, H_pad), full3),              # fc1 bias
            pl.BlockSpec((ET, N_pad, N_pad), full3),          # adjacency
            pl.BlockSpec((1, ET, H_pad), lambda i: (i, 0, 0)),  # attn1 per hop
            pl.BlockSpec((1, ET, H_pad), lambda i: (i, 0, 0)),  # attn2 per hop
            pl.BlockSpec((H_pad, O_pad), full2),              # fc2 weights
            pl.BlockSpec((1, O_pad), full2),                  # fc2 bias
        ],
        out_specs=pl.BlockSpec((N_pad, O_pad), full2),        # resident across hops
        scratch_shapes=[
            pltpu.VMEM((NT, N_pad, H_pad), f32),              # x_dict (fc1 out)
            pltpu.VMEM((NT, N_pad, H_pad), f32),              # h_dict state
        ],
        compiler_params=pltpu.CompilerParams(
            dimension_semantics=("arbitrary",)),              # hop carries state
        # NOTE: for large graphs, tile the node axes and set vmem_limit_bytes.
    )(xraw, w1, b1, adj, attn1, attn2, w2, b2)

    return out[:n_nodes[target_node_type], :n_out]


# ----------------------------------------------------------------------------
# pure-jnp reference (exact mirror of the PyTorch forward, eval mode)
# ----------------------------------------------------------------------------
def reference_forward(params, x_dict_input, edge_index_dict, edge_types,
                      target_node_type, hop):
    x_dict = {}
    for nt, x in x_dict_input.items():
        w, b = params["fc1"][nt]
        x_dict[nt] = jnp.maximum(x @ w + b, 0.0)
    h_dict = dict(x_dict)
    node_types = list(x_dict.keys())
    for i in range(hop):
        edge_aggr = {nt: [] for nt in node_types}
        div_dict = {nt: [] for nt in node_types}
        for e, et in enumerate(edge_types):
            s, t = edge_index_dict[et]
            nt_s, nt_t = et[0], et[-1]
            x, h = x_dict[nt_s], h_dict[nt_t]
            N = x.shape[0]
            a1 = params["attn1"][i, e, :][:, None]
            a2 = params["attn2"][i, e, :][:, None]
            x1 = x @ a1
            h1 = h @ a2
            w2 = jnp.exp(_leaky(x1 + x @ a2))
            w1 = jnp.exp(_leaky(x1[s] + h1[t]))
            div = jax.ops.segment_sum(w1, s, num_segments=N) + w2
            hagg = jax.ops.segment_sum(w1 * h[t], s, num_segments=N) + w2 * x
            edge_aggr[nt_s].append(hagg)
            div_dict[nt_s].append(div)
        for nt in node_types:
            hh = jnp.sum(jnp.stack(edge_aggr[nt], 0), 0)
            dd = jnp.sum(jnp.stack(div_dict[nt], 0), 0)
            h_dict[nt] = _elu(hh / dd)
    w2p, b2p = params["fc2"]
    return h_dict[target_node_type] @ w2p + b2p


# ----------------------------------------------------------------------------
# deterministic setup + run
# ----------------------------------------------------------------------------
if __name__ == "__main__":
    key = jax.random.PRNGKey(0)

    n_in_dict = {"paper": 12, "author": 20}
    n_nodes = {"paper": 16, "author": 24}
    n_hid, n_out, hop = 64, 8, 3
    edge_types = (("paper", "to", "author"),
                  ("author", "to", "paper"),
                  ("paper", "cites", "paper"))
    target_node_type = "paper"
    node_types = list(n_in_dict.keys())
    n_edges = 60

    # ---- parameters ----
    params = {"fc1": {}}
    for nt in node_types:
        key, k1 = jax.random.split(key)
        fan_in = n_in_dict[nt]
        w = jax.random.normal(k1, (fan_in, n_hid), jnp.float32) / jnp.sqrt(fan_in)
        params["fc1"][nt] = (w, jnp.zeros((n_hid,), jnp.float32))
    key, k2 = jax.random.split(key)
    params["fc2"] = (
        jax.random.normal(k2, (n_hid, n_out), jnp.float32) / jnp.sqrt(n_hid),
        jnp.zeros((n_out,), jnp.float32))
    # PyTorch reset_parameters zero-inits attention; use small random weights
    # here so the attention math is actually exercised.
    key, ka1, ka2 = jax.random.split(key, 3)
    params["attn1"] = 0.1 * jax.random.normal(
        ka1, (hop, len(edge_types), n_hid), jnp.float32)
    params["attn2"] = 0.1 * jax.random.normal(
        ka2, (hop, len(edge_types), n_hid), jnp.float32)

    # ---- inputs ----
    x_dict_input = {}
    for nt in node_types:
        key, kx = jax.random.split(key)
        x_dict_input[nt] = jax.random.normal(
            kx, (n_nodes[nt], n_in_dict[nt]), jnp.float32)

    # random edge lists (2 x E) per edge type
    edge_index_dict = {}
    for et in edge_types:
        key, ks, kt = jax.random.split(key, 3)
        s = jax.random.randint(ks, (n_edges,), 0, n_nodes[et[0]])
        t = jax.random.randint(kt, (n_edges,), 0, n_nodes[et[-1]])
        edge_index_dict[et] = (s, t)

    # ---- run ----
    out = hetgtan_nosem_forward(params, x_dict_input, edge_index_dict,
                                edge_types, target_node_type, hop)
    out = jax.block_until_ready(out)

    ref = reference_forward(params, x_dict_input, edge_index_dict,
                            edge_types, target_node_type, hop)
    assert out.shape == (n_nodes[target_node_type], n_out)
    max_diff = float(jnp.max(jnp.abs(out - ref)))
    assert jnp.allclose(out, ref, atol=1e-3, rtol=1e-3), \
        f"mismatch vs reference, max abs diff = {max_diff}"

    # TODO(synk): training-mode dropout / attn-dropout (PRNG masking) not implemented.
    print("KERNEL_OK")
</pallas_src>

<mosaic_0001>
module attributes {stable_mosaic.version = 11 : i64} {
  func.func @_hetgtan_kernel(%arg0: i32, %arg1: memref<2x128x128xf32, #tpu.memory_space<vmem>>, %arg2: memref<2x128x128xf32, #tpu.memory_space<vmem>>, %arg3: memref<2x1x128xf32, #tpu.memory_space<vmem>>, %arg4: memref<3x128x128xf32, #tpu.memory_space<vmem>>, %arg5: memref<1x3x128xf32, #tpu.memory_space<vmem>>, %arg6: memref<1x3x128xf32, #tpu.memory_space<vmem>>, %arg7: memref<128x128xf32, #tpu.memory_space<vmem>>, %arg8: memref<1x128xf32, #tpu.memory_space<vmem>>, %arg9: memref<128x128xf32, #tpu.memory_space<vmem>>, %arg10: memref<2x128x128xf32, #tpu.memory_space<vmem>>, %arg11: memref<2x128x128xf32, #tpu.memory_space<vmem>>) attributes {dimension_semantics = [#tpu.dimension_semantics<arbitrary>], iteration_bounds = array<i64: 3>, scalar_prefetch = 0 : i64, scratch_operands = 2 : i64, tpu.core_type = #tpu.core_type<tc>, window_params = [{pipeline_mode = #tpu.pipeline_mode<synchronous>, transform_indices = @transform_0, window_bounds = array<i64: 2, 128, 128>}, {pipeline_mode = #tpu.pipeline_mode<synchronous>, transform_indices = @transform_1, window_bounds = array<i64: 2, 128, 128>}, {pipeline_mode = #tpu.pipeline_mode<synchronous>, transform_indices = @transform_2, window_bounds = array<i64: 2, 1, 128>}, {pipeline_mode = #tpu.pipeline_mode<synchronous>, transform_indices = @transform_3, window_bounds = array<i64: 3, 128, 128>}, {transform_indices = @transform_4, window_bounds = array<i64: 1, 3, 128>}, {transform_indices = @transform_5, window_bounds = array<i64: 1, 3, 128>}, {pipeline_mode = #tpu.pipeline_mode<synchronous>, transform_indices = @transform_6, window_bounds = array<i64: 128, 128>}, {pipeline_mode = #tpu.pipeline_mode<synchronous>, transform_indices = @transform_7, window_bounds = array<i64: 1, 128>}, {pipeline_mode = #tpu.pipeline_mode<synchronous>, transform_indices = @transform_8, window_bounds = array<i64: 128, 128>}]} {
    %c0_i32 = arith.constant 0 : i32
    %0 = arith.cmpi eq, %arg0, %c0_i32 : i32
    %1 = arith.extui %0 : i1 to i32
    %c0_i32_0 = arith.constant 0 : i32
    %2 = arith.cmpi ne, %1, %c0_i32_0 : i32
    scf.if %2 {
      %c0_56 = arith.constant 0 : index
      %c0_57 = arith.constant 0 : index
      %c0_58 = arith.constant 0 : index
      %141 = vector.load %arg1[%c0_56, %c0_57, %c0_58] : memref<2x128x128xf32, #tpu.memory_space<vmem>>, vector<1x128x128xf32>
      %142 = vector.shape_cast %141 : vector<1x128x128xf32> to vector<128x128xf32>
      %c0_59 = arith.constant 0 : index
      %c0_60 = arith.constant 0 : index
      %c0_61 = arith.constant 0 : index
      %143 = vector.load %arg2[%c0_59, %c0_60, %c0_61] : memref<2x128x128xf32, #tpu.memory_space<vmem>>, vector<1x128x128xf32>
      %144 = vector.shape_cast %143 : vector<1x128x128xf32> to vector<128x128xf32>
      %cst_62 = arith.constant dense<0.000000e+00> : vector<128x128xf32>
      %145 = tpu.matmul %142, %144, %cst_62 {dimension_numbers = #tpu.dot_dimension_numbers<[1], [0], [0], [1], [0, 0, 1, 1], [], []>} : vector<128x128xf32>, vector<128x128xf32>, vector<128x128xf32> -> vector<128x128xf32>
      %c0_63 = arith.constant 0 : index
      %c0_64 = arith.constant 0 : index
      %c0_65 = arith.constant 0 : index
      %146 = vector.load %arg3[%c0_63, %c0_64, %c0_65] : memref<2x1x128xf32, #tpu.memory_space<vmem>>, vector<1x1x128xf32>
      %147 = vector.shape_cast %146 : vector<1x1x128xf32> to vector<1x128xf32>
      %148 = vector.broadcast %147 : vector<1x128xf32> to vector<128x128xf32>
      %149 = arith.addf %145, %148 : vector<128x128xf32>
      %cst_66 = arith.constant 0.000000e+00 : f32
      %150 = vector.broadcast %cst_66 : f32 to vector<128x128xf32>
      %151 = arith.maximumf %149, %150 : vector<128x128xf32>
      %c0_67 = arith.constant 0 : index
      %c0_68 = arith.constant 0 : index
      %c0_69 = arith.constant 0 : index
      %152 = vector.load %arg10[%c0_67, %c0_68, %c0_69] : memref<2x128x128xf32, #tpu.memory_space<vmem>>, vector<1x128x128xf32>
      %153 = vector.shape_cast %152 : vector<1x128x128xf32> to vector<128x128xf32>
      %154 = vector.shape_cast %151 : vector<128x128xf32> to vector<1x128x128xf32>
      tpu.vector_store %arg10[%c0_67, %c0_68, %c0_69], %154 {strides = array<i32>} : memref<2x128x128xf32, #tpu.memory_space<vmem>>, vector<1x128x128xf32>,
      %c0_70 = arith.constant 0 : index
      %c0_71 = arith.constant 0 : index
      %c0_72 = arith.constant 0 : index
      %155 = vector.load %arg11[%c0_70, %c0_71, %c0_72] : memref<2x128x128xf32, #tpu.memory_space<vmem>>, vector<1x128x128xf32>
      %156 = vector.shape_cast %155 : vector<1x128x128xf32> to vector<128x128xf32>
      %157 = vector.shape_cast %151 : vector<128x128xf32> to vector<1x128x128xf32>
      tpu.vector_store %arg11[%c0_70, %c0_71, %c0_72], %157 {strides = array<i32>} : memref<2x128x128xf32, #tpu.memory_space<vmem>>, vector<1x128x128xf32>,
      %c1_73 = arith.constant 1 : index
      %c0_74 = arith.constant 0 : index
      %c0_75 = arith.constant 0 : index
      %158 = vector.load %arg1[%c1_73, %c0_74, %c0_75] : memref<2x128x128xf32, #tpu.memory_space<vmem>>, vector<1x128x128xf32>
      %159 = vector.shape_cast %158 : vector<1x128x128xf32> to vector<128x128xf32>
      %c1_76 = arith.constant 1 : index
      %c0_77 = arith.constant 0 : index
      %c0_78 = arith.constant 0 : index
      %160 = vector.load %arg2[%c1_76, %c0_77, %c0_78] : memref<2x128x128xf32, #tpu.memory_space<vmem>>, vector<1x128x128xf32>
      %161 = vector.shape_cast %160 : vector<1x128x128xf32> to vector<128x128xf32>
      %cst_79 = arith.constant dense<0.000000e+00> : vector<128x128xf32>
      %162 = tpu.matmul %159, %161, %cst_79 {dimension_numbers = #tpu.dot_dimension_numbers<[1], [0], [0], [1], [0, 0, 1, 1], [], []>} : vector<128x128xf32>, vector<128x128xf32>, vector<128x128xf32> -> vector<128x128xf32>
      %c1_80 = arith.constant 1 : index
      %c0_81 = arith.constant 0 : index
      %c0_82 = arith.constant 0 : index
      %163 = vector.load %arg3[%c1_80, %c0_81, %c0_82] : memref<2x1x128xf32, #tpu.memory_space<vmem>>, vector<1x1x128xf32>
      %164 = vector.shape_cast %163 : vector<1x1x128xf32> to vector<1x128xf32>
      %165 = vector.broadcast %164 : vector<1x128xf32> to vector<128x128xf32>
      %166 = arith.addf %162, %165 : vector<128x128xf32>
      %cst_83 = arith.constant 0.000000e+00 : f32
      %167 = vector.broadcast %cst_83 : f32 to vector<128x128xf32>
      %168 = arith.maximumf %166, %167 : vector<128x128xf32>
      %c1_84 = arith.constant 1 : index
      %c0_85 = arith.constant 0 : index
      %c0_86 = arith.constant 0 : index
      %169 = vector.load %arg10[%c1_84, %c0_85, %c0_86] : memref<2x128x128xf32, #tpu.memory_space<vmem>>, vector<1x128x128xf32>
      %170 = vector.shape_cast %169 : vector<1x128x128xf32> to vector<128x128xf32>
      %171 = vector.shape_cast %168 : vector<128x128xf32> to vector<1x128x128xf32>
      tpu.vector_store %arg10[%c1_84, %c0_85, %c0_86], %171 {strides = array<i32>} : memref<2x128x128xf32, #tpu.memory_space<vmem>>, vector<1x128x128xf32>,
      %c1_87 = arith.constant 1 : index
      %c0_88 = arith.constant 0 : index
      %c0_89 = arith.constant 0 : index
      %172 = vector.load %arg11[%c1_87, %c0_88, %c0_89] : memref<2x128x128xf32, #tpu.memory_space<vmem>>, vector<1x128x128xf32>
      %173 = vector.shape_cast %172 : vector<1x128x128xf32> to vector<128x128xf32>
      %174 = vector.shape_cast %168 : vector<128x128xf32> to vector<1x128x128xf32>
      tpu.vector_store %arg11[%c1_87, %c0_88, %c0_89], %174 {strides = array<i32>} : memref<2x128x128xf32, #tpu.memory_space<vmem>>, vector<1x128x128xf32>,
    } else {
    }
    %c0 = arith.constant 0 : index
    %c0_1 = arith.constant 0 : index
    %c0_2 = arith.constant 0 : index
    %3 = vector.load %arg5[%c0, %c0_1, %c0_2] : memref<1x3x128xf32, #tpu.memory_space<vmem>>, vector<1x3x128xf32>
    %4 = vector.shape_cast %3 : vector<1x3x128xf32> to vector<3x128xf32>
    %c0_3 = arith.constant 0 : index
    %c0_4 = arith.constant 0 : index
    %c0_5 = arith.constant 0 : index
    %5 = vector.load %arg6[%c0_3, %c0_4, %c0_5] : memref<1x3x128xf32, #tpu.memory_space<vmem>>, vector<1x3x128xf32>
    %6 = vector.shape_cast %5 : vector<1x3x128xf32> to vector<3x128xf32>
    %c0_6 = arith.constant 0 : index
    %c0_7 = arith.constant 0 : index
    %c0_8 = arith.constant 0 : index
    %7 = vector.load %arg10[%c0_6, %c0_7, %c0_8] : memref<2x128x128xf32, #tpu.memory_space<vmem>>, vector<1x128x128xf32>
    %8 = vector.shape_cast %7 : vector<1x128x128xf32> to vector<128x128xf32>
    %c1 = arith.constant 1 : index
    %c0_9 = arith.constant 0 : index
    %c0_10 = arith.constant 0 : index
    %9 = vector.load %arg10[%c1, %c0_9, %c0_10] : memref<2x128x128xf32, #tpu.memory_space<vmem>>, vector<1x128x128xf32>
    %10 = vector.shape_cast %9 : vector<1x128x128xf32> to vector<128x128xf32>
    %c0_11 = arith.constant 0 : index
    %c0_12 = arith.constant 0 : index
    %c0_13 = arith.constant 0 : index
    %11 = vector.load %arg11[%c0_11, %c0_12, %c0_13] : memref<2x128x128xf32, #tpu.memory_space<vmem>>, vector<1x128x128xf32>
    %12 = vector.shape_cast %11 : vector<1x128x128xf32> to vector<128x128xf32>
    %c1_14 = arith.constant 1 : index
    %c0_15 = arith.constant 0 : index
    %c0_16 = arith.constant 0 : index
    %13 = vector.load %arg11[%c1_14, %c0_15, %c0_16] : memref<2x128x128xf32, #tpu.memory_space<vmem>>, vector<1x128x128xf32>
    %14 = vector.shape_cast %13 : vector<1x128x128xf32> to vector<128x128xf32>
    %15 = vector.extract_strided_slice %4 {offsets = [0, 0], sizes = [1, 128], strides = [1, 1]} : vector<3x128xf32> to vector<1x128xf32>
    %16 = vector.extract_strided_slice %6 {offsets = [0, 0], sizes = [1, 128], strides = [1, 1]} : vector<3x128xf32> to vector<1x128xf32>
    %17 = vector.broadcast %15 : vector<1x128xf32> to vector<128x128xf32>
    %18 = arith.mulf %8, %17 : vector<128x128xf32>
    %cst = arith.constant dense<0.000000e+00> : vector<128xf32>
    %19 = vector.multi_reduction <add>, %18, %cst [1] : vector<128x128xf32> to vector<128xf32>
    %20 = vector.shape_cast %19 : vector<128xf32> to vector<128x1xf32>
    %21 = vector.broadcast %16 : vector<1x128xf32> to vector<128x128xf32>
    %22 = arith.mulf %8, %21 : vector<128x128xf32>
    %cst_17 = arith.constant dense<0.000000e+00> : vector<128xf32>
    %23 = vector.multi_reduction <add>, %22, %cst_17 [1] : vector<128x128xf32> to vector<128xf32>
    %24 = vector.shape_cast %23 : vector<128xf32> to vector<128x1xf32>
    %cst_18 = arith.constant dense<0.000000e+00> : vector<1x128xf32>
    %25 = tpu.matmul %16, %14, %cst_18 {dimension_numbers = #tpu.dot_dimension_numbers<[1], [1], [0], [0], [0, 0, 1, 0], [], []>} : vector<1x128xf32>, vector<128x128xf32>, vector<1x128xf32> -> vector<1x128xf32>
    %26 = arith.addf %20, %24 : vector<128x1xf32>
    %cst_19 = arith.constant 2.000000e-01 : f32
    %27 = vector.broadcast %cst_19 : f32 to vector<128x1xf32>
    %28 = arith.mulf %27, %26 : vector<128x1xf32>
    %29 = arith.maximumf %26, %28 : vector<128x1xf32>
    %30 = math.exp %29 : vector<128x1xf32>
    %c0_20 = arith.constant 0 : index
    %c0_21 = arith.constant 0 : index
    %c0_22 = arith.constant 0 : index
    %31 = vector.load %arg4[%c0_20, %c0_21, %c0_22] : memref<3x128x128xf32, #tpu.memory_space<vmem>>, vector<1x128x128xf32>
    %32 = vector.shape_cast %31 : vector<1x128x128xf32> to vector<128x128xf32>
    %33 = vector.broadcast %20 : vector<128x1xf32> to vector<128x128xf32>
    %34 = vector.broadcast %25 : vector<1x128xf32> to vector<128x128xf32>
    %35 = arith.addf %33, %34 : vector<128x128xf32>
    %cst_23 = arith.constant 2.000000e-01 : f32
    %36 = vector.broadcast %cst_23 : f32 to vector<128x128xf32>
    %37 = arith.mulf %36, %35 : vector<128x128xf32>
    %38 = arith.maximumf %35, %37 : vector<128x128xf32>
    %39 = math.exp %38 : vector<128x128xf32>
    %40 = arith.mulf %32, %39 : vector<128x128xf32>
    %cst_24 = arith.constant dense<0.000000e+00> : vector<128x128xf32>
    %41 = tpu.matmul %40, %14, %cst_24 {dimension_numbers = #tpu.dot_dimension_numbers<[1], [0], [0], [1], [0, 0, 1, 1], [], []>} : vector<128x128xf32>, vector<128x128xf32>, vector<128x128xf32> -> vector<128x128xf32>
    %42 = vector.broadcast %30 : vector<128x1xf32> to vector<128x128xf32>
    %43 = arith.mulf %42, %8 : vector<128x128xf32>
    %44 = arith.addf %41, %43 : vector<128x128xf32>
    %cst_25 = arith.constant dense<0.000000e+00> : vector<128xf32>
    %45 = vector.multi_reduction <add>, %40, %cst_25 [1] : vector<128x128xf32> to vector<128xf32>
    %46 = vector.shape_cast %45 : vector<128xf32> to vector<128x1xf32>
    %47 = arith.addf %46, %30 : vector<128x1xf32>
    %48 = vector.extract_strided_slice %4 {offsets = [1, 0], sizes = [1, 128], strides = [1, 1]} : vector<3x128xf32> to vector<1x128xf32>
    %49 = vector.extract_strided_slice %6 {offsets = [1, 0], sizes = [1, 128], strides = [1, 1]} : vector<3x128xf32> to vector<1x128xf32>
    %50 = vector.broadcast %48 : vector<1x128xf32> to vector<128x128xf32>
    %51 = arith.mulf %10, %50 : vector<128x128xf32>
    %cst_26 = arith.constant dense<0.000000e+00> : vector<128xf32>
    %52 = vector.multi_reduction <add>, %51, %cst_26 [1] : vector<128x128xf32> to vector<128xf32>
    %53 = vector.shape_cast %52 : vector<128xf32> to vector<128x1xf32>
    %54 = vector.broadcast %49 : vector<1x128xf32> to vector<128x128xf32>
    %55 = arith.mulf %10, %54 : vector<128x128xf32>
    %cst_27 = arith.constant dense<0.000000e+00> : vector<128xf32>
    %56 = vector.multi_reduction <add>, %55, %cst_27 [1] : vector<128x128xf32> to vector<128xf32>
    %57 = vector.shape_cast %56 : vector<128xf32> to vector<128x1xf32>
    %cst_28 = arith.constant dense<0.000000e+00> : vector<1x128xf32>
    %58 = tpu.matmul %49, %12, %cst_28 {dimension_numbers = #tpu.dot_dimension_numbers<[1], [1], [0], [0], [0, 0, 1, 0], [], []>} : vector<1x128xf32>, vector<128x128xf32>, vector<1x128xf32> -> vector<1x128xf32>
    %59 = arith.addf %53, %57 : vector<128x1xf32>
    %cst_29 = arith.constant 2.000000e-01 : f32
    %60 = vector.broadcast %cst_29 : f32 to vector<128x1xf32>
    %61 = arith.mulf %60, %59 : vector<128x1xf32>
    %62 = arith.maximumf %59, %61 : vector<128x1xf32>
    %63 = math.exp %62 : vector<128x1xf32>
    %c1_30 = arith.constant 1 : index
    %c0_31 = arith.constant 0 : index
    %c0_32 = arith.constant 0 : index
    %64 = vector.load %arg4[%c1_30, %c0_31, %c0_32] : memref<3x128x128xf32, #tpu.memory_space<vmem>>, vector<1x128x128xf32>
    %65 = vector.shape_cast %64 : vector<1x128x128xf32> to vector<128x128xf32>
    %66 = vector.broadcast %53 : vector<128x1xf32> to vector<128x128xf32>
    %67 = vector.broadcast %58 : vector<1x128xf32> to vector<128x128xf32>
    %68 = arith.addf %66, %67 : vector<128x128xf32>
    %cst_33 = arith.constant 2.000000e-01 : f32
    %69 = vector.broadcast %cst_33 : f32 to vector<128x128xf32>
    %70 = arith.mulf %69, %68 : vector<128x128xf32>
    %71 = arith.maximumf %68, %70 : vector<128x128xf32>
    %72 = math.exp %71 : vector<128x128xf32>
    %73 = arith.mulf %65, %72 : vector<128x128xf32>
    %cst_34 = arith.constant dense<0.000000e+00> : vector<128x128xf32>
    %74 = tpu.matmul %73, %12, %cst_34 {dimension_numbers = #tpu.dot_dimension_numbers<[1], [0], [0], [1], [0, 0, 1, 1], [], []>} : vector<128x128xf32>, vector<128x128xf32>, vector<128x128xf32> -> vector<128x128xf32>
    %75 = vector.broadcast %63 : vector<128x1xf32> to vector<128x128xf32>
    %76 = arith.mulf %75, %10 : vector<128x128xf32>
    %77 = arith.addf %74, %76 : vector<128x128xf32>
    %cst_35 = arith.constant dense<0.000000e+00> : vector<128xf32>
    %78 = vector.multi_reduction <add>, %73, %cst_35 [1] : vector<128x128xf32> to vector<128xf32>
    %79 = vector.shape_cast %78 : vector<128xf32> to vector<128x1xf32>
    %80 = arith.addf %79, %63 : vector<128x1xf32>
    %81 = vector.extract_strided_slice %4 {offsets = [2, 0], sizes = [1, 128], strides = [1, 1]} : vector<3x128xf32> to vector<1x128xf32>
    %82 = vector.extract_strided_slice %6 {offsets = [2, 0], sizes = [1, 128], strides = [1, 1]} : vector<3x128xf32> to vector<1x128xf32>
    %83 = vector.broadcast %81 : vector<1x128xf32> to vector<128x128xf32>
    %84 = arith.mulf %8, %83 : vector<128x128xf32>
    %cst_36 = arith.constant dense<0.000000e+00> : vector<128xf32>
    %85 = vector.multi_reduction <add>, %84, %cst_36 [1] : vector<128x128xf32> to vector<128xf32>
    %86 = vector.shape_cast %85 : vector<128xf32> to vector<128x1xf32>
    %87 = vector.broadcast %82 : vector<1x128xf32> to vector<128x128xf32>
    %88 = arith.mulf %8, %87 : vector<128x128xf32>
    %cst_37 = arith.constant dense<0.000000e+00> : vector<128xf32>
    %89 = vector.multi_reduction <add>, %88, %cst_37 [1] : vector<128x128xf32> to vector<128xf32>
    %90 = vector.shape_cast %89 : vector<128xf32> to vector<128x1xf32>
    %cst_38 = arith.constant dense<0.000000e+00> : vector<1x128xf32>
    %91 = tpu.matmul %82, %12, %cst_38 {dimension_numbers = #tpu.dot_dimension_numbers<[1], [1], [0], [0], [0, 0, 1, 0], [], []>} : vector<1x128xf32>, vector<128x128xf32>, vector<1x128xf32> -> vector<1x128xf32>
    %92 = arith.addf %86, %90 : vector<128x1xf32>
    %cst_39 = arith.constant 2.000000e-01 : f32
    %93 = vector.broadcast %cst_39 : f32 to vector<128x1xf32>
    %94 = arith.mulf %93, %92 : vector<128x1xf32>
    %95 = arith.maximumf %92, %94 : vector<128x1xf32>
    %96 = math.exp %95 : vector<128x1xf32>
    %c2 = arith.constant 2 : index
    %c0_40 = arith.constant 0 : index
    %c0_41 = arith.constant 0 : index
    %97 = vector.load %arg4[%c2, %c0_40, %c0_41] : memref<3x128x128xf32, #tpu.memory_space<vmem>>, vector<1x128x128xf32>
    %98 = vector.shape_cast %97 : vector<1x128x128xf32> to vector<128x128xf32>
    %99 = vector.broadcast %86 : vector<128x1xf32> to vector<128x128xf32>
    %100 = vector.broadcast %91 : vector<1x128xf32> to vector<128x128xf32>
    %101 = arith.addf %99, %100 : vector<128x128xf32>
    %cst_42 = arith.constant 2.000000e-01 : f32
    %102 = vector.broadcast %cst_42 : f32 to vector<128x128xf32>
    %103 = arith.mulf %102, %101 : vector<128x128xf32>
    %104 = arith.maximumf %101, %103 : vector<128x128xf32>
    %105 = math.exp %104 : vector<128x128xf32>
    %106 = arith.mulf %98, %105 : vector<128x128xf32>
    %cst_43 = arith.constant dense<0.000000e+00> : vector<128x128xf32>
    %107 = tpu.matmul %106, %12, %cst_43 {dimension_numbers = #tpu.dot_dimension_numbers<[1], [0], [0], [1], [0, 0, 1, 1], [], []>} : vector<128x128xf32>, vector<128x128xf32>, vector<128x128xf32> -> vector<128x128xf32>
    %108 = vector.broadcast %96 : vector<128x1xf32> to vector<128x128xf32>
    %109 = arith.mulf %108, %8 : vector<128x128xf32>
    %110 = arith.addf %107, %109 : vector<128x128xf32>
    %cst_44 = arith.constant dense<0.000000e+00> : vector<128xf32>
    %111 = vector.multi_reduction <add>, %106, %cst_44 [1] : vector<128x128xf32> to vector<128xf32>
    %112 = vector.shape_cast %111 : vector<128xf32> to vector<128x1xf32>
    %113 = arith.addf %112, %96 : vector<128x1xf32>
    %114 = arith.addf %44, %110 : vector<128x128xf32>
    %115 = arith.addf %47, %113 : vector<128x1xf32>
    %116 = vector.broadcast %115 : vector<128x1xf32> to vector<128x128xf32>
    %117 = arith.divf %114, %116 : vector<128x128xf32>
    %cst_45 = arith.constant 0.000000e+00 : f32
    %118 = vector.broadcast %cst_45 : f32 to vector<128x128xf32>
    %119 = arith.cmpf ogt, %117, %118 : vector<128x128xf32>
    %120 = math.exp %117 : vector<128x128xf32>
    %cst_46 = arith.constant 1.000000e+00 : f32
    %121 = vector.broadcast %cst_46 : f32 to vector<128x128xf32>
    %122 = arith.subf %120, %121 : vector<128x128xf32>
    %123 = arith.select %119, %117, %122 : vector<128x128xi1>, vector<128x128xf32>
    %c0_47 = arith.constant 0 : index
    %c0_48 = arith.constant 0 : index
    %c0_49 = arith.constant 0 : index
    %124 = vector.load %arg11[%c0_47, %c0_48, %c0_49] : memref<2x128x128xf32, #tpu.memory_space<vmem>>, vector<1x128x128xf32>
    %125 = vector.shape_cast %124 : vector<1x128x128xf32> to vector<128x128xf32>
    %126 = vector.shape_cast %123 : vector<128x128xf32> to vector<1x128x128xf32>
    tpu.vector_store %arg11[%c0_47, %c0_48, %c0_49], %126 {strides = array<i32>} : memref<2x128x128xf32, #tpu.memory_space<vmem>>, vector<1x128x128xf32>,
    %127 = vector.broadcast %80 : vector<128x1xf32> to vector<128x128xf32>
    %128 = arith.divf %77, %127 : vector<128x128xf32>
    %cst_50 = arith.constant 0.000000e+00 : f32
    %129 = vector.broadcast %cst_50 : f32 to vector<128x128xf32>
    %130 = arith.cmpf ogt, %128, %129 : vector<128x128xf32>
    %131 = math.exp %128 : vector<128x128xf32>
    %cst_51 = arith.constant 1.000000e+00 : f32
    %132 = vector.broadcast %cst_51 : f32 to vector<128x128xf32>
    %133 = arith.subf %131, %132 : vector<128x128xf32>
    %134 = arith.select %130, %128, %133 : vector<128x128xi1>, vector<128x128xf32>
    %c1_52 = arith.constant 1 : index
    %c0_53 = arith.constant 0 : index
    %c0_54 = arith.constant 0 : index
    %135 = vector.load %arg11[%c1_52, %c0_53, %c0_54] : memref<2x128x128xf32, #tpu.memory_space<vmem>>, vector<1x128x128xf32>
    %136 = vector.shape_cast %135 : vector<1x128x128xf32> to vector<128x128xf32>
    %137 = vector.shape_cast %134 : vector<128x128xf32> to vector<1x128x128xf32>
    tpu.vector_store %arg11[%c1_52, %c0_53, %c0_54], %137 {strides = array<i32>} : memref<2x128x128xf32, #tpu.memory_space<vmem>>, vector<1x128x128xf32>,
    %c2_i32 = arith.constant 2 : i32
    %138 = arith.cmpi eq, %arg0, %c2_i32 : i32
    %139 = arith.extui %138 : i1 to i32
    %c0_i32_55 = arith.constant 0 : i32
    %140 = arith.cmpi ne, %139, %c0_i32_55 : i32
    scf.if %140 {
      %c0_56 = arith.constant 0 : index
      %c0_57 = arith.constant 0 : index
      %141 = vector.load %arg7[%c0_56, %c0_57] : memref<128x128xf32, #tpu.memory_space<vmem>>, vector<128x128xf32>
      %cst_58 = arith.constant dense<0.000000e+00> : vector<128x128xf32>
      %142 = tpu.matmul %123, %141, %cst_58 {dimension_numbers = #tpu.dot_dimension_numbers<[1], [0], [0], [1], [0, 0, 1, 1], [], []>} : vector<128x128xf32>, vector<128x128xf32>, vector<128x128xf32> -> vector<128x128xf32>
      %c0_59 = arith.constant 0 : index
      %c0_60 = arith.constant 0 : index
      %143 = vector.load %arg8[%c0_59, %c0_60] : memref<1x128xf32, #tpu.memory_space<vmem>>, vector<1x128xf32>
      %144 = vector.broadcast %143 : vector<1x128xf32> to vector<128x128xf32>
      %145 = arith.addf %142, %144 : vector<128x128xf32>
      %c0_61 = arith.constant 0 : index
      %c0_62 = arith.constant 0 : index
      %146 = vector.load %arg9[%c0_61, %c0_62] : memref<128x128xf32, #tpu.memory_space<vmem>>, vector<128x128xf32>
      tpu.vector_store %arg9[%c0_61, %c0_62], %145 {strides = array<i32>} : memref<128x128xf32, #tpu.memory_space<vmem>>, vector<128x128xf32>,
    } else {
    }
    return
  }
  func.func @transform_0(%arg0: i32) -> (i32, i32, i32) {
    %c0_i32 = arith.constant 0 : i32
    %c0_i32_0 = arith.constant 0 : i32
    %c0_i32_1 = arith.constant 0 : i32
    %c0_i32_2 = arith.constant 0 : i32
    return %c0_i32, %c0_i32_0, %c0_i32_1 : i32, i32, i32
  }
  func.func @transform_1(%arg0: i32) -> (i32, i32, i32) {
    %c0_i32 = arith.constant 0 : i32
    %c0_i32_0 = arith.constant 0 : i32
    %c0_i32_1 = arith.constant 0 : i32
    %c0_i32_2 = arith.constant 0 : i32
    return %c0_i32, %c0_i32_0, %c0_i32_1 : i32, i32, i32
  }
  func.func @transform_2(%arg0: i32) -> (i32, i32, i32) {
    %c0_i32 = arith.constant 0 : i32
    %c0_i32_0 = arith.constant 0 : i32
    %c0_i32_1 = arith.constant 0 : i32
    %c0_i32_2 = arith.constant 0 : i32
    return %c0_i32, %c0_i32_0, %c0_i32_1 : i32, i32, i32
  }
  func.func @transform_3(%arg0: i32) -> (i32, i32, i32) {
    %c0_i32 = arith.constant 0 : i32
    %c0_i32_0 = arith.constant 0 : i32
    %c0_i32_1 = arith.constant 0 : i32
    %c0_i32_2 = arith.constant 0 : i32
    return %c0_i32, %c0_i32_0, %c0_i32_1 : i32, i32, i32
  }
  func.func @transform_4(%arg0: i32) -> (i32, i32, i32) {
    %c0_i32 = arith.constant 0 : i32
    %c0_i32_0 = arith.constant 0 : i32
    %c0_i32_1 = arith.constant 0 : i32
    return %arg0, %c0_i32, %c0_i32_0 : i32, i32, i32
  }
  func.func @transform_5(%arg0: i32) -> (i32, i32, i32) {
    %c0_i32 = arith.constant 0 : i32
    %c0_i32_0 = arith.constant 0 : i32
    %c0_i32_1 = arith.constant 0 : i32
    return %arg0, %c0_i32, %c0_i32_0 : i32, i32, i32
  }
  func.func @transform_6(%arg0: i32) -> (i32, i32) {
    %c0_i32 = arith.constant 0 : i32
    %c0_i32_0 = arith.constant 0 : i32
    %c0_i32_1 = arith.constant 0 : i32
    return %c0_i32, %c0_i32_0 : i32, i32
  }
  func.func @transform_7(%arg0: i32) -> (i32, i32) {
    %c0_i32 = arith.constant 0 : i32
    %c0_i32_0 = arith.constant 0 : i32
    %c0_i32_1 = arith.constant 0 : i32
    return %c0_i32, %c0_i32_0 : i32, i32
  }
  func.func @transform_8(%arg0: i32) -> (i32, i32) {
    %c0_i32 = arith.constant 0 : i32
    %c0_i32_0 = arith.constant 0 : i32
    %c0_i32_1 = arith.constant 0 : i32
    return %c0_i32, %c0_i32_0 : i32, i32
  }
}

</mosaic_0001>

<bundles_post_ra>
// kernel: tpu_custom_call.1
= control target key start
LH: loop header
LB: loop body
LE: loop exit
PB: predicated region body
PF: predicated region fallthrough
CT: control target
= control target key end

     0   :  { %13 = vsyncpa [#allocation5], 0  ;;  %s6603_s0 = inlined_call_operand.hbm [shape: f32[2,128,128], index: 0, kind: input, shape index: {}]   ;;  %s6604_s1 = inlined_call_operand.hbm [shape: f32[2,128,128], index: 1, kind: input, shape index: {}]   ;;  %s6605_s2 = inlined_call_operand.vmem [shape: f32[2,1,128], index: 2, kind: input, shape index: {}]   ;;  %s6606_s3 = inlined_call_operand.hbm [shape: f32[3,128,128], index: 3, kind: input, shape index: {}]   ;;  %s6607_s4 = inlined_call_operand.vmem [shape: f32[3,3,128], index: 4, kind: input, shape index: {}]   ;;  %s6608_s5 = inlined_call_operand.hbm [shape: f32[3,3,128], index: 5, kind: input, shape index: {}]   ;;  %s6609_s6 = inlined_call_operand.hbm [shape: f32[128,128], index: 6, kind: input, shape index: {}]   ;;  %s6610_s7 = inlined_call_operand.vmem [shape: f32[1,128], index: 7, kind: input, shape index: {}]   ;;  %s6611_s8 = inlined_call_operand.hbm [shape: f32[128,128], index: 8, kind: output, shape index: {}]  }
   0x1   :  { %14 = vsyncpa [#allocation8], 0 }
   0x2   :  { %15 = vsyncpa [#allocation11], 0 }
   0x3   :  { %17 = vsyncpa [#allocation11 + $0x1], 0 }
   0x4   :  { %18 = vsyncpa [#allocation6], 0  ;;  %s5051_s27 = smov 0   ;;  %s5053_s28 = smov 0  }
   0x5   :  { %s5055_s29 = smov 0   ;;  %s5057_s30 = smov 0  }
   0x6 LB: > { %s5072_s9 = sadd.s32 4294967295, %s4991_s30   ;;  %p3257_p0 = scmp.ge.s32.totalorder %s4991_s30, 1  ;;  %s4991_s30 = sphi %s5057_s30, %s6894_s30   ;;  %s4987_s29 = sphi %s5055_s29, %s6893_s29   ;;  %s4983_s28 = sphi %s5053_s28, %s6892_s28   ;;  %s4979_s27 = sphi %s5051_s27, %s6891_s27  }
   0x7   : > { %p6612_p1 = scmp.eq.s32.totalorder %s5072_s9, 0  ;;  %p228_p2 = scmp.lt.s32.totalorder %s4991_s30, 4 }
   0x8   : > { %s4993_s11 = smov [#allocation7]   ;;  %s4994_s13 = smov [#allocation12]  }
   0x9   : > { %p5078_p4 = pnand %p3257_p0, %p228_p2  ;;  %s253_s12 = sshll.u32 %s4993_s11, 4  ;;  %s5082_s12 = int_to_ptr.vmem [resolvable:$true] %s253_s12 }
   0xa   : > { %s282_s14 = sshll.u32 %s4994_s13, 4  ;;  %s4995_s16 = smov [#allocation4]   ;;  %s5092_s14 = int_to_ptr.vmem [resolvable:$true] %s282_s14 }
   0xb   : > { %s6682_s10 = scalar_select %p5078_p4, 1, 0 }
   0xc   : > { %p4348_p5 = pneg %p5078_p4  ;;  %s240_s17 = sshll.u32 %s4995_s16, 4  ;;  %s5094_s17 = int_to_ptr.vmem [resolvable:$true] %s240_s17 }
   0xd   : > { %s4773_s20 = scalar_lea.hbm %s6604_s1, 4096 }
   0xe   : > { %p5088_p6 = pnand %p4348_p5, %p6612_p1  ;;  %p4774_p7 = scmp.ne.s32.totalorder %s6604_s1, %s4773_s20 }
   0xf   : > { %p4780_p11 = scmp.lt.u32.totalorder %s4773_s20, %s6604_s1 }
  0x10   : > { %p5104_p8 = pneg %p5088_p6 }
  0x12   : > { %p4776_p9 = pnand %p5104_p8, %p4774_p7 }
  0x14   : > { %p4777_p10 = pneg %p4776_p9 }
  0x16   : > { %p4782_p12 = pnand %p4780_p11, %p4777_p10 }
  0x18   : > { %4785 = shalt.err (!%p4782_p12)
}
  0x19   : > { %s4786_s26 = scalar_lea.vmem %s5082_s12, 4096  ;;  %p4794_p5 = scmp.lt.s32.totalorder %s5082_s12, %s5082_s12 }
  0x1a   : > { %p4787_p13 = scmp.ne.s32.totalorder %s5082_s12, %s4786_s26  ;;  %p4795_p3 = scmp.lt.s32.totalorder %s4786_s26, %s4786_s26 }
  0x1c   : > { %p4789_p0 = pnand %p4787_p13, %p5104_p8  ;;  %p4796_p7 = por %p4795_p3, %p4794_p5 }
  0x1e   : > { %p4790_p2 = pneg %p4789_p0 }
  0x20   : > { %p4797_p9 = pnand %p4796_p7, %p4790_p2 }
  0x22   : > { %4800 = shalt.err (!%p4797_p9)
}
  0x23   : > { %s4996_s11 = smov 128   ;;  %s4997_s13 = smov 8  }
  0x24   : > { %4354 = dma.hbm_to_vmem [thread:$0]  (!%p5088_p6), %s6604_s1, 4096, %s5082_s12, [#allocation8], %s4996_s11, %s4996_s11, %s4997_s13  }
  0x25   : > { %s4801_s21 = scalar_lea.hbm %s6609_s6, 2048 }
  0x26   : > { %p4802_p3 = scmp.ne.s32.totalorder %s6609_s6, %s4801_s21  ;;  %p4808_p12 = scmp.lt.u32.totalorder %s4801_s21, %s6609_s6 }
  0x28   : > { %p4804_p10 = pnand %p4802_p3, %p5104_p8 }
  0x2a   : > { %p4805_p11 = pneg %p4804_p10 }
  0x2c   : > { %p4810_p13 = pnand %p4808_p12, %p4805_p11 }
  0x2e   : > { %4813 = shalt.err (!%p4810_p13)
}
  0x2f   : > { %s4814_s12 = scalar_lea.vmem %s5092_s14, 2048  ;;  %p4822_p7 = scmp.lt.s32.totalorder %s5092_s14, %s5092_s14 }
  0x30   : > { %p4815_p0 = scmp.ne.s32.totalorder %s5092_s14, %s4814_s12  ;;  %p4823_p9 = scmp.lt.s32.totalorder %s4814_s12, %s4814_s12 }
  0x32   : > { %p4817_p2 = pnand %p4815_p0, %p5104_p8  ;;  %p4824_p3 = por %p4823_p9, %p4822_p7 }
  0x34   : > { %p4818_p5 = pneg %p4817_p2 }
  0x36   : > { %p4825_p10 = pnand %p4824_p3, %p4818_p5 }
  0x38   : > { %4828 = shalt.err (!%p4825_p10)
}
  0x39   : > { %4360 = dma.hbm_to_vmem [thread:$0]  (!%p5088_p6), %s6609_s6, 2048, %s5092_s14, [#allocation11], %s4996_s11, %s4996_s11, %s4997_s13  }
  0x3a   : > { %s4829_s21 = scalar_lea.hbm %s6603_s0, 4096 }
  0x3b   : > { %p4830_p11 = scmp.ne.s32.totalorder %s6603_s0, %s4829_s21  ;;  %p4836_p0 = scmp.lt.u32.totalorder %s4829_s21, %s6603_s0 }
  0x3d   : > { %p4832_p12 = pnand %p4830_p11, %p5104_p8 }
  0x3f   : > { %p4833_p13 = pneg %p4832_p12 }
  0x41   : > { %p4838_p2 = pnand %p4836_p0, %p4833_p13 }
  0x43   : > { %4841 = shalt.err (!%p4838_p2)
}
  0x44   : > { %s4842_s14 = scalar_lea.vmem %s5094_s17, 4096  ;;  %p4850_p3 = scmp.lt.s32.totalorder %s5094_s17, %s5094_s17 }
  0x45   : > { %p4843_p5 = scmp.ne.s32.totalorder %s5094_s17, %s4842_s14  ;;  %p4851_p10 = scmp.lt.s32.totalorder %s4842_s14, %s4842_s14 }
  0x47   : > { %p4845_p7 = pnand %p4843_p5, %p5104_p8  ;;  %p4852_p11 = por %p4851_p10, %p4850_p3 }
  0x49   : > { %p4846_p9 = pneg %p4845_p7 }
  0x4b   : > { %p4853_p12 = pnand %p4852_p11, %p4846_p9 }
  0x4d   : > { %4856 = shalt.err (!%p4853_p12)
}
  0x4e   : > { %4351 = dma.hbm_to_vmem [thread:$0]  (!%p5088_p6), %s6603_s0, 4096, %s5094_s17, [#allocation5], %s4996_s11, %s4996_s11, %s4997_s13  }
  0x4f   : > { %s4998_s18 = smov [#allocation9]   ;;  %s4857_s22 = scalar_lea.hbm %s6606_s3, 6144 }
  0x50   : > { %s269_s19 = sshll.u32 %s4998_s18, 4  ;;  %p4858_p13 = scmp.ne.s32.totalorder %s6606_s3, %s4857_s22  ;;  %s270_s19 = int_to_ptr.vmem [resolvable:$true] %s269_s19 }
  0x51   : > { %p4864_p5 = scmp.lt.u32.totalorder %s4857_s22, %s6606_s3 }
  0x52   : > { %p4860_p0 = pnand %p4858_p13, %p5104_p8 }
  0x54   : > { %p4861_p2 = pneg %p4860_p0 }
  0x56   : > { %p4866_p7 = pnand %p4864_p5, %p4861_p2 }
  0x58   : > { %4869 = shalt.err (!%p4866_p7)
}
  0x59   : > { %s4870_s17 = scalar_lea.vmem %s270_s19, 6144  ;;  %p4878_p11 = scmp.lt.s32.totalorder %s270_s19, %s270_s19 }
  0x5a   : > { %p4871_p9 = scmp.ne.s32.totalorder %s270_s19, %s4870_s17  ;;  %p4879_p12 = scmp.lt.s32.totalorder %s4870_s17, %s4870_s17 }
  0x5c   : > { %p4873_p3 = pnand %p4871_p9, %p5104_p8  ;;  %p4880_p1 = por %p4879_p12, %p4878_p11 }
  0x5e   : > { %p4874_p10 = pneg %p4873_p3 }
  0x60   : > { %p4881_p4 = pnand %p4880_p1, %p4874_p10 }
  0x62   : > { %4884 = shalt.err (!%p4881_p4)
}
  0x63   : > { %4357 = dma.hbm_to_vmem [thread:$0]  (!%p5088_p6), %s6606_s3, 6144, %s270_s19, [#allocation8], %s4996_s11, %s4996_s11, %s4997_s13  }
  0x64   : > { %s5202_s15 = sadd.s32 1, %s4991_s30   ;;  %s141_s23 = sadd.s32 1, %s4987_s29 }
  0x65   : > { %s138_s18 = ssub.s32 %s4991_s30, %s5202_s15  ;;  %p148_p1 = scmp.ne.s32.totalorder %s4987_s29, %s4983_s28 }
  0x66   : > { %p139_p4 = scmp.eq.s32.totalorder %s138_s18, 0  ;;  %p149_p8 = scmp.eq.s32.totalorder %s4991_s30, 0 }
  0x67   : > { %p154_p13 = scmp.ne.s32.totalorder %s4983_s28, %s4979_s27  ;;  %p4369_p0 = scmp.lt.s32.totalorder %s4991_s30, 3 }
  0x68   : > { %s5214_s20 = scalar_select %p139_p4, %s4987_s29, %s141_s23  }
  0x69   : > { %p150_p2 = por %p149_p8, %p148_p1  ;;  %p6685_p5 = scmp.eq.s32.totalorder %s5072_s9, 0 }
  0x6a   : > { %s306_s22 = sand.u32 1, %s4991_s30   ;;  %s308_s11 = sand.u32 1, %s4987_s29  }
  0x6b   : > { %p5218_p7 = por %p6685_p5, %p154_p13  ;;  %s3263_s13 = sshll.u32 %s308_s11, 2 }
  0x6c   : > { %s3264_s19 = sshll.u32 %s4991_s30, 6  ;;  %s310_s27 = scalar_lea.vmem [#allocation10], %s3263_s13 }
  0x6d   : > { %s5228_s26 = scalar_lea.hbm %s6608_s5, %s3264_s19  ;;  %s317_s14 = sshll.u32 %s310_s27, 4  ;;  %s5230_s14 = int_to_ptr.vmem [resolvable:$true] %s317_s14 }
  0x6e   : > { %p5232_p6 = pnand %p4369_p0, %p150_p2  ;;  %s307_s30 = scalar_lea.sflag [#allocation11], %s306_s22 }
  0x6f   : > { %s4885_s12 = scalar_lea.hbm %s5228_s26, 64  ;;  %s4890_s18 = scalar_lea.hbm %s6608_s5, 192 }
  0x70   : > { %p4886_p9 = scmp.ne.s32.totalorder %s5228_s26, %s4885_s12  ;;  %p4887_p3 = pneg %p5232_p6 }
  0x71   : > { %p4891_p12 = scmp.lt.u32.totalorder %s5228_s26, %s6608_s5  ;;  %p4892_p1 = scmp.lt.u32.totalorder %s4890_s18, %s4885_s12 }
  0x72   : > { %p4888_p10 = pnand %p4887_p3, %p4886_p9  ;;  %p4894_p8 = scmp.lt.u32.totalorder %s4885_s12, %s5228_s26 }
  0x73   : > { %p4893_p4 = por %p4892_p1, %p4891_p12 }
  0x74   : > { %p4889_p11 = pneg %p4888_p10 }
  0x75   : > { %p4895_p13 = por %p4894_p8, %p4893_p4 }
  0x77   : > { %p4896_p0 = pnand %p4895_p13, %p4889_p11 }
  0x79   : > { %4899 = shalt.err (!%p4896_p0)
}
  0x7a   : > { %s4900_s22 = scalar_lea.vmem %s5230_s14, 64  ;;  %s4999_s19 = smov [#allocation10]  }
  0x7b   : > { %p4901_p2 = scmp.ne.s32.totalorder %s5230_s14, %s4900_s22  ;;  %s4905_s24 = sshll.u32 %s4999_s19, 4  ;;  %s4906_s24 = int_to_ptr.vmem [resolvable:$false] %s4905_s24 }
  0x7c   : > { %s4907_s25 = scalar_lea.vmem %s4906_s24, 128  ;;  %p4908_p10 = scmp.lt.s32.totalorder %s5230_s14, %s4906_s24 }
  0x7d   : > { %p4903_p5 = pnand %p4901_p2, %p4887_p3  ;;  %p4909_p12 = scmp.lt.s32.totalorder %s4907_s25, %s4900_s22 }
  0x7f   : > { %p4904_p9 = pneg %p4903_p5  ;;  %p4910_p1 = por %p4909_p12, %p4908_p10 }
  0x81   : > { %p4911_p4 = pnand %p4910_p1, %p4904_p9 }
  0x83   : > { %4914 = shalt.err (!%p4911_p4)
}
  0x84   : > { %4364 = dma.hbm_to_vmem [thread:$0]  (!%p5232_p6), %s5228_s26, 64, %s5230_s14, %s307_s30  }
  0x85   : > { %p6688_p11 = scmp.ne.s32.totalorder %s6682_s10, 0 }
  0x87   : > { %326 = sbr.rel (%p6688_p11) target bundleno = 1872 (0x750), region = 52 }
  0x8e   : > { %p6689_p3 = scmp.eq.s32.totalorder %s5072_s9, 0 }
  0x90   : > { %4958 = dma.done.wait (%p6689_p3), [#allocation5], 4096   ;;  %p6690_p8 = pmov %p6689_p3 }
  0x91   : > { %p6691_p13 = pmov %p6689_p3 }
  0x92   : > { %4960 = vsyncadd (%p6690_p8), [#allocation5], 4294963200 }
  0x93   : > { %4962 = dma.done.wait (%p6691_p13), [#allocation8], 10240   ;;  %p6692_p0 = pmov %p6689_p3 }
  0x94   : > { %s340_s27 = sand.u32 1, %s5072_s9   ;;  %s342_s26 = sand.u32 1, %s4983_s28  }
  0x95   : > { %4964 = vsyncadd (%p6692_p0), [#allocation8], 4294957056  ;;  %s5273_s14 = sshll.u32 %s342_s26, 2  ;;  %s341_s10 = scalar_lea.sflag [#allocation11], %s340_s27 }
  0x96   : > { %s344_s17 = scalar_lea.vmem [#allocation10], %s5273_s14 }
  0x97   : > { %4966 = dma.done.wait (%p5218_p7), %s341_s10, 64  }
  0x98   : > { %4968 = vsyncadd (%p5218_p7), %s341_s10, 4294967232  ;;  %p6693_p6 = pmov %p6692_p0 }
  0x99   : > { %p6694_p2 = pmov %p6692_p0 }
  0x9a   : > { %4970 = dma.done.wait (%p6693_p6), [#allocation11], 2048  }
  0x9b   : > { %4972 = vsyncadd (%p6694_p2), [#allocation11], 4294965248  ;;  %p380_p5 = scmp.lt.s32.totalorder %s5072_s9, 2  ;;  %p6695_p9 = scmp.ne.s32.totalorder %s5072_s9, 0 }
  0x9c   : > { %v404_v0 = vld [vmem:[#allocation7] sm:$0xff] (!%p6695_p9)  ;;  %v405_v1 = vld [vmem:[#allocation7 + $0x8] sm:$0xff] (!%p6695_p9)  ;;  %v406_v5 = vld [vmem:[#allocation7 + $0x10] sm:$0xff] (!%p6695_p9) }
  0x9d   : > { %s381_s30 = scalar_select %p380_p5, %s5072_s9, 2 }
  0x9e   : > { %387 = sbr.rel (%p6695_p9) target bundleno = 440 (0x1b8), region = 76  ;;  %v638_v2 = vld [vmem:[#allocation7 + $0x80] sm:$0xff] (!%p6695_p9)  ;;  %v3998_v3 = vpack.c.bf16 (!%p6695_p9), %v405_v1, %v404_v0  ;;  %v639_v4 = vld [vmem:[#allocation7 + $0x88] sm:$0xff] (!%p6695_p9)  ;;  %v407_v6 = vld [vmem:[#allocation7 + $0x18] sm:$0xff] (!%p6695_p9) }
  0x9f   : > { %s3271_s12 = sshll.u32 %s381_s30, 2  ;;  %v4030_v7 = vpack.c.bf16 (!%p6695_p9), %v639_v4, %v638_v2  ;;  %v4002_v8 = vpack.c.bf16 (!%p6695_p9), %v407_v6, %v406_v5  ;;  %v640_v9 = vld [vmem:[#allocation7 + $0x90] sm:$0xff] (!%p6695_p9)  ;;  %v641_v10 = vld [vmem:[#allocation7 + $0x98] sm:$0xff] (!%p6695_p9)  ;;  %v408_v11 = vld [vmem:[#allocation7 + $0x20] sm:$0xff] (!%p6695_p9) }
  0xa0   : > { %s5289_s18 = scalar_lea.vmem %s6607_s4, %s3271_s12  ;;  %3999 = vmatprep.subr.bf16.mxu0 (!%p6695_p9), %v3998_v3  ;;  %v4034_v12 = vpack.c.bf16 (!%p6695_p9), %v641_v10, %v640_v9  ;;  %v409_v13 = vld [vmem:[#allocation7 + $0x28] sm:$0xff] (!%p6695_p9)  ;;  %v642_v14 = vld [vmem:[#allocation7 + $0xa0] sm:$0xff] (!%p6695_p9)  ;;  %v410_v18 = vld [vmem:[#allocation7 + $0x30] sm:$0xff] (!%p6695_p9) }
  0xa1   : > { %v643_v15 = vld [vmem:[#allocation7 + $0xa8] sm:$0xff] (!%p6695_p9)  ;;  %4031 = vmatprep.subr.bf16.mxu1 (!%p6695_p9), %v4030_v7  ;;  %4001 = vmatpush3.bf16.msra.mxu0 (!%p6695_p9), %v3998_v3  ;;  %v4006_v16 = vpack.c.bf16 (!%p6695_p9), %v409_v13, %v408_v11  ;;  %v411_v19 = vld [vmem:[#allocation7 + $0x38] sm:$0xff] (!%p6695_p9)  ;;  %v644_v20 = vld [vmem:[#allocation7 + $0xb0] sm:$0xff] (!%p6695_p9) }
  0xa2   : > { %4033 = vmatpush3.bf16.msra.mxu1 (!%p6695_p9), %v4030_v7  ;;  %4003 = vmatprep.subr.bf16.mxu0 (!%p6695_p9), %v4002_v8  ;;  %v4038_v17 = vpack.c.bf16 (!%p6695_p9), %v643_v15, %v642_v14  ;;  %v645_v21 = vld [vmem:[#allocation7 + $0xb8] sm:$0xff] (!%p6695_p9)  ;;  %v4010_v22 = vpack.c.bf16 (!%p6695_p9), %v411_v19, %v410_v18  ;;  %v412_v24 = vld [vmem:[#allocation7 + $0x40] sm:$0xff] (!%p6695_p9)  ;;  %v413_v25 = vld [vmem:[#allocation7 + $0x48] sm:$0xff] (!%p6695_p9) }
  0xa3   : > { %4035 = vmatprep.subr.bf16.mxu1 (!%p6695_p9), %v4034_v12  ;;  %v4042_v23 = vpack.c.bf16 (!%p6695_p9), %v645_v21, %v644_v20  ;;  %v388_v26 = vld [vmem:[#allocation4] sm:$0xff] (!%p6695_p9)  ;;  %v647_v28 = vld [vmem:[#allocation7 + $0xc8] sm:$0xff] (!%p6695_p9)  ;;  %v4014_v30 = vpack.c.bf16 (!%p6695_p9), %v413_v25, %v412_v24  ;;  %v414_v32 = vld [vmem:[#allocation7 + $0x50] sm:$0xff] (!%p6695_p9) }
  0xa4   : > { %v646_v27 = vld [vmem:[#allocation7 + $0xc0] sm:$0xff] (!%p6695_p9)  ;;  %3589 = vmatprep.mubr.f32.mxu0 (!%p6695_p9), %v388_v26  ;;  %v415_v33 = vld [vmem:[#allocation7 + $0x58] sm:$0xff] (!%p6695_p9)  ;;  %v648_v34 = vld [vmem:[#allocation7 + $0xd0] sm:$0xff] (!%p6695_p9) }
  0xa5   : > { %4005 = vmatpush3.bf16.msra.mxu0 %v4002_v8  ;;  %v621_v29 = vld [vmem:[#allocation4 + $0x80] sm:$0xff]  ;;  %v4046_v31 = vpack.c.bf16 %v647_v28, %v646_v27  ;;  %v649_v35 = vld [vmem:[#allocation7 + $0xd8] sm:$0xff]  ;;  %v4018_v36 = vpack.c.bf16 %v415_v33, %v414_v32  ;;  %v417_v39 = vld [vmem:[#allocation7 + $0x68] sm:$0xff] }
  0xa6   : > { %4037 = vmatpush3.bf16.msra.mxu1 %v4034_v12  ;;  %4007 = vmatprep.subr.bf16.mxu0 %v4006_v16  ;;  %v4050_v37 = vpack.c.bf16 %v649_v35, %v648_v34  ;;  %v416_v38 = vld [vmem:[#allocation7 + $0x60] sm:$0xff]  ;;  %v651_v41 = vld [vmem:[#allocation7 + $0xe8] sm:$0xff]  ;;  %v418_v44 = vld [vmem:[#allocation7 + $0x70] sm:$0xff] }
  0xa7   : > { %4039 = vmatprep.subr.bf16.mxu1 %v4038_v17  ;;  %3645 = vmatprep.mubr.f32.mxu1 %v621_v29  ;;  %v650_v40 = vld [vmem:[#allocation7 + $0xe0] sm:$0xff]  ;;  %v4022_v42 = vpack.c.bf16 %v417_v39, %v416_v38  ;;  %v419_v45 = vld [vmem:[#allocation7 + $0x78] sm:$0xff]  ;;  %v652_v46 = vld [vmem:[#allocation7 + $0xf0] sm:$0xff] }
  0xa8   : > { %v4054_v43 = vpack.c.bf16 %v651_v41, %v650_v40  ;;  %v653_v47 = vld [vmem:[#allocation7 + $0xf8] sm:$0xff]  ;;  %v4026_v48 = vpack.c.bf16 %v419_v45, %v418_v44  ;;  %v389_v50 = vld [vmem:[#allocation4 + $0x8] sm:$0xff]  ;;  %v390_v52 = vld [vmem:[#allocation4 + $0x10] sm:$0xff] }
  0xa9   : > { %4009 = vmatpush3.bf16.msra.mxu0 %v4006_v16  ;;  %v4058_v49 = vpack.c.bf16 %v653_v47, %v652_v46  ;;  %v622_v51 = vld [vmem:[#allocation4 + $0x88] sm:$0xff]  ;;  %v623_v53 = vld [vmem:[#allocation4 + $0x90] sm:$0xff]  ;;  %v391_v54 = vld [vmem:[#allocation4 + $0x18] sm:$0xff] }
  0xaa   : > { %4041 = vmatpush3.bf16.msra.mxu1 %v4038_v17  ;;  %4011 = vmatprep.subr.bf16.mxu0 %v4010_v22  ;;  %v624_v55 = vld [vmem:[#allocation4 + $0x98] sm:$0xff]  ;;  %v392_v56 = vld [vmem:[#allocation4 + $0x20] sm:$0xff]  ;;  %v393_v58 = vld [vmem:[#allocation4 + $0x28] sm:$0xff] }
  0xab   : > { %4043 = vmatprep.subr.bf16.mxu1 %v4042_v23  ;;  %v625_v57 = vld [vmem:[#allocation4 + $0xa0] sm:$0xff]  ;;  %v626_v59 = vld [vmem:[#allocation4 + $0xa8] sm:$0xff]  ;;  %v394_v60 = vld [vmem:[#allocation4 + $0x30] sm:$0xff] }
  0xac   : > { %v627_v61 = vld [vmem:[#allocation4 + $0xb0] sm:$0xff]  ;;  %v395_v62 = vld [vmem:[#allocation4 + $0x38] sm:$0xff]  ;;  %v396_v0 = vld [vmem:[#allocation4 + $0x40] sm:$0xff] }
  0xad   : > { %4013 = vmatpush3.bf16.msra.mxu0 %v4010_v22  ;;  %v628_v63 = vld [vmem:[#allocation4 + $0xb8] sm:$0xff]  ;;  %v629_v1 = vld [vmem:[#allocation4 + $0xc0] sm:$0xff]  ;;  %v397_v2 = vld [vmem:[#allocation4 + $0x48] sm:$0xff] }
  0xae   : > { %4045 = vmatpush3.bf16.msra.mxu1 %v4042_v23  ;;  %4015 = vmatprep.subr.bf16.mxu0 %v4014_v30  ;;  %v630_v3 = vld [vmem:[#allocation4 + $0xc8] sm:$0xff]  ;;  %v398_v4 = vld [vmem:[#allocation4 + $0x50] sm:$0xff]  ;;  %v399_v6 = vld [vmem:[#allocation4 + $0x58] sm:$0xff] }
  0xaf   : > { %4047 = vmatprep.subr.bf16.mxu1 %v4046_v31  ;;  %v631_v5 = vld [vmem:[#allocation4 + $0xd0] sm:$0xff]  ;;  %v632_v7 = vld [vmem:[#allocation4 + $0xd8] sm:$0xff]  ;;  %v400_v8 = vld [vmem:[#allocation4 + $0x60] sm:$0xff] }
  0xb0   : > { %v633_v9 = vld [vmem:[#allocation4 + $0xe0] sm:$0xff]  ;;  %v401_v10 = vld [vmem:[#allocation4 + $0x68] sm:$0xff]  ;;  %v402_v12 = vld [vmem:[#allocation4 + $0x70] sm:$0xff] }
  0xb1   : > { %4017 = vmatpush3.bf16.msra.mxu0 %v4014_v30  ;;  %v634_v11 = vld [vmem:[#allocation4 + $0xe8] sm:$0xff]  ;;  %v635_v13 = vld [vmem:[#allocation4 + $0xf0] sm:$0xff]  ;;  %v403_v14 = vld [vmem:[#allocation4 + $0x78] sm:$0xff] }
  0xb2   : > { %4049 = vmatpush3.bf16.msra.mxu1 %v4046_v31  ;;  %4019 = vmatprep.subr.bf16.mxu0 %v4018_v36  ;;  %v636_v15 = vld [vmem:[#allocation4 + $0xf8] sm:$0xff]  ;;  %v5296_v16 = vld [vmem:[%s6605_s2] ss:$0 sm:$0xff]  ;;  %v5301_v17 = vld [vmem:[%s6605_s2 + $0x1] ss:$0 sm:$0xff] }
  0xb3   : > { %4051 = vmatprep.subr.bf16.mxu1 %v4050_v37 }
  0xb5   : > { %4021 = vmatpush3.bf16.msra.mxu0 %v4018_v36 }
  0xb6   : > { %4053 = vmatpush3.bf16.msra.mxu1 %v4050_v37  ;;  %4023 = vmatprep.subr.bf16.mxu0 %v4022_v42 }
  0xb7   : > { %4055 = vmatprep.subr.bf16.mxu1 %v4054_v43 }
  0xb9   : > { %4025 = vmatpush3.bf16.msra.mxu0 %v4022_v42 }
  0xba   : > { %4057 = vmatpush3.bf16.msra.mxu1 %v4054_v43  ;;  %4027 = vmatprep.subr.bf16.mxu0 %v4026_v48 }
  0xbb   : > { %4059 = vmatprep.subr.bf16.mxu1 %v4058_v49 }
  0xbd   : > { %4029 = vmatpush3.bf16.msra.mxu0 %v4026_v48 }
  0xbe   : > { %4061 = vmatpush3.bf16.msra.mxu1 %v4058_v49 }
  0xc0   : > { %3590 = vmatmul.mubr.f32.vlgmr.msra.gmra.mrb[0].mxu0 %v389_v50 }
  0xc1   : > { %3646 = vmatmul.mubr.f32.vlgmr.msra.gmra.mrb[0].mxu1 %v622_v51  ;;  %3592 = vmatprep.mubr.f32.mxu0 %v390_v52 }
  0xc2   : > { %3648 = vmatprep.mubr.f32.mxu1 %v623_v53 }
  0xc4   : > { %3593 = vmatmul.mubr.f32.gmra.mrb[2].mxu0 %v391_v54 }
  0xc5   : > { %3649 = vmatmul.mubr.f32.gmra.mrb[2].mxu1 %v624_v55  ;;  %3595 = vmatprep.mubr.f32.mxu0 %v392_v56 }
  0xc6   : > { %3651 = vmatprep.mubr.f32.mxu1 %v625_v57 }
  0xc8   : > { %3596 = vmatmul.mubr.f32.gmra.mrb[4].mxu0 %v393_v58 }
  0xc9   : > { %3652 = vmatmul.mubr.f32.gmra.mrb[4].mxu1 %v626_v59  ;;  %3598 = vmatprep.mubr.f32.mxu0 %v394_v60 }
  0xca   : > { %3654 = vmatprep.mubr.f32.mxu1 %v627_v61 }
  0xcc   : > { %3599 = vmatmul.mubr.f32.gmra.mrb[6].mxu0 %v395_v62 }
  0xcd   : > { %3655 = vmatmul.mubr.f32.gmra.mrb[6].mxu1 %v628_v63  ;;  %3601 = vmatprep.mubr.f32.mxu0 %v396_v0 }
  0xce   : > { %3657 = vmatprep.mubr.f32.mxu1 %v629_v1 }
  0xd0   : > { %3602 = vmatmul.mubr.f32.gmra.mrb[8].mxu0 %v397_v2 }
  0xd1   : > { %3658 = vmatmul.mubr.f32.gmra.mrb[8].mxu1 %v630_v3  ;;  %3604 = vmatprep.mubr.f32.mxu0 %v398_v4 }
  0xd2   : > { %3660 = vmatprep.mubr.f32.mxu1 %v631_v5 }
  0xd4   : > { %3605 = vmatmul.mubr.f32.gmra.mrb[10].mxu0 %v399_v6 }
  0xd5   : > { %3661 = vmatmul.mubr.f32.gmra.mrb[10].mxu1 %v632_v7  ;;  %3607 = vmatprep.mubr.f32.mxu0 %v400_v8 }
  0xd6   : > { %3663 = vmatprep.mubr.f32.mxu1 %v633_v9 }
  0xd8   : > { %3608 = vmatmul.mubr.f32.gmra.mrb[12].mxu0 %v401_v10 }
  0xd9   : > { %3664 = vmatmul.mubr.f32.gmra.mrb[12].mxu1 %v634_v11  ;;  %3610 = vmatprep.mubr.f32.mxu0 %v402_v12 }
  0xda   : > { %3666 = vmatprep.mubr.f32.mxu1 %v635_v13 }
  0xdc   : > { %3611 = vmatmul.mubr.f32.gmra.mrb[14].mxu0 %v403_v14 }
  0xdd   : > { %3667 = vmatmul.mubr.f32.gmra.mrb[14].mxu1 %v636_v15 }
 0x193   : > { %v3591_v18 = vpop.f32.mrb[0].mxu0 }
 0x194   : > { %v499_v19 = vadd.f32 %v3591_v18, %v5296_v16  ;;  %v3647_v20 = vpop.f32.mrb[0].mxu1  ;;  %v493_v21 = vpop.f32.mrb[1].mxu0 }
 0x195   : > { %v734_v22 = vadd.f32 %v3647_v20, %v5301_v17  ;;  %v494_v23 = vadd.f32 %v5296_v16, %v493_v21  ;;  %v728_v24 = vpop.f32.mrb[1].mxu1 }
 0x196   : > { %v573_v25 = vmax.f32 %v499_v19, 0.0  ;;  %v729_v26 = vadd.f32 %v5301_v17, %v728_v24 }
 0x197   : > { %v808_v27 = vmax.f32 %v734_v22, 0.0  ;;  %v572_v28 = vmax.f32 %v494_v23, 0.0  ;;  %v3594_v29 = vpop.f32.mrb[2].mxu0 }
 0x198   : > { %589 = vst [vmem:[#allocation2 + $0x8] sm:$0xff] %v573_v25  ;;  %605 = vst [vmem:[#allocation3 + $0x8] sm:$0xff] %v573_v25  ;;  %v807_v30 = vmax.f32 %v729_v26, 0.0  ;;  %v509_v31 = vadd.f32 %v3594_v29, %v5296_v16  ;;  %v3650_v32 = vpop.f32.mrb[2].mxu1  ;;  %v503_v33 = vpop.f32.mrb[3].mxu0 }
 0x199   : > { %825 = vst [vmem:[#allocation2 + $0x88] sm:$0xff] %v808_v27  ;;  %842 = vst [vmem:[#allocation3 + $0x88] sm:$0xff] %v808_v27  ;;  %v744_v34 = vadd.f32 %v3650_v32, %v5301_v17  ;;  %v504_v35 = vadd.f32 %v5296_v16, %v503_v33  ;;  %v738_v36 = vpop.f32.mrb[3].mxu1 }
 0x19a   : > { %588 = vst [vmem:[#allocation2] sm:$0xff] %v572_v28  ;;  %604 = vst [vmem:[#allocation3] sm:$0xff] %v572_v28  ;;  %v575_v37 = vmax.f32 %v509_v31, 0.0  ;;  %v739_v38 = vadd.f32 %v5301_v17, %v738_v36 }
 0x19b   : > { %824 = vst [vmem:[#allocation2 + $0x80] sm:$0xff] %v807_v30  ;;  %841 = vst [vmem:[#allocation3 + $0x80] sm:$0xff] %v807_v30  ;;  %v810_v39 = vmax.f32 %v744_v34, 0.0  ;;  %v574_v40 = vmax.f32 %v504_v35, 0.0  ;;  %v3597_v41 = vpop.f32.mrb[4].mxu0 }
 0x19c   : > { %591 = vst [vmem:[#allocation2 + $0x18] sm:$0xff] %v575_v37  ;;  %607 = vst [vmem:[#allocation3 + $0x18] sm:$0xff] %v575_v37  ;;  %v809_v42 = vmax.f32 %v739_v38, 0.0  ;;  %v519_v43 = vadd.f32 %v3597_v41, %v5296_v16  ;;  %v3653_v44 = vpop.f32.mrb[4].mxu1  ;;  %v513_v45 = vpop.f32.mrb[5].mxu0 }
 0x19d   : > { %827 = vst [vmem:[#allocation2 + $0x98] sm:$0xff] %v810_v39  ;;  %844 = vst [vmem:[#allocation3 + $0x98] sm:$0xff] %v810_v39  ;;  %v754_v46 = vadd.f32 %v3653_v44, %v5301_v17  ;;  %v514_v47 = vadd.f32 %v5296_v16, %v513_v45  ;;  %v748_v48 = vpop.f32.mrb[5].mxu1 }
 0x19e   : > { %590 = vst [vmem:[#allocation2 + $0x10] sm:$0xff] %v574_v40  ;;  %606 = vst [vmem:[#allocation3 + $0x10] sm:$0xff] %v574_v40  ;;  %v577_v49 = vmax.f32 %v519_v43, 0.0  ;;  %v749_v50 = vadd.f32 %v5301_v17, %v748_v48 }
 0x19f   : > { %826 = vst [vmem:[#allocation2 + $0x90] sm:$0xff] %v809_v42  ;;  %843 = vst [vmem:[#allocation3 + $0x90] sm:$0xff] %v809_v42  ;;  %v812_v51 = vmax.f32 %v754_v46, 0.0  ;;  %v576_v52 = vmax.f32 %v514_v47, 0.0  ;;  %v3600_v53 = vpop.f32.mrb[6].mxu0 }
 0x1a0   : > { %593 = vst [vmem:[#allocation2 + $0x28] sm:$0xff] %v577_v49  ;;  %609 = vst [vmem:[#allocation3 + $0x28] sm:$0xff] %v577_v49  ;;  %v811_v54 = vmax.f32 %v749_v50, 0.0  ;;  %v529_v55 = vadd.f32 %v3600_v53, %v5296_v16  ;;  %v3656_v56 = vpop.f32.mrb[6].mxu1  ;;  %v523_v57 = vpop.f32.mrb[7].mxu0 }
 0x1a1   : > { %829 = vst [vmem:[#allocation2 + $0xa8] sm:$0xff] %v812_v51  ;;  %846 = vst [vmem:[#allocation3 + $0xa8] sm:$0xff] %v812_v51  ;;  %v764_v58 = vadd.f32 %v3656_v56, %v5301_v17  ;;  %v524_v59 = vadd.f32 %v5296_v16, %v523_v57  ;;  %v758_v60 = vpop.f32.mrb[7].mxu1 }
 0x1a2   : > { %592 = vst [vmem:[#allocation2 + $0x20] sm:$0xff] %v576_v52  ;;  %608 = vst [vmem:[#allocation3 + $0x20] sm:$0xff] %v576_v52  ;;  %v579_v61 = vmax.f32 %v529_v55, 0.0  ;;  %v759_v62 = vadd.f32 %v5301_v17, %v758_v60 }
 0x1a3   : > { %828 = vst [vmem:[#allocation2 + $0xa0] sm:$0xff] %v811_v54  ;;  %845 = vst [vmem:[#allocation3 + $0xa0] sm:$0xff] %v811_v54  ;;  %v814_v63 = vmax.f32 %v764_v58, 0.0  ;;  %v578_v0 = vmax.f32 %v524_v59, 0.0  ;;  %v3603_v1 = vpop.f32.mrb[8].mxu0 }
 0x1a4   : > { %595 = vst [vmem:[#allocation2 + $0x38] sm:$0xff] %v579_v61  ;;  %611 = vst [vmem:[#allocation3 + $0x38] sm:$0xff] %v579_v61  ;;  %v813_v2 = vmax.f32 %v759_v62, 0.0  ;;  %v539_v3 = vadd.f32 %v3603_v1, %v5296_v16  ;;  %v3659_v4 = vpop.f32.mrb[8].mxu1  ;;  %v533_v5 = vpop.f32.mrb[9].mxu0 }
 0x1a5   : > { %831 = vst [vmem:[#allocation2 + $0xb8] sm:$0xff] %v814_v63  ;;  %848 = vst [vmem:[#allocation3 + $0xb8] sm:$0xff] %v814_v63  ;;  %v774_v6 = vadd.f32 %v3659_v4, %v5301_v17  ;;  %v534_v7 = vadd.f32 %v5296_v16, %v533_v5  ;;  %v768_v8 = vpop.f32.mrb[9].mxu1 }
 0x1a6   : > { %594 = vst [vmem:[#allocation2 + $0x30] sm:$0xff] %v578_v0  ;;  %610 = vst [vmem:[#allocation3 + $0x30] sm:$0xff] %v578_v0  ;;  %v581_v9 = vmax.f32 %v539_v3, 0.0  ;;  %v769_v10 = vadd.f32 %v5301_v17, %v768_v8 }
 0x1a7   : > { %830 = vst [vmem:[#allocation2 + $0xb0] sm:$0xff] %v813_v2  ;;  %847 = vst [vmem:[#allocation3 + $0xb0] sm:$0xff] %v813_v2  ;;  %v816_v11 = vmax.f32 %v774_v6, 0.0  ;;  %v580_v12 = vmax.f32 %v534_v7, 0.0  ;;  %v3606_v13 = vpop.f32.mrb[10].mxu0 }
 0x1a8   : > { %597 = vst [vmem:[#allocation2 + $0x48] sm:$0xff] %v581_v9  ;;  %613 = vst [vmem:[#allocation3 + $0x48] sm:$0xff] %v581_v9  ;;  %v815_v14 = vmax.f32 %v769_v10, 0.0  ;;  %v549_v15 = vadd.f32 %v3606_v13, %v5296_v16  ;;  %v3662_v18 = vpop.f32.mrb[10].mxu1  ;;  %v543_v19 = vpop.f32.mrb[11].mxu0 }
 0x1a9   : > { %833 = vst [vmem:[#allocation2 + $0xc8] sm:$0xff] %v816_v11  ;;  %850 = vst [vmem:[#allocation3 + $0xc8] sm:$0xff] %v816_v11  ;;  %v784_v20 = vadd.f32 %v3662_v18, %v5301_v17  ;;  %v544_v21 = vadd.f32 %v5296_v16, %v543_v19  ;;  %v778_v22 = vpop.f32.mrb[11].mxu1 }
 0x1aa   : > { %596 = vst [vmem:[#allocation2 + $0x40] sm:$0xff] %v580_v12  ;;  %612 = vst [vmem:[#allocation3 + $0x40] sm:$0xff] %v580_v12  ;;  %v583_v23 = vmax.f32 %v549_v15, 0.0  ;;  %v779_v24 = vadd.f32 %v5301_v17, %v778_v22 }
 0x1ab   : > { %832 = vst [vmem:[#allocation2 + $0xc0] sm:$0xff] %v815_v14  ;;  %849 = vst [vmem:[#allocation3 + $0xc0] sm:$0xff] %v815_v14  ;;  %v818_v25 = vmax.f32 %v784_v20, 0.0  ;;  %v582_v26 = vmax.f32 %v544_v21, 0.0  ;;  %v3609_v27 = vpop.f32.mrb[12].mxu0 }
 0x1ac   : > { %599 = vst [vmem:[#allocation2 + $0x58] sm:$0xff] %v583_v23  ;;  %615 = vst [vmem:[#allocation3 + $0x58] sm:$0xff] %v583_v23  ;;  %v817_v28 = vmax.f32 %v779_v24, 0.0  ;;  %v559_v29 = vadd.f32 %v3609_v27, %v5296_v16  ;;  %v3665_v30 = vpop.f32.mrb[12].mxu1  ;;  %v553_v31 = vpop.f32.mrb[13].mxu0 }
 0x1ad   : > { %835 = vst [vmem:[#allocation2 + $0xd8] sm:$0xff] %v818_v25  ;;  %852 = vst [vmem:[#allocation3 + $0xd8] sm:$0xff] %v818_v25  ;;  %v794_v32 = vadd.f32 %v3665_v30, %v5301_v17  ;;  %v554_v33 = vadd.f32 %v5296_v16, %v553_v31  ;;  %v788_v34 = vpop.f32.mrb[13].mxu1 }
 0x1ae   : > { %598 = vst [vmem:[#allocation2 + $0x50] sm:$0xff] %v582_v26  ;;  %614 = vst [vmem:[#allocation3 + $0x50] sm:$0xff] %v582_v26  ;;  %v585_v35 = vmax.f32 %v559_v29, 0.0  ;;  %v789_v36 = vadd.f32 %v5301_v17, %v788_v34 }
 0x1af   : > { %834 = vst [vmem:[#allocation2 + $0xd0] sm:$0xff] %v817_v28  ;;  %851 = vst [vmem:[#allocation3 + $0xd0] sm:$0xff] %v817_v28  ;;  %v820_v37 = vmax.f32 %v794_v32, 0.0  ;;  %v584_v38 = vmax.f32 %v554_v33, 0.0  ;;  %v3612_v39 = vpop.f32.mrb[14].mxu0 }
 0x1b0   : > { %601 = vst [vmem:[#allocation2 + $0x68] sm:$0xff] %v585_v35  ;;  %617 = vst [vmem:[#allocation3 + $0x68] sm:$0xff] %v585_v35  ;;  %v819_v40 = vmax.f32 %v789_v36, 0.0  ;;  %v569_v41 = vadd.f32 %v3612_v39, %v5296_v16  ;;  %v3668_v42 = vpop.f32.mrb[14].mxu1  ;;  %v563_v43 = vpop.f32.mrb[15].mxu0 }
 0x1b1   : > { %837 = vst [vmem:[#allocation2 + $0xe8] sm:$0xff] %v820_v37  ;;  %854 = vst [vmem:[#allocation3 + $0xe8] sm:$0xff] %v820_v37  ;;  %v804_v44 = vadd.f32 %v3668_v42, %v5301_v17  ;;  %v564_v45 = vadd.f32 %v5296_v16, %v563_v43  ;;  %v798_v46 = vpop.f32.mrb[15].mxu1 }
 0x1b2   : > { %600 = vst [vmem:[#allocation2 + $0x60] sm:$0xff] %v584_v38  ;;  %616 = vst [vmem:[#allocation3 + $0x60] sm:$0xff] %v584_v38  ;;  %v587_v47 = vmax.f32 %v569_v41, 0.0  ;;  %v799_v48 = vadd.f32 %v5301_v17, %v798_v46 }
 0x1b3   : > { %836 = vst [vmem:[#allocation2 + $0xe0] sm:$0xff] %v819_v40  ;;  %853 = vst [vmem:[#allocation3 + $0xe0] sm:$0xff] %v819_v40  ;;  %v822_v49 = vmax.f32 %v804_v44, 0.0  ;;  %v586_v50 = vmax.f32 %v564_v45, 0.0 }
 0x1b4   : > { %603 = vst [vmem:[#allocation2 + $0x78] sm:$0xff] %v587_v47  ;;  %619 = vst [vmem:[#allocation3 + $0x78] sm:$0xff] %v587_v47  ;;  %v821_v51 = vmax.f32 %v799_v48, 0.0 }
 0x1b5   : > { %839 = vst [vmem:[#allocation2 + $0xf8] sm:$0xff] %v822_v49  ;;  %856 = vst [vmem:[#allocation3 + $0xf8] sm:$0xff] %v822_v49 }
 0x1b6   : > { %602 = vst [vmem:[#allocation2 + $0x70] sm:$0xff] %v586_v50  ;;  %618 = vst [vmem:[#allocation3 + $0x70] sm:$0xff] %v586_v50 }
 0x1b7   : > { %838 = vst [vmem:[#allocation2 + $0xf0] sm:$0xff] %v821_v51  ;;  %855 = vst [vmem:[#allocation3 + $0xf0] sm:$0xff] %v821_v51 }
 0x1b8 PF: > { %v909_v52 = vld [vmem:[#allocation3 + $0x80] sm:$0xff]  ;;  %v910_v16 = vld [vmem:[#allocation3 + $0x88] sm:$0xff]  ;;  %v925_v53 = vlaneseq  ;;  %v6617_v54 = vmov 0.0|0.0   ;;  %v911_v55 = vld [vmem:[#allocation3 + $0x90] sm:$0xff]  ;;  %vm5001_vm0 = vmmov 0   ;;  %v6614_v58 = vmov 0.0  }
 0x1b9   : > { %4062 = vmatprep.subr.bf16.mxu0 %v6617_v54  ;;  %v4063_v17 = vpack.c.bf16 %v910_v16, %v909_v52  ;;  %v912_v57 = vld [vmem:[#allocation3 + $0x98] sm:$0xff]  ;;  %3701 = vmatprep.mubr.msk.f32.mxu0 %vm5001_vm0, %v6614_v58  ;;  %v5341_v59 = vld [vmem:[%s5289_s18] sm:$0x7]  ;;  %v914_v63 = vld [vmem:[#allocation3 + $0xa8] sm:$0xff]  ;;  %p3308_p7 = scmp.ne.s32.totalorder %s5072_s9, 2 }
 0x1ba   : > { %v5336_v56 = vshrl.u32 %v925_v53, 7  ;;  %v4066_v60 = vpack.c.bf16 %v912_v57, %v911_v55  ;;  %v913_v62 = vld [vmem:[#allocation3 + $0xa0] sm:$0xff]  ;;  %v5348_v1 = vld [vmem:[#allocation2 + $0x10] sm:$0xff]  ;;  %v5361_v5 = vld [vmem:[#allocation2 + $0x18] sm:$0xff] }
 0x1bb   : > { %4064 = vmatpush3.bf16.xpose.msra.mxu0 %v4063_v17  ;;  %4087 = vmatprep.subr.bf16.mxu1 %v4063_v17  ;;  %v5350_v2 = vld [vmem:[#allocation2] sm:$0xff]  ;;  %v5363_v6 = vld [vmem:[#allocation2 + $0x8] sm:$0xff]  ;;  %v4069_v7 = vpack.c.bf16 %v914_v63, %v913_v62  ;;  %v915_v12 = vld [vmem:[#allocation3 + $0xb0] sm:$0xff] }
 0x1bc   : > { %4065 = vmatprep.subr.bf16.mxu0 %v6617_v54  ;;  %v5345_v61 = vsub.s32 0, %v5336_v56  ;;  %v2089_v0 = vsub.s32 2, %v5336_v56  ;;  %4089 = vmatpush3.bf16.msra.mxu1 %v4063_v17  ;;  %v916_v13 = vld [vmem:[#allocation3 + $0xb8] sm:$0xff]  ;;  %v5373_v14 = vld [vmem:[#allocation2 + $0x28] sm:$0xff]  ;;  %v5375_v15 = vld [vmem:[#allocation2 + $0x20] sm:$0xff]  ;;  %v1506_v48 = vsub.s32 1, %v5336_v56 }
 0x1bd   : > { %4091 = vmatprep.subr.bf16.mxu1 %v4066_v60  ;;  %v4072_v18 = vpack.c.bf16 %v916_v13, %v915_v12  ;;  %v5382_v21 = vld [vmem:[#allocation2 + $0x38] sm:$0xff]  ;;  %v5384_v22 = vld [vmem:[#allocation2 + $0x30] sm:$0xff]  ;;  %v917_v23 = vld [vmem:[#allocation3 + $0xc0] sm:$0xff] }
 0x1be   : > { %6696 = vst [vmem:[#allocation19_spill] sm:$0xff] %v5345_v61  ;;  %v5354_v3 = vrot.slane %v5341_v59, %v5345_v61  ;;  %v5359_v4 = vrot.slane %v5341_v59, %v2089_v0  ;;  %v918_v24 = vld [vmem:[#allocation3 + $0xc8] sm:$0xff]  ;;  %v5392_v28 = vld [vmem:[#allocation2 + $0x40] sm:$0xff]  ;;  %v919_v30 = vld [vmem:[#allocation3 + $0xd0] sm:$0xff]  ;;  %v1507_v53 = vrot.slane %v5341_v59, %v1506_v48 }
 0x1bf   : > { %v5390_v27 = vld [vmem:[#allocation2 + $0x48] sm:$0xff]  ;;  %v4075_v29 = vpack.c.bf16 %v918_v24, %v917_v23  ;;  %v920_v31 = vld [vmem:[#allocation3 + $0xd8] sm:$0xff]  ;;  %v5401_v36 = vld [vmem:[#allocation2 + $0x50] sm:$0xff] }
 0x1c0   : > { %v931_v8 = vmul.f32 %v5354_v3, %v5348_v1  ;;  %v929_v9 = vmul.f32 %v5354_v3, %v5350_v2  ;;  %4093 = vmatpush3.bf16.msra.mxu1 %v4066_v60  ;;  %v932_v10 = vmul.f32 %v5354_v3, %v5361_v5  ;;  %v930_v11 = vmul.f32 %v5354_v3, %v5363_v6  ;;  %v5399_v35 = vld [vmem:[#allocation2 + $0x58] sm:$0xff]  ;;  %v921_v37 = vld [vmem:[#allocation3 + $0xe0] sm:$0xff]  ;;  %v922_v38 = vld [vmem:[#allocation3 + $0xe8] sm:$0xff] }
 0x1c1   : > { %4095 = vmatprep.subr.bf16.mxu1 %v4069_v7  ;;  %v934_v19 = vmul.f32 %v5354_v3, %v5373_v14  ;;  %v933_v20 = vmul.f32 %v5354_v3, %v5375_v15  ;;  %v936_v25 = vmul.f32 %v5354_v3, %v5382_v21  ;;  %v935_v26 = vmul.f32 %v5354_v3, %v5384_v22  ;;  %v5407_v41 = vld [vmem:[#allocation2 + $0x68] sm:$0xff]  ;;  %v5409_v42 = vld [vmem:[#allocation2 + $0x60] sm:$0xff]  ;;  %v923_v44 = vld [vmem:[#allocation3 + $0xf0] sm:$0xff] }
 0x1c2   : > { %949 = vadd.xlane.f32.xlu1 %v931_v8  ;;  %945 = vadd.xlane.f32.xlu0 %v929_v9  ;;  %v938_v32 = vmul.f32 %v5354_v3, %v5390_v27  ;;  %v937_v33 = vmul.f32 %v5354_v3, %v5392_v28  ;;  %v4078_v34 = vpack.c.bf16 %v920_v31, %v919_v30  ;;  %v924_v45 = vld [vmem:[#allocation3 + $0xf8] sm:$0xff]  ;;  %v5419_v50 = vld [vmem:[#allocation2 + $0x70] sm:$0xff]  ;;  %v5428_v17 = vld [vmem:[#allocation2 + $0x88] sm:$0xff] }
 0x1c3   : > { %4067 = vmatpush3.bf16.xpose.msra.mxu0 %v4066_v60  ;;  %v940_v39 = vmul.f32 %v5354_v3, %v5399_v35  ;;  %v939_v40 = vmul.f32 %v5354_v3, %v5401_v36  ;;  %v4081_v43 = vpack.c.bf16 %v922_v38, %v921_v37  ;;  %v942_v46 = vmul.f32 %v5354_v3, %v5407_v41  ;;  %v5417_v49 = vld [vmem:[#allocation2 + $0x78] sm:$0xff]  ;;  %v5430_v55 = vld [vmem:[#allocation2 + $0x80] sm:$0xff]  ;;  %v5438_v63 = vld [vmem:[#allocation2 + $0x90] sm:$0xff] }
 0x1c4   : > { %4068 = vmatprep.subr.bf16.mxu0 %v6617_v54  ;;  %4097 = vmatpush3.bf16.msra.mxu1 %v4069_v7  ;;  %v941_v47 = vmul.f32 %v5354_v3, %v5409_v42  ;;  %v4084_v51 = vpack.c.bf16 %v924_v45, %v923_v44  ;;  %v944_v52 = vmul.f32 %v5354_v3, %v5417_v49  ;;  %v5436_v62 = vld [vmem:[#allocation2 + $0x98] sm:$0xff]  ;;  %v5444_v8 = vld [vmem:[#allocation2 + $0xa0] sm:$0xff]  ;;  %v5451_v12 = vld [vmem:[#allocation2 + $0xb0] sm:$0xff] }
 0x1c5   : > { %4099 = vmatprep.subr.bf16.mxu1 %v4072_v18  ;;  %v943_v16 = vmul.f32 %v5354_v3, %v5419_v50  ;;  %v1509_v57 = vmul.f32 %v1507_v53, %v5428_v17  ;;  %v1508_v60 = vmul.f32 %v1507_v53, %v5430_v55  ;;  %v1511_v59 = vmul.f32 %v1507_v53, %v5436_v62  ;;  %v5468_v31 = vld [vmem:[#allocation2 + $0xe8] sm:$0xff]  ;;  %v5478_v38 = vld [vmem:[#allocation2 + $0xf8] sm:$0xff] }
 0x1c6   : > { %951 = vadd.xlane.f32.xlu1 %v932_v10  ;;  %947 = vadd.xlane.f32.xlu0 %v930_v11  ;;  %v1510_v3 = vmul.f32 %v1507_v53, %v5438_v63  ;;  %v1512_v10 = vmul.f32 %v1507_v53, %v5444_v8  ;;  %v5449_v11 = vld [vmem:[#allocation2 + $0xb8] sm:$0xff]  ;;  %v2092_v44 = vmul.f32 %v5359_v4, %v5363_v6 }
 0x1c7   : > { %v1515_v13 = vmul.f32 %v1507_v53, %v5449_v11  ;;  %v2091_v45 = vmul.f32 %v5359_v4, %v5350_v2 }
 0x1c8   : > { %4101 = vmatpush3.bf16.msra.mxu1 %v4072_v18 }
 0x1c9   : > { %4103 = vmatprep.subr.bf16.mxu1 %v4075_v29 }
 0x1ca   : > { %955 = vadd.xlane.f32.xlu1 %v934_v19  ;;  %953 = vadd.xlane.f32.xlu0 %v933_v20  ;;  %v5455_v19 = vld [vmem:[#allocation2 + $0xc8] sm:$0xff]  ;;  %v5457_v20 = vld [vmem:[#allocation2 + $0xc0] sm:$0xff] }
 0x1cb   : > { %4070 = vmatpush3.bf16.xpose.msra.mxu0 %v4069_v7  ;;  %v5442_v7 = vld [vmem:[#allocation2 + $0xa8] sm:$0xff]  ;;  %v1517_v23 = vmul.f32 %v1507_v53, %v5455_v19  ;;  %v1516_v24 = vmul.f32 %v1507_v53, %v5457_v20 }
 0x1cc   : > { %4071 = vmatprep.subr.bf16.mxu0 %v6617_v54  ;;  %4105 = vmatpush3.bf16.msra.mxu1 %v4075_v29  ;;  %v1513_v9 = vmul.f32 %v1507_v53, %v5442_v7 }
 0x1cd   : > { %4107 = vmatprep.subr.bf16.mxu1 %v4078_v34 }
 0x1ce   : > { %959 = vadd.xlane.f32.xlu1 %v936_v25  ;;  %957 = vadd.xlane.f32.xlu0 %v935_v26  ;;  %v5462_v25 = vld [vmem:[#allocation2 + $0xd8] sm:$0xff]  ;;  %v5464_v26 = vld [vmem:[#allocation2 + $0xd0] sm:$0xff] }
 0x1cf   : > { %v1518_v30 = vmul.f32 %v1507_v53, %v5464_v26 }
 0x1d0   : > { %4109 = vmatpush3.bf16.msra.mxu1 %v4078_v34 }
 0x1d1   : > { %4111 = vmatprep.subr.bf16.mxu1 %v4081_v43 }
 0x1d2   : > { %963 = vadd.xlane.f32.xlu1 %v938_v32  ;;  %961 = vadd.xlane.f32.xlu0 %v937_v33  ;;  %v5470_v32 = vld [vmem:[#allocation2 + $0xe0] sm:$0xff]  ;;  %v1521_v33 = vmul.f32 %v1507_v53, %v5468_v31 }
 0x1d3   : > { %4073 = vmatpush3.bf16.xpose.msra.mxu0 %v4072_v18  ;;  %v1514_v18 = vmul.f32 %v1507_v53, %v5451_v12  ;;  %v1520_v37 = vmul.f32 %v1507_v53, %v5470_v32 }
 0x1d4   : > { %4074 = vmatprep.subr.bf16.mxu0 %v6617_v54  ;;  %4113 = vmatpush3.bf16.msra.mxu1 %v4081_v43 }
 0x1d5   : > { %4115 = vmatprep.subr.bf16.mxu1 %v4084_v51 }
 0x1d6   : > { %967 = vadd.xlane.f32.xlu1 %v940_v39  ;;  %965 = vadd.xlane.f32.xlu0 %v939_v40  ;;  %v5480_v39 = vld [vmem:[#allocation2 + $0xf0] sm:$0xff]  ;;  %v1523_v40 = vmul.f32 %v1507_v53, %v5478_v38 }
 0x1d8   : > { %4117 = vmatpush3.bf16.msra.mxu1 %v4084_v51 }
 0x1d9   : > { %4118 = vmatprep.subr.bf16.mxu1 %v6617_v54 }
 0x1da   : > { %971 = vadd.xlane.f32.xlu1 %v942_v46  ;;  %969 = vadd.xlane.f32.xlu0 %v941_v47  ;;  %v2094_v46 = vmul.f32 %v5359_v4, %v5361_v5  ;;  %v2093_v47 = vmul.f32 %v5359_v4, %v5348_v1 }
 0x1db   : > { %4076 = vmatpush3.bf16.xpose.msra.mxu0 %v4075_v29  ;;  %v1519_v29 = vmul.f32 %v1507_v53, %v5462_v25 }
 0x1dc   : > { %4077 = vmatprep.subr.bf16.mxu0 %v6617_v54 }
 0x1de   : > { %975 = vadd.xlane.f32.xlu1 %v944_v52  ;;  %973 = vadd.xlane.f32.xlu0 %v943_v16  ;;  %v2095_v52 = vmul.f32 %v5359_v4, %v5375_v15  ;;  %v2098_v16 = vmul.f32 %v5359_v4, %v5382_v21 }
 0x1e2   : > { %1526 = vadd.xlane.f32.xlu1 %v1509_v57  ;;  %1524 = vadd.xlane.f32.xlu0 %v1508_v60  ;;  %v2100_v57 = vmul.f32 %v5359_v4, %v5390_v27  ;;  %v2099_v60 = vmul.f32 %v5359_v4, %v5392_v28 }
 0x1e3   : > { %4079 = vmatpush3.bf16.xpose.msra.mxu0 %v4078_v34  ;;  %v5475_v34 = vld [vmem:[%s344_s17] sm:$0x7] }
 0x1e4   : > { %4080 = vmatprep.subr.bf16.mxu0 %v6617_v54 }
 0x1e6   : > { %1530 = vadd.xlane.f32.xlu1 %v1511_v59  ;;  %1528 = vadd.xlane.f32.xlu0 %v1510_v3  ;;  %v2102_v59 = vmul.f32 %v5359_v4, %v5399_v35  ;;  %v2101_v3 = vmul.f32 %v5359_v4, %v5401_v36 }
 0x1ea   : > { %1534 = vadd.xlane.f32.xlu1 %v1513_v9  ;;  %1532 = vadd.xlane.f32.xlu0 %v1512_v10  ;;  %v2104_v9 = vmul.f32 %v5359_v4, %v5407_v41  ;;  %v2103_v10 = vmul.f32 %v5359_v4, %v5409_v42 }
 0x1eb   : > { %4082 = vmatpush3.bf16.xpose.msra.mxu0 %v4081_v43  ;;  %v1522_v43 = vmul.f32 %v1507_v53, %v5480_v39  ;;  %v2097_v53 = vmul.f32 %v5359_v4, %v5384_v22 }
 0x1ec   : > { %4083 = vmatprep.subr.bf16.mxu0 %v6617_v54 }
 0x1ee   : > { %1538 = vadd.xlane.f32.xlu1 %v1515_v13  ;;  %1536 = vadd.xlane.f32.xlu0 %v1514_v18  ;;  %v980_v13 = vrot.slane %v5475_v34, %v5345_v61  ;;  %v2106_v18 = vmul.f32 %v5359_v4, %v5417_v49 }
 0x1f2   : > { %1542 = vadd.xlane.f32.xlu1 %v1517_v23  ;;  %1540 = vadd.xlane.f32.xlu0 %v1516_v24  ;;  %v2105_v23 = vmul.f32 %v5359_v4, %v5419_v50  ;;  %v982_v24 = vmul.f32 %v980_v13, %v5363_v6 }
 0x1f3   : > { %4085 = vmatpush3.bf16.xpose.msra.mxu0 %v4084_v51  ;;  %v2096_v51 = vmul.f32 %v5359_v4, %v5373_v14  ;;  %v988_v4 = vmul.f32 %v980_v13, %v5382_v21 }
 0x1f6   : > { %1546 = vadd.xlane.f32.xlu1 %v1519_v29  ;;  %1544 = vadd.xlane.f32.xlu0 %v1518_v30  ;;  %v981_v29 = vmul.f32 %v980_v13, %v5350_v2  ;;  %v984_v30 = vmul.f32 %v980_v13, %v5361_v5 }
 0x1fa   : > { %3702 = vmatmul.mubr.f32.vlgmr.msra.gmra.mrb[0].mxu0 %v5475_v34  ;;  %1550 = vadd.xlane.f32.xlu1 %v1521_v33  ;;  %v983_v33 = vmul.f32 %v980_v13, %v5348_v1 }
 0x1fb   : > { %1548 = vadd.xlane.f32.xlu0 %v1520_v37  ;;  %v986_v37 = vmul.f32 %v980_v13, %v5373_v14 }
 0x1fe   : > { %1554 = vadd.xlane.f32.xlu1 %v1523_v40  ;;  %v985_v40 = vmul.f32 %v980_v13, %v5375_v15 }
 0x1ff   : > { %1552 = vadd.xlane.f32.xlu0 %v1522_v43  ;;  %v987_v43 = vmul.f32 %v980_v13, %v5384_v22 }
 0x202   : > { %2109 = vadd.xlane.f32.xlu1 %v2092_v44  ;;  %v990_v44 = vmul.f32 %v980_v13, %v5390_v27 }
 0x203   : > { %2107 = vadd.xlane.f32.xlu0 %v2091_v45  ;;  %v989_v45 = vmul.f32 %v980_v13, %v5392_v28 }
 0x206   : > { %2113 = vadd.xlane.f32.xlu1 %v2094_v46  ;;  %v992_v46 = vmul.f32 %v980_v13, %v5399_v35 }
 0x207   : > { %2111 = vadd.xlane.f32.xlu0 %v2093_v47  ;;  %v991_v47 = vmul.f32 %v980_v13, %v5401_v36 }
 0x20a   : > { %2117 = vadd.xlane.f32.xlu1 %v2096_v51  ;;  %v994_v51 = vmul.f32 %v980_v13, %v5407_v41 }
 0x20b   : > { %2115 = vadd.xlane.f32.xlu0 %v2095_v52  ;;  %v993_v52 = vmul.f32 %v980_v13, %v5409_v42 }
 0x20e   : > { %2121 = vadd.xlane.f32.xlu1 %v2098_v16  ;;  %v5536_v16 = vrot.slane %v5475_v34, %v1506_v48 }
 0x20f   : > { %2119 = vadd.xlane.f32.xlu0 %v2097_v53  ;;  %v996_v53 = vmul.f32 %v980_v13, %v5417_v49 }
 0x212   : > { %2125 = vadd.xlane.f32.xlu1 %v2100_v57  ;;  %v995_v57 = vmul.f32 %v980_v13, %v5419_v50 }
 0x213   : > { %2123 = vadd.xlane.f32.xlu0 %v2099_v60  ;;  %v2142_v60 = vrot.slane %v5475_v34, %v2089_v0 }
 0x215   : > { %v2144_v48 = vmul.f32 %v2142_v60, %v5363_v6  ;;  %v2145_v56 = vmul.f32 %v2142_v60, %v5348_v1  ;;  %v2148_v0 = vmul.f32 %v2142_v60, %v5373_v14  ;;  %v2151_v14 = vmul.f32 %v2142_v60, %v5392_v28 }
 0x216   : > { %2129 = vadd.xlane.f32.xlu1 %v2102_v59  ;;  %v1561_v59 = vmul.f32 %v5536_v16, %v5428_v17  ;;  %v2147_v17 = vmul.f32 %v2142_v60, %v5375_v15  ;;  %v2154_v15 = vmul.f32 %v2142_v60, %v5399_v35  ;;  %v2155_v28 = vmul.f32 %v2142_v60, %v5409_v42 }
 0x217   : > { %2127 = vadd.xlane.f32.xlu0 %v2101_v3  ;;  %v1560_v3 = vmul.f32 %v5536_v16, %v5430_v55  ;;  %v2150_v55 = vmul.f32 %v2142_v60, %v5382_v21  ;;  %v2158_v35 = vmul.f32 %v2142_v60, %v5417_v49  ;;  %v1562_v42 = vmul.f32 %v5536_v16, %v5438_v63 }
 0x218   : > { %v1565_v49 = vmul.f32 %v5536_v16, %v5442_v7  ;;  %v1567_v63 = vmul.f32 %v5536_v16, %v5449_v11  ;;  %v1568_v11 = vmul.f32 %v5536_v16, %v5457_v20  ;;  %v1573_v20 = vmul.f32 %v5536_v16, %v5468_v31 }
 0x219   : > { %v1574_v31 = vmul.f32 %v5536_v16, %v5480_v39 }
 0x21a   : > { %2133 = vadd.xlane.f32.xlu1 %v2104_v9  ;;  %v2143_v9 = vmul.f32 %v2142_v60, %v5350_v2  ;;  %v2149_v2 = vmul.f32 %v2142_v60, %v5384_v22  ;;  %v2153_v22 = vmul.f32 %v2142_v60, %v5401_v36  ;;  %v2157_v36 = vmul.f32 %v2142_v60, %v5419_v50 }
 0x21b   : > { %2131 = vadd.xlane.f32.xlu0 %v2103_v10  ;;  %v2146_v10 = vmul.f32 %v2142_v60, %v5361_v5  ;;  %v2152_v5 = vmul.f32 %v2142_v60, %v5390_v27  ;;  %v2156_v27 = vmul.f32 %v2142_v60, %v5407_v41  ;;  %v1563_v41 = vmul.f32 %v5536_v16, %v5436_v62 }
 0x21c   : > { %v1564_v62 = vmul.f32 %v5536_v16, %v5444_v8  ;;  %v1569_v8 = vmul.f32 %v5536_v16, %v5455_v19  ;;  %v1570_v19 = vmul.f32 %v5536_v16, %v5464_v26  ;;  %v1575_v26 = vmul.f32 %v5536_v16, %v5478_v38 }
 0x21e   : > { %2137 = vadd.xlane.f32.xlu1 %v2106_v18 }
 0x21f   : > { %2135 = vadd.xlane.f32.xlu0 %v2105_v23 }
 0x222   : > { %999 = vadd.xlane.f32.xlu1 %v982_v24 }
 0x223   : > { %997 = vadd.xlane.f32.xlu0 %v981_v29 }
 0x226   : > { %1003 = vadd.xlane.f32.xlu1 %v984_v30 }
 0x227   : > { %1001 = vadd.xlane.f32.xlu0 %v983_v33 }
 0x22a   : > { %1007 = vadd.xlane.f32.xlu1 %v986_v37 }
 0x22b   : > { %1005 = vadd.xlane.f32.xlu0 %v985_v40  ;;  %v892_v40 = vld [vmem:[#allocation3] sm:$0xff] }
 0x22e   : > { %1011 = vadd.xlane.f32.xlu1 %v988_v4  ;;  %v893_v4 = vld [vmem:[#allocation3 + $0x8] sm:$0xff] }
 0x22f   : > { %1009 = vadd.xlane.f32.xlu0 %v987_v43 }
 0x232   : > { %1015 = vadd.xlane.f32.xlu1 %v990_v44  ;;  %v5599_v44 = vpack.c.bf16 %v893_v4, %v892_v40 }
 0x233   : > { %1013 = vadd.xlane.f32.xlu0 %v989_v45 }
 0x234   : > { %4143 = vmatprep.subr.bf16.mxu0 %v5599_v44 }
 0x235   : > { %4145 = vmatpush3.bf16.msra.mxu0 %v5599_v44 }
 0x236   : > { %1019 = vadd.xlane.f32.xlu1 %v992_v46  ;;  %v1566_v46 = vmul.f32 %v5536_v16, %v5451_v12  ;;  %v1571_v12 = vmul.f32 %v5536_v16, %v5462_v25  ;;  %v1572_v25 = vmul.f32 %v5536_v16, %v5470_v32 }
 0x237   : > { %1017 = vadd.xlane.f32.xlu0 %v991_v47 }
 0x23a   : > { %1023 = vadd.xlane.f32.xlu1 %v994_v51 }
 0x23b   : > { %1021 = vadd.xlane.f32.xlu0 %v993_v52  ;;  %v894_v52 = vld [vmem:[#allocation3 + $0x10] sm:$0xff] }
 0x23e   : > { %1027 = vadd.xlane.f32.xlu1 %v996_v53  ;;  %v895_v53 = vld [vmem:[#allocation3 + $0x18] sm:$0xff] }
 0x23f   : > { %1025 = vadd.xlane.f32.xlu0 %v995_v57  ;;  %v5619_v57 = vpack.c.bf16 %v895_v53, %v894_v52 }
 0x241   : > { %4147 = vmatprep.subr.bf16.mxu0 %v5619_v57 }
 0x242   : > { %1578 = vadd.xlane.f32.xlu1 %v1561_v59  ;;  %4149 = vmatpush3.bf16.msra.mxu0 %v5619_v57 }
 0x243   : > { %1576 = vadd.xlane.f32.xlu0 %v1560_v3 }
 0x246   : > { %2161 = vadd.xlane.f32.xlu1 %v2144_v48 }
 0x247   : > { %2159 = vadd.xlane.f32.xlu0 %v2143_v9  ;;  %v896_v9 = vld [vmem:[#allocation3 + $0x20] sm:$0xff] }
 0x24a   : > { %2165 = vadd.xlane.f32.xlu1 %v2146_v10  ;;  %v897_v10 = vld [vmem:[#allocation3 + $0x28] sm:$0xff] }
 0x24b   : > { %2163 = vadd.xlane.f32.xlu0 %v2145_v56  ;;  %v5641_v56 = vpack.c.bf16 %v897_v10, %v896_v9 }
 0x24d   : > { %4151 = vmatprep.subr.bf16.mxu0 %v5641_v56 }
 0x24e   : > { %2169 = vadd.xlane.f32.xlu1 %v2148_v0  ;;  %4153 = vmatpush3.bf16.msra.mxu0 %v5641_v56 }
 0x24f   : > { %v5554_v34 = vpop.xlane.xlu1 %949  ;;  %v5556_v6 = vpop.xlane.xlu0 %945  ;;  %2167 = vadd.xlane.f32.xlu0 %v2147_v17 }
 0x252   : > { %2173 = vadd.xlane.f32.xlu1 %v2150_v55 }
 0x253   : > { %v5560_v1 = vpop.xlane.xlu1 %951  ;;  %v5562_v13 = vpop.xlane.xlu0 %947  ;;  %2171 = vadd.xlane.f32.xlu0 %v2149_v2 }
 0x256   : > { %2177 = vadd.xlane.f32.xlu1 %v2152_v5  ;;  %v898_v5 = vld [vmem:[#allocation3 + $0x30] sm:$0xff] }
 0x257   : > { %v5566_v21 = vpop.xlane.xlu1 %955  ;;  %v5568_v18 = vpop.xlane.xlu0 %953  ;;  %2175 = vadd.xlane.f32.xlu0 %v2151_v14  ;;  %v899_v14 = vld [vmem:[#allocation3 + $0x38] sm:$0xff] }
 0x25a   : > { %2181 = vadd.xlane.f32.xlu1 %v2154_v15  ;;  %v5659_v15 = vpack.c.bf16 %v899_v14, %v898_v5 }
 0x25b   : > { %v5572_v23 = vpop.xlane.xlu1 %959  ;;  %v5574_v24 = vpop.xlane.xlu0 %957  ;;  %2179 = vadd.xlane.f32.xlu0 %v2153_v22 }
 0x25c   : > { %6709 = vst [vmem:[#allocation32_spill] sm:$0xff] %v5659_v15  ;;  %4155 = vmatprep.subr.bf16.mxu0 %v5659_v15 }
 0x25d   : > { %4157 = vmatpush3.bf16.msra.mxu0 %v5659_v15 }
 0x25e   : > { %2185 = vadd.xlane.f32.xlu1 %v2156_v27  ;;  %v900_v27 = vld [vmem:[#allocation3 + $0x40] sm:$0xff] }
 0x25f   : > { %v5578_v29 = vpop.xlane.xlu1 %963  ;;  %v5580_v30 = vpop.xlane.xlu0 %961  ;;  %2183 = vadd.xlane.f32.xlu0 %v2155_v28  ;;  %v901_v28 = vld [vmem:[#allocation3 + $0x48] sm:$0xff] }
 0x262   : > { %2189 = vadd.xlane.f32.xlu1 %v2158_v35 }
 0x263   : > { %v5585_v33 = vpop.xlane.xlu1 %967  ;;  %v5587_v37 = vpop.xlane.xlu0 %965  ;;  %2187 = vadd.xlane.f32.xlu0 %v2157_v36  ;;  %v5671_v36 = vpack.c.bf16 %v901_v28, %v900_v27 }
 0x265   : > { %6714 = vst [vmem:[#allocation37_spill] sm:$0xff] %v5671_v36  ;;  %4159 = vmatprep.subr.bf16.mxu0 %v5671_v36 }
 0x266   : > { %1582 = vadd.xlane.f32.xlu1 %v1563_v41  ;;  %v902_v41 = vld [vmem:[#allocation3 + $0x50] sm:$0xff]  ;;  %4161 = vmatpush3.bf16.msra.mxu0 %v5671_v36 }
 0x267   : > { %v5593_v43 = vpop.xlane.xlu1 %971  ;;  %v5595_v50 = vpop.xlane.xlu0 %969  ;;  %1580 = vadd.xlane.f32.xlu0 %v1562_v42  ;;  %v903_v42 = vld [vmem:[#allocation3 + $0x58] sm:$0xff] }
 0x26a   : > { %1586 = vadd.xlane.f32.xlu1 %v1565_v49  ;;  %v5673_v49 = vpack.c.bf16 %v903_v42, %v902_v41 }
 0x26b   : > { %v5605_v7 = vpop.xlane.xlu1 %975  ;;  %v5607_v45 = vpop.xlane.xlu0 %973  ;;  %1584 = vadd.xlane.f32.xlu0 %v1564_v62 }
 0x26c   : > { %6715 = vst [vmem:[#allocation38_spill] sm:$0xff] %v5673_v49  ;;  %4163 = vmatprep.subr.bf16.mxu0 %v5673_v49 }
 0x26d   : > { %4165 = vmatpush3.bf16.msra.mxu0 %v5673_v49 }
 0x26e   : > { %1590 = vadd.xlane.f32.xlu1 %v1567_v63  ;;  %v904_v63 = vld [vmem:[#allocation3 + $0x60] sm:$0xff] }
 0x26f   : > { %v5613_v47 = vpop.xlane.xlu1 %1526  ;;  %v5615_v51 = vpop.xlane.xlu0 %1524  ;;  %1588 = vadd.xlane.f32.xlu0 %v1566_v46  ;;  %v905_v46 = vld [vmem:[#allocation3 + $0x68] sm:$0xff] }
 0x270   : > { %6697 = vst [vmem:[#allocation20_spill] sm:$0xff] %v5613_v47  ;;  %6698 = vst [vmem:[#allocation21_spill] sm:$0xff] %v5615_v51 }
 0x272   : > { %1594 = vadd.xlane.f32.xlu1 %v1569_v8 }
 0x273   : > { %v5623_v60 = vpop.xlane.xlu1 %1530  ;;  %v5625_v59 = vpop.xlane.xlu0 %1528  ;;  %1592 = vadd.xlane.f32.xlu0 %v1568_v11  ;;  %v5687_v11 = vpack.c.bf16 %v905_v46, %v904_v63 }
 0x274   : > { %6699 = vst [vmem:[#allocation22_spill] sm:$0xff] %v5623_v60  ;;  %6700 = vst [vmem:[#allocation23_spill] sm:$0xff] %v5625_v59 }
 0x275   : > { %6720 = vst [vmem:[#allocation43_spill] sm:$0xff] %v5687_v11  ;;  %4167 = vmatprep.subr.bf16.mxu0 %v5687_v11 }
 0x276   : > { %1598 = vadd.xlane.f32.xlu1 %v1571_v12  ;;  %4169 = vmatpush3.bf16.msra.mxu0 %v5687_v11 }
 0x277   : > { %v5633_v3 = vpop.xlane.xlu1 %1534  ;;  %v5635_v48 = vpop.xlane.xlu0 %1532  ;;  %1596 = vadd.xlane.f32.xlu0 %v1570_v19  ;;  %v906_v19 = vld [vmem:[#allocation3 + $0x70] sm:$0xff] }
 0x278   : > { %6701 = vst [vmem:[#allocation24_spill] sm:$0xff] %v5633_v3  ;;  %6702 = vst [vmem:[#allocation25_spill] sm:$0xff] %v5635_v48 }
 0x27a   : > { %1602 = vadd.xlane.f32.xlu1 %v1573_v20  ;;  %v907_v20 = vld [vmem:[#allocation3 + $0x78] sm:$0xff] }
 0x27b   : > { %v5643_v0 = vpop.xlane.xlu1 %1538  ;;  %v5645_v17 = vpop.xlane.xlu0 %1536  ;;  %1600 = vadd.xlane.f32.xlu0 %v1572_v25  ;;  %v5699_v9 = vpack.c.bf16 %v907_v20, %v906_v19 }
 0x27c   : > { %6703 = vst [vmem:[#allocation26_spill] sm:$0xff] %v5643_v0  ;;  %6704 = vst [vmem:[#allocation27_spill] sm:$0xff] %v5645_v17 }
 0x27d   : > { %6725 = vst [vmem:[#allocation48_spill] sm:$0xff] %v5699_v9  ;;  %4171 = vmatprep.subr.bf16.mxu0 %v5699_v9 }
 0x27e   : > { %1606 = vadd.xlane.f32.xlu1 %v1575_v26  ;;  %4173 = vmatpush3.bf16.msra.mxu0 %v5699_v9 }
 0x27f   : > { %v5651_v32 = vpop.xlane.xlu1 %1542  ;;  %v5653_v55 = vpop.xlane.xlu0 %1540  ;;  %1604 = vadd.xlane.f32.xlu0 %v1574_v31  ;;  %4174 = vmatprep.subr.bf16.mxu0 %v6617_v54 }
 0x280   : > { %6705 = vst [vmem:[#allocation28_spill] sm:$0xff] %v5651_v32  ;;  %6706 = vst [vmem:[#allocation29_spill] sm:$0xff] %v5653_v55 }
 0x283   : > { %v5655_v38 = vpop.xlane.xlu1 %1546  ;;  %v5657_v2 = vpop.xlane.xlu0 %1544 }
 0x284   : > { %6707 = vst [vmem:[#allocation30_spill] sm:$0xff] %v5655_v38  ;;  %6708 = vst [vmem:[#allocation31_spill] sm:$0xff] %v5657_v2 }
 0x287   : > { %v5661_v22 = vpop.xlane.xlu1 %1550 }
 0x288   : > { %6710 = vst [vmem:[#allocation33_spill] sm:$0xff] %v5661_v22  ;;  %v5664_v39 = vpop.xlane.xlu0 %1548 }
 0x289   : > { %6711 = vst [vmem:[#allocation34_spill] sm:$0xff] %v5664_v39 }
 0x28b   : > { %v5667_v16 = vpop.xlane.xlu1 %1554 }
 0x28c   : > { %6712 = vst [vmem:[#allocation35_spill] sm:$0xff] %v5667_v16  ;;  %v5669_v35 = vpop.xlane.xlu0 %1552 }
 0x28d   : > { %6713 = vst [vmem:[#allocation36_spill] sm:$0xff] %v5669_v35 }
 0x28f   : > { %v5676_v40 = vpop.xlane.xlu1 %2109 }
 0x290   : > { %6716 = vst [vmem:[#allocation39_spill] sm:$0xff] %v5676_v40  ;;  %v5679_v4 = vpop.xlane.xlu0 %2107 }
 0x291   : > { %6717 = vst [vmem:[#allocation40_spill] sm:$0xff] %v5679_v4 }
 0x293   : > { %v5682_v62 = vpop.xlane.xlu1 %2113 }
 0x294   : > { %6718 = vst [vmem:[#allocation41_spill] sm:$0xff] %v5682_v62  ;;  %v5685_v8 = vpop.xlane.xlu0 %2111 }
 0x295   : > { %6719 = vst [vmem:[#allocation42_spill] sm:$0xff] %v5685_v8 }
 0x297   : > { %v5690_v52 = vpop.xlane.xlu1 %2117 }
 0x298   : > { %6721 = vst [vmem:[#allocation44_spill] sm:$0xff] %v5690_v52  ;;  %v5693_v53 = vpop.xlane.xlu0 %2115 }
 0x299   : > { %6722 = vst [vmem:[#allocation45_spill] sm:$0xff] %v5693_v53 }
 0x29b   : > { %v5695_v12 = vpop.xlane.xlu1 %2121 }
 0x29c   : > { %6723 = vst [vmem:[#allocation46_spill] sm:$0xff] %v5695_v12  ;;  %v5697_v25 = vpop.xlane.xlu0 %2119 }
 0x29d   : > { %6724 = vst [vmem:[#allocation47_spill] sm:$0xff] %v5697_v25 }
 0x29f   : > { %v5702_v10 = vpop.xlane.xlu1 %2125 }
 0x2a0   : > { %6726 = vst [vmem:[#allocation49_spill] sm:$0xff] %v5702_v10  ;;  %v5705_v26 = vpop.xlane.xlu0 %2123 }
 0x2a1   : > { %6727 = vst [vmem:[#allocation50_spill] sm:$0xff] %v5705_v26 }
 0x2a3   : > { %v5708_v31 = vpop.xlane.xlu1 %2129 }
 0x2a4   : > { %6728 = vst [vmem:[#allocation51_spill] sm:$0xff] %v5708_v31  ;;  %v5710_v5 = vpop.xlane.xlu0 %2127 }
 0x2a5   : > { %6729 = vst [vmem:[#allocation52_spill] sm:$0xff] %v5710_v5 }
 0x2a7   : > { %v5712_v14 = vpop.xlane.xlu1 %2133 }
 0x2a8   : > { %6730 = vst [vmem:[#allocation53_spill] sm:$0xff] %v5712_v14  ;;  %v5714_v27 = vpop.xlane.xlu0 %2131 }
 0x2a9   : > { %6731 = vst [vmem:[#allocation54_spill] sm:$0xff] %v5714_v27 }
 0x2ab   : > { %v5716_v28 = vpop.xlane.xlu1 %2137 }
 0x2ac   : > { %6732 = vst [vmem:[#allocation55_spill] sm:$0xff] %v5716_v28  ;;  %v5718_v41 = vpop.xlane.xlu0 %2135 }
 0x2ad   : > { %6733 = vst [vmem:[#allocation56_spill] sm:$0xff] %v5718_v41 }
 0x2af   : > { %v1000_v42 = vpop.xlane.xlu1 %999 }
 0x2b0   : > { %v998_v63 = vpop.xlane.xlu0 %997  ;;  %v1100_v35 = vadd.f32 %v1000_v42, %v5562_v13 }
 0x2b1   : > { %v1099_v22 = vadd.f32 %v998_v63, %v5556_v6 }
 0x2b2   : > { %v1116_v32 = vmul.f32 0.2, %v1100_v35 }
 0x2b3   : > { %v1004_v46 = vpop.xlane.xlu1 %1003  ;;  %v1115_v0 = vmul.f32 0.2, %v1099_v22 }
 0x2b4   : > { %v1002_v19 = vpop.xlane.xlu0 %1001  ;;  %v1102_v38 = vadd.f32 %v1004_v46, %v5560_v1  ;;  %v1132_v51 = vmax.f32 %v1100_v35, %v1116_v32 }
 0x2b5   : > { %v1101_v55 = vadd.f32 %v1002_v19, %v5554_v34  ;;  %v1131_v63 = vmax.f32 %v1099_v22, %v1115_v0 }
 0x2b6   : > { %v1118_v48 = vmul.f32 0.2, %v1102_v38  ;;  %v1149_v15 = vmul.f32 1.442695, %v1132_v51 }
 0x2b7   : > { %v1008_v20 = vpop.xlane.xlu1 %1007  ;;  %v1117_v47 = vmul.f32 0.2, %v1101_v55  ;;  %v1147_v28 = vmul.f32 1.442695, %v1131_v63 }
 0x2b8   : > { %v1006_v58 = vpop.xlane.xlu0 %1005  ;;  %v1104_v17 = vadd.f32 %v1008_v20, %v5566_v21  ;;  %v1134_v49 = vmax.f32 %v1102_v38, %v1118_v48  ;;  %4420 = vpow2.f32 %v1149_v15 }
 0x2b9   : > { %v1103_v59 = vadd.f32 %v1006_v58, %v5568_v18  ;;  %v1133_v20 = vmax.f32 %v1101_v55, %v1117_v47  ;;  %4422 = vpow2.f32 %v1147_v28 }
 0x2ba   : > { %v1120_v9 = vmul.f32 0.2, %v1104_v17  ;;  %v1153_v32 = vmul.f32 1.442695, %v1134_v49 }
 0x2bb   : > { %v1012_v16 = vpop.xlane.xlu1 %1011  ;;  %v1119_v19 = vmul.f32 0.2, %v1103_v59  ;;  %v1151_v48 = vmul.f32 1.442695, %v1133_v20 }
 0x2bc   : > { %v1010_v54 = vpop.xlane.xlu0 %1009  ;;  %v1106_v42 = vadd.f32 %v1012_v16, %v5572_v23  ;;  %v1136_v14 = vmax.f32 %v1104_v17, %v1120_v9  ;;  %4424 = vpow2.f32 %v1153_v32 }
 0x2bd   : > { %v1105_v46 = vadd.f32 %v1010_v54, %v5574_v24  ;;  %v1135_v0 = vmax.f32 %v1103_v59, %v1119_v19  ;;  %4426 = vpow2.f32 %v1151_v48 }
 0x2be   : > { %v1122_v41 = vmul.f32 0.2, %v1106_v42  ;;  %v1157_v51 = vmul.f32 1.442695, %v1136_v14 }
 0x2bf   : > { %v1016_v39 = vpop.xlane.xlu1 %1015  ;;  %v1121_v27 = vmul.f32 0.2, %v1105_v46 }
 0x2c0   : > { %v1014_v2 = vpop.xlane.xlu0 %1013  ;;  %v1108_v22 = vadd.f32 %v1016_v39, %v5578_v29  ;;  %v1138_v38 = vmax.f32 %v1106_v42, %v1122_v41  ;;  %v1155_v39 = vmul.f32 1.442695, %v1135_v0  ;;  %4428 = vpow2.f32 %v1157_v51 }
 0x2c1   : > { %v1137_v17 = vmax.f32 %v1105_v46, %v1121_v27  ;;  %v1107_v15 = vadd.f32 %v1014_v2, %v5580_v30 }
 0x2c2   : > { %v1124_v9 = vmul.f32 0.2, %v1108_v22  ;;  %v1161_v42 = vmul.f32 1.442695, %v1138_v38  ;;  %4430 = vpow2.f32 %v1155_v39 }
 0x2c3   : > { %v1020_v3 = vpop.xlane.xlu1 %1019  ;;  %v1159_v14 = vmul.f32 1.442695, %v1137_v17  ;;  %v1123_v32 = vmul.f32 0.2, %v1107_v15 }
 0x2c4   : > { %v1018_v60 = vpop.xlane.xlu0 %1017  ;;  %v1110_v27 = vadd.f32 %v1020_v3, %v5585_v33  ;;  %4432 = vpow2.f32 %v1161_v42 }
 0x2c5   : > { %v1109_v19 = vadd.f32 %v1018_v60, %v5587_v37  ;;  %4434 = vpow2.f32 %v1159_v14 }
 0x2c6   : > { %v1126_v60 = vmul.f32 0.2, %v1110_v27 }
 0x2c7   : > { %v1024_v11 = vpop.xlane.xlu1 %1023 }
 0x2c8   : > { %v5728_v36 = vpop.xlane.xlu0 %1021  ;;  %v5766_v51 = vadd.f32 %v1024_v11, %v5593_v43  ;;  %v1142_v11 = vmax.f32 %v1110_v27, %v1126_v60 }
 0x2cb   : > { %v5730_v58 = vpop.xlane.xlu1 %1027 }
 0x2cc   : > { %v5732_v35 = vpop.xlane.xlu0 %1025 }
 0x2cd   : > { %v1095_v54 = vpop.f32.mrb[0].mxu0 }
 0x2ce   : > { %v5736_v16 = vrot.slane %v1095_v54, %v5345_v61  ;;  %v3703_v47 = vpop.f32.mrb[1].mxu0 }
 0x2cf   : > { %v5738_v55 = vpop.xlane.xlu1 %1578 }
 0x2d0   : > { %6734 = vst [vmem:[#allocation57_spill] sm:$0xff] %v5738_v55  ;;  %v5740_v49 = vpop.xlane.xlu0 %1576  ;;  %v1199_v59 = vadd.f32 %v5736_v16, %v5556_v6  ;;  %v1200_v41 = vadd.f32 %v5736_v16, %v5562_v13  ;;  %v1201_v20 = vadd.f32 %v5736_v16, %v5554_v34  ;;  %v1202_v2 = vadd.f32 %v5736_v16, %v5560_v1  ;;  %v5763_v1 = vpop.eup %4420 }
 0x2d1   : > { %6735 = vst [vmem:[#allocation58_spill] sm:$0xff] %v5740_v49  ;;  %v1140_v13 = vmax.f32 %v1108_v22, %v1124_v9  ;;  %v1203_v48 = vadd.f32 %v5736_v16, %v5568_v18  ;;  %v1204_v34 = vadd.f32 %v5736_v16, %v5566_v21  ;;  %v1125_v22 = vmul.f32 0.2, %v1109_v19  ;;  %v5768_v39 = vpop.eup %4422 }
 0x2d2   : > { %v1215_v28 = vmul.f32 0.2, %v1199_v59  ;;  %v1216_v46 = vmul.f32 0.2, %v1200_v41  ;;  %v1217_v17 = vmul.f32 0.2, %v1201_v20  ;;  %v1139_v18 = vmax.f32 %v1107_v15, %v1123_v32  ;;  %v5772_v14 = vpop.eup %4424 }
 0x2d3   : > { %v5748_v63 = vpop.xlane.xlu1 %2161  ;;  %6736 = vst [vmem:[#allocation59_spill] sm:$0xff] %v5768_v39  ;;  %v1165_v9 = vmul.f32 1.442695, %v1140_v13  ;;  %v1220_v42 = vmul.f32 0.2, %v1204_v34  ;;  %6737 = vst [vmem:[#allocation60_spill] sm:$0xff] %v5772_v14  ;;  %v1111_v21 = vadd.f32 %v5728_v36, %v5595_v50  ;;  %v5776_v55 = vpop.eup %4426  ;;  %v1141_v13 = vmax.f32 %v1109_v19, %v1125_v22 }
 0x2d4   : > { %v1231_v6 = vmax.f32 %v1199_v59, %v1215_v28  ;;  %v5755_v0 = vpop.xlane.xlu0 %2159  ;;  %v1232_v54 = vmax.f32 %v1200_v41, %v1216_v46  ;;  %v1218_v59 = vmul.f32 0.2, %v1202_v2  ;;  %v1219_v41 = vmul.f32 0.2, %v1203_v48  ;;  %v5781_v14 = vpop.eup %4428 }
 0x2d5   : > { %v1233_v46 = vmax.f32 %v1201_v20, %v1217_v17  ;;  %v1236_v49 = vmax.f32 %v1204_v34, %v1220_v42  ;;  %v1128_v15 = vmul.f32 0.2, %v5766_v51  ;;  %v1205_v27 = vadd.f32 %v5736_v16, %v5574_v24  ;;  %v5789_v60 = vpop.eup %4430  ;;  %v1179_v42 = vld [vmem:[#allocation9] sm:$0xff] }
 0x2d6   : > { %v1247_v3 = vmul.f32 1.442695, %v1231_v6  ;;  %v1249_v38 = vmul.f32 1.442695, %v1232_v54  ;;  %v1234_v6 = vmax.f32 %v1202_v2, %v1218_v59  ;;  %v1235_v54 = vmax.f32 %v1203_v48, %v1219_v41 }
 0x2d7   : > { %v5761_v47 = vpop.xlane.xlu1 %2165  ;;  %v1251_v32 = vmul.f32 1.442695, %v1233_v46  ;;  %v1163_v2 = vmul.f32 1.442695, %v1139_v18  ;;  %v1127_v48 = vmul.f32 0.2, %v1111_v21  ;;  %v1206_v19 = vadd.f32 %v5736_v16, %v5572_v23 }
 0x2d8   : > { %v5770_v28 = vpop.xlane.xlu0 %2163  ;;  %4436 = vpow2.f32 %v1247_v3  ;;  %v1253_v61 = vmul.f32 1.442695, %v1234_v6  ;;  %v1255_v36 = vmul.f32 1.442695, %v1235_v54  ;;  %v1257_v3 = vmul.f32 1.442695, %v1236_v49  ;;  %v5793_v49 = vpop.eup %4432 }
 0x2d9   : > { %4438 = vpow2.f32 %v1249_v38  ;;  %v1169_v38 = vmul.f32 1.442695, %v1142_v11  ;;  %v1221_v34 = vmul.f32 0.2, %v1205_v27  ;;  %v1207_v22 = vadd.f32 %v5736_v16, %v5580_v30  ;;  %v1180_v6 = vld [vmem:[#allocation9 + $0x8] sm:$0xff] }
 0x2da   : > { %4440 = vpow2.f32 %v1165_v9  ;;  %v1167_v17 = vmul.f32 1.442695, %v1141_v13  ;;  %v1144_v24 = vmax.f32 %v5766_v51, %v1128_v15  ;;  %v1222_v59 = vmul.f32 0.2, %v1206_v19  ;;  %v5796_v9 = vpop.eup %4434 }
 0x2db   : > { %v5779_v39 = vpop.xlane.xlu1 %2169  ;;  %4442 = vpow2.f32 %v1251_v32  ;;  %v5800_v23 = vadd.f32 %v5730_v58, %v5605_v7  ;;  %v1237_v18 = vmax.f32 %v1205_v27, %v1221_v34  ;;  %v1143_v41 = vmax.f32 %v1111_v21, %v1127_v48 }
 0x2dc   : > { %v5785_v20 = vpop.xlane.xlu0 %2167  ;;  %4444 = vpow2.f32 %v1253_v61  ;;  %v1223_v61 = vmul.f32 0.2, %v1207_v22  ;;  %v5804_v30 = vadd.f32 %v5732_v35, %v5607_v45  ;;  %v1238_v46 = vmax.f32 %v1206_v19, %v1222_v59 }
 0x2dd   : > { %4446 = vpow2.f32 %v1255_v36  ;;  %v1259_v11 = vmul.f32 1.442695, %v1237_v18  ;;  %v1208_v58 = vadd.f32 %v5736_v16, %v5578_v29  ;;  %v1173_v21 = vmul.f32 1.442695, %v1144_v24 }
 0x2de   : > { %4448 = vpow2.f32 %v1257_v3  ;;  %v1239_v54 = vmax.f32 %v1207_v22, %v1223_v61  ;;  %v5814_v35 = vadd.f32 %v5748_v63, %v5676_v40  ;;  %v1261_v32 = vmul.f32 1.442695, %v1238_v46  ;;  %v1182_v63 = vld [vmem:[#allocation9 + $0x18] sm:$0xff]  ;;  %v1183_v61 = vld [vmem:[#allocation9 + $0x20] sm:$0xff] }
 0x2df   : > { %4450 = vpow2.f32 %v1163_v2  ;;  %v5806_v51 = vpop.xlane.xlu1 %2173  ;;  %v1130_v3 = vmul.f32 0.2, %v5800_v23  ;;  %v1181_v2 = vld [vmem:[#allocation9 + $0x10] sm:$0xff]  ;;  %v1171_v19 = vmul.f32 1.442695, %v1143_v41  ;;  %v1209_v24 = vadd.f32 %v5736_v16, %v5587_v37 }
 0x2e0   : > { %4452 = vpow2.f32 %v1169_v38  ;;  %v5810_v13 = vpop.xlane.xlu0 %2171  ;;  %v1263_v48 = vmul.f32 1.442695, %v1239_v54  ;;  %v1129_v29 = vmul.f32 0.2, %v5804_v30  ;;  %v1224_v34 = vmul.f32 0.2, %v1208_v58 }
 0x2e1   : > { %4454 = vpow2.f32 %v1167_v17  ;;  %v5822_v17 = vadd.f32 %v5755_v0, %v5679_v4  ;;  %v2280_v18 = vmul.f32 0.2, %v5814_v35 }
 0x2e2   : > { %v4437_v15 = vpop.eup %4436  ;;  %4456 = vpow2.f32 %v1259_v11  ;;  %v1240_v41 = vmax.f32 %v1208_v58, %v1224_v34  ;;  %v1225_v11 = vmul.f32 0.2, %v1209_v24 }
 0x2e3   : > { %v4439_v36 = vpop.eup %4438  ;;  %v1279_v27 = vmul.f32 %v4437_v15, %v1179_v42  ;;  %4458 = vpow2.f32 %v1261_v32  ;;  %v1210_v42 = vadd.f32 %v5736_v16, %v5585_v33  ;;  %v5829_v0 = vpop.xlane.xlu1 %2177  ;;  %v1145_v32 = vmax.f32 %v5804_v30, %v1129_v29 }
 0x2e4   : > { %v1280_v38 = vmul.f32 %v4439_v36, %v1180_v6  ;;  %v5818_v22 = vpop.eup %4440  ;;  %4460 = vpow2.f32 %v1263_v48  ;;  %v1146_v6 = vmax.f32 %v5800_v23, %v1130_v3  ;;  %v5833_v54 = vpop.xlane.xlu0 %2175  ;;  %v6738_v36 = vmov 0.0|0.0  }
 0x2e5   : > { %1456 = vadd.xlane.f32.xlu0 %v1279_v27  ;;  %3736 = vmatprep.mubr.f32.mxu1 %v1279_v27  ;;  %v4443_v59 = vpop.eup %4442  ;;  %4462 = vpow2.f32 %v1173_v21  ;;  %v1265_v33 = vmul.f32 1.442695, %v1240_v41  ;;  %v2279_v48 = vmul.f32 0.2, %v5822_v17  ;;  %v1184_v21 = vld [vmem:[#allocation9 + $0x28] sm:$0xff]  ;;  %v1241_v3 = vmax.f32 %v1209_v24, %v1225_v11  ;;  %v1185_v24 = vld [vmem:[#allocation9 + $0x30] sm:$0xff] }
 0x2e6   : > { %1458 = vadd.xlane.f32.xlu1 %v1280_v38  ;;  %3737 = vmatmul.mubr.f32.vlgmr.msra.gmra.mrb[0].mxu1 %v1280_v38  ;;  %v4445_v46 = vpop.eup %4444  ;;  %v1281_v37 = vmul.f32 %v4443_v59, %v1181_v2  ;;  %4464 = vpow2.f32 %v1171_v19  ;;  %v1226_v2 = vmul.f32 0.2, %v1210_v42  ;;  %v2296_v34 = vmax.f32 %v5814_v35, %v2280_v18 }
 0x2e7   : > { %4120 = vmatpush3.bf16.xpose.msra.mxu1 %v5599_v44  ;;  %v4447_v15 = vpop.eup %4446  ;;  %v1282_v58 = vmul.f32 %v4445_v46, %v1182_v63  ;;  %4466 = vpow2.f32 %v1265_v33  ;;  %v1211_v30 = vadd.f32 %v5736_v16, %v5595_v50  ;;  %v1177_v29 = vmul.f32 1.442695, %v1146_v6  ;;  %v5853_v50 = vpop.xlane.xlu1 %2181 }
 0x2e8   : > { %4121 = vmatprep.subr.bf16.mxu1 %v6738_v36  ;;  %v4449_v27 = vpop.eup %4448  ;;  %3739 = vmatprep.mubr.f32.mxu1 %v1281_v37  ;;  %v1283_v23 = vmul.f32 %v4447_v15, %v1183_v61  ;;  %v5847_v63 = vadd.f32 %v5770_v28, %v5685_v8  ;;  %v1267_v59 = vmul.f32 1.442695, %v1241_v3  ;;  %v1242_v61 = vmax.f32 %v1210_v42, %v1226_v2  ;;  %v1186_v15 = vld [vmem:[#allocation9 + $0x38] sm:$0xff] }
 0x2e9   : > { %1460 = vadd.xlane.f32.xlu0 %v1281_v37  ;;  %v5838_v38 = vpop.eup %4450  ;;  %v1175_v35 = vmul.f32 1.442695, %v1145_v32  ;;  %v1284_v18 = vmul.f32 %v4449_v27, %v1184_v21  ;;  %v1227_v46 = vmul.f32 0.2, %v1211_v30  ;;  %v1212_v37 = vadd.f32 %v5736_v16, %v5593_v43  ;;  %v1187_v27 = vld [vmem:[#allocation9 + $0x40] sm:$0xff] }
 0x2ea   : > { %1462 = vadd.xlane.f32.xlu1 %v1282_v58  ;;  %3740 = vmatmul.mubr.f32.gmra.mrb[2].mxu1 %v1282_v58  ;;  %v5843_v19 = vpop.eup %4452  ;;  %v2295_v6 = vmax.f32 %v5822_v17, %v2279_v48  ;;  %4468 = vpow2.f32 %v1267_v59  ;;  %v1269_v28 = vmul.f32 1.442695, %v1242_v61  ;;  %v1213_v42 = vadd.f32 %v5736_v16, %v5607_v45  ;;  %v2180_v58 = vpop.xlane.xlu0 %2179 }
 0x2eb   : > { %3742 = vmatprep.mubr.f32.mxu1 %v1283_v23  ;;  %v5849_v41 = vpop.eup %4454  ;;  %v2313_v33 = vmul.f32 1.442695, %v2296_v34  ;;  %v5860_v43 = vadd.f32 %v5761_v47, %v5682_v62  ;;  %v1243_v21 = vmax.f32 %v1211_v30, %v1227_v46  ;;  %4470 = vpow2.f32 %v1177_v29 }
 0x2ec   : > { %v4457_v11 = vpop.eup %4456  ;;  %v2281_v17 = vmul.f32 0.2, %v5847_v63  ;;  %v1228_v48 = vmul.f32 0.2, %v1212_v37  ;;  %v5866_v34 = vadd.f32 %v5785_v20, %v5693_v53  ;;  %4472 = vpow2.f32 %v1269_v28 }
 0x2ed   : > { %1464 = vadd.xlane.f32.xlu0 %v1283_v23  ;;  %v1285_v32 = vmul.f32 %v4457_v11, %v1185_v24  ;;  %v4459_v3 = vpop.eup %4458  ;;  %v1229_v23 = vmul.f32 0.2, %v1213_v42  ;;  %v1271_v47 = vmul.f32 1.442695, %v1243_v21  ;;  %4474 = vpow2.f32 %v1175_v35  ;;  %v1188_v11 = vld [vmem:[#allocation9 + $0x48] sm:$0xff] }
 0x2ee   : > { %1466 = vadd.xlane.f32.xlu1 %v1284_v18  ;;  %3743 = vmatmul.mubr.f32.gmra.mrb[4].mxu1 %v1284_v18  ;;  %v4461_v45 = vpop.eup %4460  ;;  %v1286_v2 = vmul.f32 %v4459_v3, %v1186_v15  ;;  %v1244_v24 = vmax.f32 %v1212_v37, %v1228_v48  ;;  %v2311_v18 = vmul.f32 1.442695, %v2295_v6  ;;  %v2282_v46 = vmul.f32 0.2, %v5860_v43  ;;  %v2186_v15 = vpop.xlane.xlu1 %2185 }
 0x2ef   : > { %4123 = vmatpush3.bf16.xpose.msra.mxu1 %v5619_v57  ;;  %3745 = vmatprep.mubr.f32.mxu1 %v1285_v32  ;;  %v5869_v30 = vpop.eup %4462  ;;  %v1287_v29 = vmul.f32 %v4461_v45, %v1187_v27  ;;  %v1245_v59 = vmax.f32 %v1213_v42, %v1229_v23  ;;  %v5876_v20 = vadd.f32 %v5779_v39, %v5690_v52  ;;  %4476 = vpow2.f32 %v1271_v47  ;;  %v2184_v42 = vpop.xlane.xlu0 %2183  ;;  %v1190_v47 = vld [vmem:[#allocation9 + $0x58] sm:$0xff] }
 0x2f0   : > { %4124 = vmatprep.subr.bf16.mxu1 %v6738_v36  ;;  %v5871_v61 = vpop.eup %4464  ;;  %v5880_v35 = vadd.f32 %v5810_v13, %v5697_v25  ;;  %v1273_v37 = vmul.f32 1.442695, %v1244_v24  ;;  %v1214_v6 = vadd.f32 %v5736_v16, %v5605_v7  ;;  %4478 = vpow2.f32 %v2313_v33  ;;  %v1189_v13 = vld [vmem:[#allocation9 + $0x50] sm:$0xff] }
 0x2f1   : > { %1468 = vadd.xlane.f32.xlu0 %v1285_v32  ;;  %v1275_v28 = vmul.f32 1.442695, %v1245_v59  ;;  %v4467_v32 = vpop.eup %4466  ;;  %v2297_v27 = vmax.f32 %v5847_v63, %v2281_v17  ;;  %v2283_v39 = vmul.f32 0.2, %v5866_v34  ;;  %v5888_v21 = vadd.f32 %v5806_v51, %v5695_v12  ;;  %v6812_v12 = vld [vmem:[#allocation28_spill] sm:$0xff] }
 0x2f2   : > { %1470 = vadd.xlane.f32.xlu1 %v1286_v2  ;;  %3746 = vmatmul.mubr.f32.gmra.mrb[6].mxu1 %v1286_v2  ;;  %v1288_v3 = vmul.f32 %v4467_v32, %v1188_v11  ;;  %v5892_v48 = vadd.f32 %v5833_v54, %v5705_v26  ;;  %4480 = vpow2.f32 %v1273_v37  ;;  %v1230_v7 = vmul.f32 0.2, %v1214_v6 }
 0x2f3   : > { %3748 = vmatprep.mubr.f32.mxu1 %v1287_v29  ;;  %v2298_v16 = vmax.f32 %v5860_v43, %v2282_v46  ;;  %v2284_v33 = vmul.f32 0.2, %v5876_v20  ;;  %v5898_v63 = vadd.f32 %v5829_v0, %v5702_v10  ;;  %4482 = vpow2.f32 %v1275_v28  ;;  %v6740_v46 = vld [vmem:[#allocation54_spill] sm:$0xff]  ;;  %v2188_v37 = vpop.xlane.xlu0 %2187 }
 0x2f4   : > { %v4469_v51 = vpop.eup %4468  ;;  %4484 = vpow2.f32 %v2311_v18  ;;  %v2285_v17 = vmul.f32 0.2, %v5880_v35  ;;  %v5902_v54 = vadd.f32 %v2180_v58, %v5710_v5  ;;  %v1246_v23 = vmax.f32 %v1214_v6, %v1230_v7 }
 0x2f5   : > { %1472 = vadd.xlane.f32.xlu0 %v1287_v29  ;;  %v2315_v45 = vmul.f32 1.442695, %v2297_v27  ;;  %v1289_v43 = vmul.f32 %v4469_v51, %v1189_v13  ;;  %v2286_v2 = vmul.f32 0.2, %v5888_v21  ;;  %v5908_v0 = vadd.f32 %v5853_v50, %v5708_v31  ;;  %v2190_v29 = vpop.xlane.xlu1 %2189  ;;  %v5910_v24 = vpop.eup %4470  ;;  %v1191_v50 = vld [vmem:[#allocation9 + $0x60] sm:$0xff]  ;;  %v6743_v51 = vld [vmem:[#allocation55_spill] sm:$0xff] }
 0x2f6   : > { %1474 = vadd.xlane.f32.xlu1 %v1288_v3  ;;  %3749 = vmatmul.mubr.f32.gmra.mrb[8].mxu1 %v1288_v3  ;;  %6739 = vst [vmem:[#allocation61_spill] sm:$0xff] %v5910_v24  ;;  %v2299_v59 = vmax.f32 %v5866_v34, %v2283_v39  ;;  %v2287_v58 = vmul.f32 0.2, %v5892_v48  ;;  %v1277_v18 = vmul.f32 1.442695, %v1246_v23  ;;  %v5916_v11 = vadd.f32 %v2184_v42, %v6740_v46  ;;  %v4473_v28 = vpop.eup %4472  ;;  %v6741_v3 = vld [vmem:[#allocation53_spill] sm:$0xff] }
 0x2f7   : > { %4126 = vmatpush3.bf16.xpose.msra.mxu1 %v5641_v56  ;;  %v2317_v6 = vmul.f32 1.442695, %v2298_v16  ;;  %v2300_v32 = vmax.f32 %v5876_v20, %v2284_v33  ;;  %3751 = vmatprep.mubr.f32.mxu1 %v1289_v43  ;;  %v2288_v27 = vmul.f32 0.2, %v5898_v63  ;;  %v2276_v34 = vadd.f32 %v2186_v15, %v6741_v3  ;;  %v5921_v39 = vpop.eup %4474  ;;  %v6744_v33 = vld [vmem:[#allocation56_spill] sm:$0xff] }
 0x2f8   : > { %4127 = vmatprep.subr.bf16.mxu1 %v6738_v36  ;;  %6742 = vst [vmem:[#allocation62_spill] sm:$0xff] %v5921_v39  ;;  %v2301_v13 = vmax.f32 %v5880_v35, %v2285_v17  ;;  %v1290_v7 = vmul.f32 %v4473_v28, %v1190_v47  ;;  %v2289_v42 = vmul.f32 0.2, %v5902_v54  ;;  %v2278_v23 = vadd.f32 %v2190_v29, %v6743_v51  ;;  %v1192_v35 = vld [vmem:[#allocation9 + $0x68] sm:$0xff] }
 0x2f9   : > { %1476 = vadd.xlane.f32.xlu0 %v1289_v43  ;;  %v4477_v46 = vpop.eup %4476  ;;  %v2302_v16 = vmax.f32 %v5888_v21, %v2286_v2  ;;  %v2290_v20 = vmul.f32 0.2, %v5908_v0  ;;  %4486 = vpow2.f32 %v1277_v18  ;;  %v2277_v43 = vadd.f32 %v2188_v37, %v6744_v33  ;;  %v1193_v2 = vld [vmem:[#allocation9 + $0x70] sm:$0xff] }
 0x2fa   : > { %v2319_v31 = vmul.f32 1.442695, %v2299_v59  ;;  %1478 = vadd.xlane.f32.xlu1 %v1290_v7  ;;  %3752 = vmatmul.mubr.f32.gmra.mrb[10].mxu1 %v1290_v7  ;;  %v1291_v15 = vmul.f32 %v4477_v46, %v1191_v50  ;;  %v2303_v3 = vmax.f32 %v5892_v48, %v2287_v58  ;;  %v2291_v17 = vmul.f32 0.2, %v5916_v11  ;;  %v5931_v47 = vpop.eup %4478  ;;  %v6746_v7 = vld [vmem:[#allocation32_spill] sm:$0xff] }
 0x2fb   : > { %6745 = vst [vmem:[#allocation63_spill] sm:$0xff] %v5931_v47  ;;  %4488 = vpow2.f32 %v2315_v45  ;;  %v2321_v29 = vmul.f32 1.442695, %v2300_v32  ;;  %v2304_v21 = vmax.f32 %v5898_v63, %v2288_v27  ;;  %v2292_v28 = vmul.f32 0.2, %v2276_v34 }
 0x2fc   : > { %v4481_v18 = vpop.eup %4480  ;;  %4490 = vpow2.f32 %v2317_v6  ;;  %v2323_v37 = vmul.f32 1.442695, %v2301_v13  ;;  %3754 = vmatprep.mubr.f32.mxu1 %v1291_v15  ;;  %v2305_v59 = vmax.f32 %v5902_v54, %v2289_v42  ;;  %v2294_v46 = vmul.f32 0.2, %v2278_v23 }
 0x2fd   : > { %1480 = vadd.xlane.f32.xlu0 %v1291_v15  ;;  %v4483_v48 = vpop.eup %4482  ;;  %v2325_v58 = vmul.f32 1.442695, %v2302_v16  ;;  %v1292_v50 = vmul.f32 %v4481_v18, %v1192_v35  ;;  %v2306_v45 = vmax.f32 %v5908_v0, %v2290_v20  ;;  %v2293_v32 = vmul.f32 0.2, %v2277_v43  ;;  %v1194_v20 = vld [vmem:[#allocation9 + $0x78] sm:$0xff]  ;;  %v4741_v18 = vld [vmem:[#allocation2] sm:$0xff] }
 0x2fe   : > { %v5937_v51 = vpop.eup %4484  ;;  %4492 = vpow2.f32 %v2319_v31  ;;  %v2327_v63 = vmul.f32 1.442695, %v2303_v3  ;;  %v1293_v27 = vmul.f32 %v4483_v48, %v1193_v2  ;;  %v2307_v6 = vmax.f32 %v5916_v11, %v2291_v17  ;;  %v6753_v48 = vld [vmem:[#allocation59_spill] sm:$0xff] }
 0x2ff   : > { %4129 = vmatpush3.bf16.xpose.msra.mxu1 %v6746_v7  ;;  %6747 = vst [vmem:[#allocation32_spill] sm:$0xff] %v5937_v51  ;;  %4494 = vpow2.f32 %v2321_v29  ;;  %v2329_v54 = vmul.f32 1.442695, %v2304_v21  ;;  %1482 = vadd.xlane.f32.xlu1 %v1292_v50  ;;  %v2308_v13 = vmax.f32 %v2276_v34, %v2292_v28  ;;  %v2331_v42 = vmul.f32 1.442695, %v2305_v59  ;;  %v6749_v34 = vld [vmem:[#allocation37_spill] sm:$0xff] }
 0x300   : > { %4130 = vmatprep.subr.bf16.mxu1 %v6738_v36  ;;  %3755 = vmatmul.mubr.f32.gmra.mrb[12].mxu1 %v1292_v50  ;;  %4496 = vpow2.f32 %v2323_v37  ;;  %v2310_v0 = vmax.f32 %v2278_v23, %v2294_v46  ;;  %v2333_v16 = vmul.f32 1.442695, %v2306_v45  ;;  %v2309_v31 = vmax.f32 %v2277_v43, %v2293_v32  ;;  %v4740_v43 = vld [vmem:[#allocation2 + $0x8] sm:$0xff]  ;;  %v4742_v45 = vld [vmem:[#allocation2 + $0x18] sm:$0xff]  ;;  %v6755_v32 = vld [vmem:[#allocation60_spill] sm:$0xff] }
 0x301   : > { %3757 = vmatprep.mubr.f32.mxu1 %v1293_v27  ;;  %1484 = vadd.xlane.f32.xlu0 %v1293_v27  ;;  %4498 = vpow2.f32 %v2325_v58  ;;  %v2335_v3 = vmul.f32 1.442695, %v2307_v6  ;;  %v2337_v11 = vmul.f32 1.442695, %v2308_v13  ;;  %v6751_v23 = vmov 0.0   ;;  %v4743_v13 = vld [vmem:[#allocation2 + $0x10] sm:$0xff] }
 0x302   : > { %4500 = vpow2.f32 %v2327_v63  ;;  %v2341_v17 = vmul.f32 1.442695, %v2310_v0  ;;  %v2339_v21 = vmul.f32 1.442695, %v2309_v31  ;;  %v2461_v28 = vmul.f32 %v4740_v43, %v5931_v47  ;;  %v4744_v0 = vld [vmem:[#allocation2 + $0x28] sm:$0xff]  ;;  %v4745_v31 = vld [vmem:[#allocation2 + $0x20] sm:$0xff] }
 0x303   : > { %v4487_v15 = vpop.eup %4486  ;;  %4502 = vpow2.f32 %v2329_v54  ;;  %v2460_v37 = vmul.f32 %v4741_v18, %v5937_v51  ;;  %v1296_v46 = vmul.f32 %v4740_v43, %v5763_v1  ;;  %v1295_v58 = vmul.f32 %v4741_v18, %v6753_v48  ;;  %v6762_v18 = vld [vmem:[#allocation38_spill] sm:$0xff] }
 0x304   : > { %4504 = vpow2.f32 %v2331_v42  ;;  %v1294_v35 = vmul.f32 %v4487_v15, %v1194_v20  ;;  %v1298_v63 = vmul.f32 %v4742_v45, %v6755_v32  ;;  %v1297_v42 = vmul.f32 %v4743_v13, %v5776_v55 }
 0x305   : > { %v5941_v29 = vpop.eup %4488  ;;  %4506 = vpow2.f32 %v2333_v16  ;;  %v5960_v6 = vadd.f32 %v2461_v28, %v1296_v46  ;;  %v5962_v54 = vadd.f32 %v2460_v37, %v1295_v58  ;;  %v1300_v16 = vmul.f32 %v4744_v0, %v5781_v14 }
 0x306   : > { %6748 = vst [vmem:[#allocation64_spill] sm:$0xff] %v5941_v29  ;;  %v5944_v2 = vpop.eup %4490  ;;  %1486 = vadd.xlane.f32.xlu1 %v1294_v35  ;;  %3758 = vmatmul.mubr.f32.gmra.mrb[14].mxu1 %v1294_v35  ;;  %4508 = vpow2.f32 %v2335_v3  ;;  %v1299_v3 = vmul.f32 %v4745_v31, %v5789_v60  ;;  %v2462_v35 = vmul.f32 %v4743_v13, %v5941_v29 }
 0x307   : > { %4132 = vmatpush3.bf16.xpose.msra.mxu1 %v6749_v34  ;;  %6750 = vst [vmem:[#allocation37_spill] sm:$0xff] %v5944_v2  ;;  %4510 = vpow2.f32 %v2337_v11  ;;  %3792 = vmatprep.mubr.msk.f32.mxu1 %vm5001_vm0, %v6751_v23  ;;  %6757 = vst [vmem:[#allocation66_spill] sm:$0xff] %v5960_v6  ;;  %v2463_v11 = vmul.f32 %v4742_v45, %v5944_v2  ;;  %v6811_v2 = vld [vmem:[#allocation29_spill] sm:$0xff] }
 0x308   : > { %4133 = vmatprep.subr.bf16.mxu1 %v6738_v36  ;;  %v5951_v59 = vpop.eup %4492  ;;  %4512 = vpow2.f32 %v2341_v17  ;;  %6758 = vst [vmem:[#allocation67_spill] sm:$0xff] %v5962_v54  ;;  %v5984_v45 = vadd.f32 %v2462_v35, %v1297_v42 }
 0x309   : > { %6752 = vst [vmem:[#allocation65_spill] sm:$0xff] %v5951_v59  ;;  %v5955_v50 = vpop.eup %4494  ;;  %4514 = vpow2.f32 %v2339_v21  ;;  %v4746_v21 = vld [vmem:[#allocation2 + $0x38] sm:$0xff]  ;;  %v2464_v37 = vmul.f32 %v4745_v31, %v5951_v59  ;;  %v5982_v58 = vadd.f32 %v2463_v11, %v1298_v63  ;;  %v4748_v11 = vld [vmem:[#allocation2 + $0x48] sm:$0xff] }
 0x30a   : > { %6754 = vst [vmem:[#allocation59_spill] sm:$0xff] %v5955_v50  ;;  %v5958_v27 = vpop.eup %4496  ;;  %v2465_v17 = vmul.f32 %v4744_v0, %v5955_v50  ;;  %v1302_v43 = vmul.f32 %v4746_v21, %v5793_v49  ;;  %6765 = vst [vmem:[#allocation72_spill] sm:$0xff] %v5984_v45  ;;  %v4747_v50 = vld [vmem:[#allocation2 + $0x30] sm:$0xff]  ;;  %v1304_v42 = vmul.f32 %v4748_v11, %v5818_v22 }
 0x30b   : > { %6756 = vst [vmem:[#allocation60_spill] sm:$0xff] %v5958_v27  ;;  %v5966_v20 = vpop.eup %4498  ;;  %6764 = vst [vmem:[#allocation71_spill] sm:$0xff] %v5982_v58  ;;  %v5991_v6 = vadd.f32 %v2464_v37, %v1299_v3  ;;  %v1301_v29 = vmul.f32 %v4747_v50, %v5796_v9  ;;  %v2466_v63 = vmul.f32 %v4747_v50, %v5958_v27  ;;  %v6778_v27 = vld [vmem:[#allocation43_spill] sm:$0xff] }
 0x30c   : > { %6759 = vst [vmem:[#allocation68_spill] sm:$0xff] %v5966_v20  ;;  %v5969_v15 = vpop.eup %4500  ;;  %v5986_v13 = vadd.f32 %v2465_v17, %v1300_v16  ;;  %v2467_v0 = vmul.f32 %v4746_v21, %v5966_v20  ;;  %v4749_v17 = vld [vmem:[#allocation2 + $0x40] sm:$0xff] }
 0x30d   : > { %6760 = vst [vmem:[#allocation69_spill] sm:$0xff] %v5969_v15  ;;  %v5975_v28 = vpop.eup %4502  ;;  %6768 = vst [vmem:[#allocation75_spill] sm:$0xff] %v5991_v6  ;;  %v1303_v3 = vmul.f32 %v4749_v17, %v5838_v38  ;;  %v2468_v21 = vmul.f32 %v4749_v17, %v5969_v15  ;;  %v6007_v6 = vadd.f32 %v2466_v63, %v1301_v29  ;;  %v4752_v15 = vld [vmem:[#allocation2 + $0x68] sm:$0xff] }
 0x30e   : > { %6761 = vst [vmem:[#allocation70_spill] sm:$0xff] %v5975_v28  ;;  %v5979_v46 = vpop.eup %4504  ;;  %6766 = vst [vmem:[#allocation73_spill] sm:$0xff] %v5986_v13  ;;  %v5996_v59 = vadd.f32 %v2467_v0, %v1302_v43  ;;  %v2469_v35 = vmul.f32 %v4748_v11, %v5975_v28  ;;  %v4750_v43 = vld [vmem:[#allocation2 + $0x58] sm:$0xff]  ;;  %v1308_v29 = vmul.f32 %v4752_v15, %v5869_v30  ;;  %v4753_v28 = vld [vmem:[#allocation2 + $0x60] sm:$0xff] }
 0x30f   : > { %4135 = vmatpush3.bf16.xpose.msra.mxu1 %v6762_v18  ;;  %6763 = vst [vmem:[#allocation38_spill] sm:$0xff] %v5979_v46  ;;  %v5989_v54 = vpop.eup %4506  ;;  %6773 = vst [vmem:[#allocation80_spill] sm:$0xff] %v6007_v6  ;;  %v1306_v0 = vmul.f32 %v4750_v43, %v5843_v19  ;;  %v6016_v58 = vadd.f32 %v2468_v21, %v1303_v3  ;;  %v4755_v21 = vld [vmem:[#allocation2 + $0x70] sm:$0xff] }
 0x310   : > { %4136 = vmatprep.subr.bf16.mxu1 %v6738_v36  ;;  %6767 = vst [vmem:[#allocation74_spill] sm:$0xff] %v5989_v54  ;;  %v5994_v31 = vpop.eup %4508  ;;  %6770 = vst [vmem:[#allocation77_spill] sm:$0xff] %v5996_v59  ;;  %v2471_v50 = vmul.f32 %v4750_v43, %v5989_v54  ;;  %v4751_v59 = vld [vmem:[#allocation2 + $0x50] sm:$0xff]  ;;  %v6014_v11 = vadd.f32 %v2469_v35, %v1304_v42  ;;  %v1307_v43 = vmul.f32 %v4753_v28, %v5871_v61  ;;  %v4754_v35 = vld [vmem:[#allocation2 + $0x78] sm:$0xff] }
 0x311   : > { %6769 = vst [vmem:[#allocation76_spill] sm:$0xff] %v5994_v31  ;;  %v6000_v16 = vpop.eup %4510  ;;  %v1305_v13 = vmul.f32 %v4751_v59, %v5849_v41  ;;  %6776 = vst [vmem:[#allocation83_spill] sm:$0xff] %v6016_v58  ;;  %v2470_v17 = vmul.f32 %v4751_v59, %v5979_v46  ;;  %v2472_v54 = vmul.f32 %v4753_v28, %v5994_v31 }
 0x312   : > { %6771 = vst [vmem:[#allocation78_spill] sm:$0xff] %v6000_v16  ;;  %v6005_v37 = vpop.eup %4512  ;;  %6775 = vst [vmem:[#allocation82_spill] sm:$0xff] %v6014_v11  ;;  %v6020_v63 = vadd.f32 %v2471_v50, %v1306_v0  ;;  %v2473_v6 = vmul.f32 %v4752_v15, %v6000_v16  ;;  %v1310_v59 = vmul.f32 %v4754_v35, %v5910_v24 }
 0x313   : > { %6772 = vst [vmem:[#allocation79_spill] sm:$0xff] %v6005_v37  ;;  %v6012_v45 = vpop.eup %4514  ;;  %v6026_v42 = vadd.f32 %v2470_v17, %v1305_v13  ;;  %v2475_v3 = vmul.f32 %v4754_v35, %v6005_v37  ;;  %v1309_v0 = vmul.f32 %v4755_v21, %v5921_v39  ;;  %v6034_v50 = vadd.f32 %v2472_v54, %v1307_v43  ;;  %v6784_v17 = vld [vmem:[#allocation48_spill] sm:$0xff]  ;;  %v6045_v35 = vld [vmem:[%s344_s17] sm:$0x7]  ;;  %v6065_v54 = vpop.xlane.xlu1 %1582 }
 0x314   : > { %6774 = vst [vmem:[#allocation81_spill] sm:$0xff] %v6012_v45  ;;  %6777 = vst [vmem:[#allocation84_spill] sm:$0xff] %v6020_v63  ;;  %v6032_v15 = vadd.f32 %v2473_v6, %v1308_v29  ;;  %v2474_v28 = vmul.f32 %v4755_v21, %v6012_v45  ;;  %v6063_v6 = vpop.xlane.xlu0 %1580 }
 0x315   : > { %6779 = vst [vmem:[#allocation43_spill] sm:$0xff] %v6026_v42  ;;  %6781 = vst [vmem:[#allocation86_spill] sm:$0xff] %v6034_v50  ;;  %v6037_v63 = vadd.f32 %v2475_v3, %v1310_v59  ;;  %v1609_v42 = vrot.slane %v6045_v35, 1 }
 0x316   : > { %6780 = vst [vmem:[#allocation85_spill] sm:$0xff] %v6032_v15  ;;  %v6039_v13 = vadd.f32 %v2474_v28, %v1309_v0 }
 0x317   : > { %4138 = vmatpush3.bf16.xpose.msra.mxu1 %v6778_v27  ;;  %6782 = vst [vmem:[#allocation87_spill] sm:$0xff] %v6037_v63  ;;  %v6069_v43 = vpop.xlane.xlu1 %1586 }
 0x318   : > { %4139 = vmatprep.subr.bf16.mxu1 %v6738_v36  ;;  %6783 = vst [vmem:[#allocation88_spill] sm:$0xff] %v6039_v13  ;;  %v6067_v29 = vpop.xlane.xlu0 %1584 }
 0x31b   : > { %v6073_v59 = vpop.xlane.xlu1 %1590 }
 0x31f   : > { %4141 = vmatpush3.bf16.xpose.msra.mxu1 %v6784_v17  ;;  %v6077_v21 = vpop.xlane.xlu1 %1594 }
 0x320   : > { %4199 = vmatprep.subr.bf16.mxu1 %v5599_v44 }
 0x323   : > { %v6081_v28 = vpop.xlane.xlu1 %1598 }
 0x326   : > { %3793 = vmatmul.mubr.f32.vlgmr.msra.gmra.mrb[16].mxu1 %v1609_v42  ;;  %v6071_v42 = vpop.xlane.xlu0 %1588 }
 0x327   : > { %4201 = vmatpush3.bf16.msra.mxu1 %v5599_v44  ;;  %v6085_v63 = vpop.xlane.xlu1 %1602 }
 0x328   : > { %4203 = vmatprep.subr.bf16.mxu1 %v5619_v57 }
 0x32a   : > { %v6075_v3 = vpop.xlane.xlu0 %1592 }
 0x32b   : > { %4205 = vmatpush3.bf16.msra.mxu1 %v5619_v57  ;;  %v6089_v15 = vpop.xlane.xlu1 %1606 }
 0x32c   : > { %4207 = vmatprep.subr.bf16.mxu1 %v5641_v56  ;;  %6787 = vst [vmem:[#allocation90_spill] sm:$0xff] %v6089_v15 }
 0x32e   : > { %v6079_v0 = vpop.xlane.xlu0 %1596 }
 0x32f   : > { %4209 = vmatpush3.bf16.msra.mxu1 %v5641_v56 }
 0x330   : > { %4211 = vmatprep.subr.bf16.mxu1 %v6746_v7 }
 0x332   : > { %v6083_v13 = vpop.xlane.xlu0 %1600 }
 0x333   : > { %4213 = vmatpush3.bf16.msra.mxu1 %v6746_v7  ;;  %6785 = vst [vmem:[#allocation48_spill] sm:$0xff] %v6083_v13 }
 0x334   : > { %4215 = vmatprep.subr.bf16.mxu1 %v6749_v34 }
 0x336   : > { %v6087_v50 = vpop.xlane.xlu0 %1604 }
 0x337   : > { %4217 = vmatpush3.bf16.msra.mxu1 %v6749_v34  ;;  %6786 = vst [vmem:[#allocation89_spill] sm:$0xff] %v6087_v50 }
 0x338   : > { %4219 = vmatprep.subr.bf16.mxu1 %v6762_v18 }
 0x33b   : > { %4221 = vmatpush3.bf16.msra.mxu1 %v6762_v18 }
 0x33c   : > { %4223 = vmatprep.subr.bf16.mxu1 %v6778_v27 }
 0x33f   : > { %4225 = vmatpush3.bf16.msra.mxu1 %v6778_v27 }
 0x340   : > { %4227 = vmatprep.subr.bf16.mxu1 %v6784_v17 }
 0x343   : > { %4229 = vmatpush3.bf16.msra.mxu1 %v6784_v17 }
 0x372   : > { %v1457_v58 = vpop.xlane.xlu0 %1456 }
 0x373   : > { %v1459_v11 = vpop.xlane.xlu1 %1458  ;;  %v6092_v45 = vadd.f32 %v6753_v48, %v1457_v58 }
 0x374   : > { %v6095_v39 = vadd.f32 %v5763_v1, %v1459_v11 }
 0x375   : > { %6788 = vst [vmem:[#allocation91_spill] sm:$0xff] %v6092_v45 }
 0x376   : > { %6789 = vst [vmem:[#allocation92_spill] sm:$0xff] %v6095_v39  ;;  %v1461_v37 = vpop.xlane.xlu0 %1460 }
 0x377   : > { %v1463_v24 = vpop.xlane.xlu1 %1462  ;;  %v6098_v31 = vadd.f32 %v5776_v55, %v1461_v37 }
 0x378   : > { %v6101_v16 = vadd.f32 %v6755_v32, %v1463_v24 }
 0x379   : > { %6790 = vst [vmem:[#allocation93_spill] sm:$0xff] %v6098_v31 }
 0x37a   : > { %6791 = vst [vmem:[#allocation94_spill] sm:$0xff] %v6101_v16  ;;  %v1465_v46 = vpop.xlane.xlu0 %1464 }
 0x37b   : > { %v1467_v20 = vpop.xlane.xlu1 %1466  ;;  %v6104_v50 = vadd.f32 %v5789_v60, %v1465_v46 }
 0x37c   : > { %v6107_v15 = vadd.f32 %v5781_v14, %v1467_v20 }
 0x37d   : > { %6792 = vst [vmem:[#allocation95_spill] sm:$0xff] %v6104_v50 }
 0x37e   : > { %6793 = vst [vmem:[#allocation96_spill] sm:$0xff] %v6107_v15  ;;  %v1469_v48 = vpop.xlane.xlu0 %1468 }
 0x37f   : > { %v1471_v58 = vpop.xlane.xlu1 %1470  ;;  %v6110_v1 = vadd.f32 %v5796_v9, %v1469_v48 }
 0x380   : > { %v6113_v11 = vadd.f32 %v5793_v49, %v1471_v58 }
 0x381   : > { %6794 = vst [vmem:[#allocation97_spill] sm:$0xff] %v6110_v1 }
 0x382   : > { %6795 = vst [vmem:[#allocation98_spill] sm:$0xff] %v6113_v11  ;;  %v1473_v55 = vpop.xlane.xlu0 %1472 }
 0x383   : > { %v6116_v24 = vadd.f32 %v5838_v38, %v1473_v55  ;;  %v1475_v32 = vpop.xlane.xlu1 %1474  ;;  %v6802_v55 = vld [vmem:[#allocation19_spill] sm:$0xff] }
 0x384   : > { %v6119_v37 = vadd.f32 %v5818_v22, %v1475_v32 }
 0x385   : > { %6796 = vst [vmem:[#allocation99_spill] sm:$0xff] %v6116_v24  ;;  %v6803_v24 = vld [vmem:[#allocation20_spill] sm:$0xff] }
 0x386   : > { %6797 = vst [vmem:[#allocation100_spill] sm:$0xff] %v6119_v37  ;;  %v1477_v60 = vpop.xlane.xlu0 %1476 }
 0x387   : > { %v6122_v14 = vadd.f32 %v5849_v41, %v1477_v60  ;;  %v1479_v20 = vpop.xlane.xlu1 %1478  ;;  %v6804_v60 = vld [vmem:[#allocation21_spill] sm:$0xff] }
 0x388   : > { %v6125_v46 = vadd.f32 %v5843_v19, %v1479_v20  ;;  %v6805_v20 = vld [vmem:[#allocation23_spill] sm:$0xff] }
 0x389   : > { %6798 = vst [vmem:[#allocation101_spill] sm:$0xff] %v6122_v14 }
 0x38a   : > { %6799 = vst [vmem:[#allocation102_spill] sm:$0xff] %v6125_v46  ;;  %v1481_v9 = vpop.xlane.xlu0 %1480  ;;  %v6810_v46 = vld [vmem:[#allocation26_spill] sm:$0xff] }
 0x38b   : > { %v6128_v49 = vadd.f32 %v5871_v61, %v1481_v9  ;;  %v6806_v61 = vld [vmem:[#allocation22_spill] sm:$0xff] }
 0x38c   : > { %v1483_v48 = vpop.xlane.xlu1 %1482 }
 0x38d   : > { %6800 = vst [vmem:[#allocation103_spill] sm:$0xff] %v6128_v49  ;;  %v6131_v38 = vadd.f32 %v5869_v30, %v1483_v48  ;;  %v6807_v49 = vld [vmem:[#allocation25_spill] sm:$0xff]  ;;  %v6808_v48 = vld [vmem:[#allocation24_spill] sm:$0xff] }
 0x38f   : > { %6801 = vst [vmem:[#allocation104_spill] sm:$0xff] %v6131_v38  ;;  %v6809_v38 = vld [vmem:[#allocation27_spill] sm:$0xff] }
 0x3f9   : > { %v1677_v58 = vpop.f32.mrb[16].mxu1 }
 0x3fa   : > { %v6134_v22 = vrot.slane %v1677_v58, %v6802_v55  ;;  %v3794_v32 = vpop.f32.mrb[17].mxu1 }
 0x3fc   : > { %v1783_v41 = vadd.f32 %v6134_v22, %v6803_v24  ;;  %v1782_v19 = vadd.f32 %v6134_v22, %v6804_v60  ;;  %v1784_v14 = vadd.f32 %v6134_v22, %v6805_v20  ;;  %v1785_v9 = vadd.f32 %v6134_v22, %v6806_v61 }
 0x3fd   : > { %v1786_v30 = vadd.f32 %v6134_v22, %v6807_v49  ;;  %v1787_v58 = vadd.f32 %v6134_v22, %v6808_v48  ;;  %v1788_v32 = vadd.f32 %v6134_v22, %v6809_v38  ;;  %v1789_v37 = vadd.f32 %v6134_v22, %v6810_v46 }
 0x3fe   : > { %v1799_v1 = vmul.f32 0.2, %v1783_v41  ;;  %v1798_v11 = vmul.f32 0.2, %v1782_v19  ;;  %v1800_v50 = vmul.f32 0.2, %v1784_v14  ;;  %v1790_v45 = vadd.f32 %v6134_v22, %v6811_v2 }
 0x3ff   : > { %v1801_v15 = vmul.f32 0.2, %v1785_v9  ;;  %v1802_v31 = vmul.f32 0.2, %v1786_v30  ;;  %v1803_v16 = vmul.f32 0.2, %v1787_v58  ;;  %v1791_v25 = vadd.f32 %v6134_v22, %v6812_v12 }
 0x400   : > { %v1815_v39 = vmax.f32 %v1783_v41, %v1799_v1  ;;  %v1814_v51 = vmax.f32 %v1782_v19, %v1798_v11  ;;  %v1816_v47 = vmax.f32 %v1784_v14, %v1800_v50  ;;  %v1804_v33 = vmul.f32 0.2, %v1788_v32  ;;  %v6813_v11 = vld [vmem:[#allocation31_spill] sm:$0xff]  ;;  %v6814_v14 = vld [vmem:[#allocation30_spill] sm:$0xff] }
 0x401   : > { %v1817_v5 = vmax.f32 %v1785_v9, %v1801_v15  ;;  %v1818_v10 = vmax.f32 %v1786_v30, %v1802_v31  ;;  %v1805_v26 = vmul.f32 0.2, %v1789_v37  ;;  %v1819_v8 = vmax.f32 %v1787_v58, %v1803_v16 }
 0x402   : > { %v1832_v52 = vmul.f32 1.442695, %v1815_v39  ;;  %v1830_v53 = vmul.f32 1.442695, %v1814_v51  ;;  %v1834_v62 = vmul.f32 1.442695, %v1816_v47  ;;  %v1820_v40 = vmax.f32 %v1788_v32, %v1804_v33 }
 0x403   : > { %v1836_v4 = vmul.f32 1.442695, %v1817_v5  ;;  %v1806_v55 = vmul.f32 0.2, %v1790_v45  ;;  %v1838_v13 = vmul.f32 1.442695, %v1818_v10  ;;  %v1821_v1 = vmax.f32 %v1789_v37, %v1805_v26 }
 0x404   : > { %4516 = vpow2.f32 %v1832_v52  ;;  %v1792_v50 = vadd.f32 %v6134_v22, %v6813_v11  ;;  %v1840_v31 = vmul.f32 1.442695, %v1819_v8  ;;  %v1807_v15 = vmul.f32 0.2, %v1791_v25  ;;  %v6815_v33 = vld [vmem:[#allocation34_spill] sm:$0xff]  ;;  %v6816_v47 = vld [vmem:[#allocation33_spill] sm:$0xff] }
 0x405   : > { %4518 = vpow2.f32 %v1830_v53  ;;  %v1793_v41 = vadd.f32 %v6134_v22, %v6814_v14  ;;  %v1842_v39 = vmul.f32 1.442695, %v1820_v40  ;;  %v1822_v51 = vmax.f32 %v1790_v45, %v1806_v55  ;;  %v1763_v8 = vld [vmem:[#allocation9 + $0x88] sm:$0xff]  ;;  %v1762_v37 = vld [vmem:[#allocation9 + $0x80] sm:$0xff]  ;;  %v6817_v40 = vld [vmem:[#allocation36_spill] sm:$0xff] }
 0x406   : > { %4520 = vpow2.f32 %v1834_v62  ;;  %v1844_v5 = vmul.f32 1.442695, %v1821_v1  ;;  %v1808_v52 = vmul.f32 0.2, %v1792_v50  ;;  %v1794_v53 = vadd.f32 %v6134_v22, %v6815_v33  ;;  %v1764_v32 = vld [vmem:[#allocation9 + $0x90] sm:$0xff]  ;;  %v6818_v33 = vld [vmem:[#allocation35_spill] sm:$0xff] }
 0x407   : > { %4522 = vpow2.f32 %v1836_v4  ;;  %v1823_v10 = vmax.f32 %v1791_v25, %v1807_v15  ;;  %v1809_v26 = vmul.f32 0.2, %v1793_v41  ;;  %v1795_v62 = vadd.f32 %v6134_v22, %v6816_v47  ;;  %v1765_v15 = vld [vmem:[#allocation9 + $0x98] sm:$0xff] }
 0x408   : > { %4524 = vpow2.f32 %v1838_v13  ;;  %v1846_v16 = vmul.f32 1.442695, %v1822_v51  ;;  %v1824_v19 = vmax.f32 %v1792_v50, %v1808_v52  ;;  %v1810_v4 = vmul.f32 0.2, %v1794_v53 }
 0x409   : > { %4526 = vpow2.f32 %v1840_v31  ;;  %v1796_v45 = vadd.f32 %v6134_v22, %v6817_v40  ;;  %v1848_v55 = vmul.f32 1.442695, %v1823_v10  ;;  %v1825_v9 = vmax.f32 %v1793_v41, %v1809_v26 }
 0x40a   : > { %4528 = vpow2.f32 %v1842_v39  ;;  %v1811_v30 = vmul.f32 0.2, %v1795_v62  ;;  %v1797_v51 = vadd.f32 %v6134_v22, %v6818_v33  ;;  %v1850_v50 = vmul.f32 1.442695, %v1824_v19  ;;  %v1767_v22 = vld [vmem:[#allocation9 + $0xa8] sm:$0xff] }
 0x40b   : > { %4530 = vpow2.f32 %v1844_v5  ;;  %v1826_v52 = vmax.f32 %v1794_v53, %v1810_v4  ;;  %v1812_v40 = vmul.f32 0.2, %v1796_v45  ;;  %v1852_v41 = vmul.f32 1.442695, %v1825_v9  ;;  %v1768_v9 = vld [vmem:[#allocation9 + $0xb0] sm:$0xff] }
 0x40c   : > { %4532 = vpow2.f32 %v1846_v16  ;;  %v1827_v10 = vmax.f32 %v1795_v62, %v1811_v30 }
 0x40d   : > { %4534 = vpow2.f32 %v1848_v55  ;;  %v1854_v53 = vmul.f32 1.442695, %v1826_v52  ;;  %v1828_v16 = vmax.f32 %v1796_v45, %v1812_v40  ;;  %v1770_v45 = vld [vmem:[#allocation9 + $0xc0] sm:$0xff] }
 0x40e   : > { %v4517_v13 = vpop.eup %4516  ;;  %4536 = vpow2.f32 %v1850_v50  ;;  %v1856_v62 = vmul.f32 1.442695, %v1827_v10 }
 0x40f   : > { %v4519_v58 = vpop.eup %4518  ;;  %v1863_v25 = vmul.f32 %v4517_v13, %v1763_v8  ;;  %4538 = vpow2.f32 %v1852_v41  ;;  %v1772_v41 = vld [vmem:[#allocation9 + $0xd0] sm:$0xff] }
 0x410   : > { %v4521_v1 = vpop.eup %4520  ;;  %v1862_v31 = vmul.f32 %v4519_v58, %v1762_v37  ;;  %v1766_v37 = vld [vmem:[#allocation9 + $0xa0] sm:$0xff]  ;;  %v1813_v58 = vmul.f32 0.2, %v1797_v51  ;;  %4540 = vpow2.f32 %v1854_v53 }
 0x411   : > { %v4523_v39 = vpop.eup %4522  ;;  %2041 = vadd.xlane.f32.xlu1 %v1863_v25  ;;  %v1864_v5 = vmul.f32 %v4521_v1, %v1764_v32  ;;  %v1858_v32 = vmul.f32 1.442695, %v1828_v16  ;;  %4542 = vpow2.f32 %v1856_v62  ;;  %v1776_v62 = vld [vmem:[#allocation9 + $0xf0] sm:$0xff] }
 0x412   : > { %2039 = vadd.xlane.f32.xlu0 %v1862_v31  ;;  %3827 = vmatprep.mubr.f32.mxu0 %v1862_v31  ;;  %v4525_v26 = vpop.eup %4524  ;;  %v1865_v8 = vmul.f32 %v4523_v39, %v1765_v15  ;;  %v1771_v39 = vld [vmem:[#allocation9 + $0xc8] sm:$0xff] }
 0x413   : > { %3828 = vmatmul.mubr.f32.vlgmr.msra.gmra.mrb[2].mxu0 %v1863_v25  ;;  %v4527_v13 = vpop.eup %4526  ;;  %v1866_v19 = vmul.f32 %v4525_v26, %v1766_v37  ;;  %v1829_v25 = vmax.f32 %v1797_v51, %v1813_v58  ;;  %4544 = vpow2.f32 %v1858_v32  ;;  %v1773_v26 = vld [vmem:[#allocation9 + $0xd8] sm:$0xff]  ;;  %v1775_v58 = vld [vmem:[#allocation9 + $0xe8] sm:$0xff] }
 0x414   : > { %4176 = vmatpush3.bf16.xpose.msra.mxu0 %v5599_v44  ;;  %3830 = vmatprep.mubr.f32.mxu0 %v1864_v5  ;;  %v4529_v4 = vpop.eup %4528  ;;  %v1867_v55 = vmul.f32 %v4527_v13, %v1767_v22  ;;  %v1769_v44 = vld [vmem:[#allocation9 + $0xb8] sm:$0xff]  ;;  %v1774_v13 = vld [vmem:[#allocation9 + $0xe0] sm:$0xff] }
 0x415   : > { %2045 = vadd.xlane.f32.xlu1 %v1865_v8  ;;  %4177 = vmatprep.subr.bf16.mxu0 %v6738_v36  ;;  %v4531_v30 = vpop.eup %4530  ;;  %v1868_v1 = vmul.f32 %v4529_v4, %v1768_v9  ;;  %v1860_v50 = vmul.f32 1.442695, %v1829_v25  ;;  %v1777_v9 = vld [vmem:[#allocation9 + $0xf8] sm:$0xff] }
 0x416   : > { %2043 = vadd.xlane.f32.xlu0 %v1864_v5  ;;  %v4533_v31 = vpop.eup %4532  ;;  %v1869_v40 = vmul.f32 %v4531_v30, %v1769_v44  ;;  %v6819_v30 = vld [vmem:[#allocation57_spill] sm:$0xff] }
 0x417   : > { %3831 = vmatmul.mubr.f32.gmra.mrb[4].mxu0 %v1865_v8  ;;  %v4535_v15 = vpop.eup %4534  ;;  %v1870_v51 = vmul.f32 %v4533_v31, %v1770_v45  ;;  %4546 = vpow2.f32 %v1860_v50 }
 0x418   : > { %3833 = vmatprep.mubr.f32.mxu0 %v1866_v19  ;;  %v4537_v52 = vpop.eup %4536  ;;  %v1871_v5 = vmul.f32 %v4535_v15, %v1771_v39 }
 0x419   : > { %2049 = vadd.xlane.f32.xlu1 %v1867_v55  ;;  %v4539_v10 = vpop.eup %4538 }
 0x41a   : > { %2047 = vadd.xlane.f32.xlu0 %v1866_v19  ;;  %v4541_v8 = vpop.eup %4540  ;;  %v1873_v37 = vmul.f32 %v4539_v10, %v1773_v26 }
 0x41b   : > { %3834 = vmatmul.mubr.f32.gmra.mrb[6].mxu0 %v1867_v55  ;;  %v4543_v22 = vpop.eup %4542  ;;  %v1874_v53 = vmul.f32 %v4541_v8, %v1774_v13 }
 0x41c   : > { %4179 = vmatpush3.bf16.xpose.msra.mxu0 %v5619_v57  ;;  %3836 = vmatprep.mubr.f32.mxu0 %v1868_v1  ;;  %v1872_v57 = vmul.f32 %v4537_v52, %v1772_v41  ;;  %v1875_v19 = vmul.f32 %v4543_v22, %v1775_v58  ;;  %v1694_v22 = vadd.f32 %v6085_v63, %v6816_v47 }
 0x41d   : > { %2053 = vadd.xlane.f32.xlu1 %v1869_v40  ;;  %4180 = vmatprep.subr.bf16.mxu0 %v6738_v36  ;;  %v4545_v16 = vpop.eup %4544 }
 0x41e   : > { %2051 = vadd.xlane.f32.xlu0 %v1868_v1  ;;  %v6174_v55 = vmul.f32 %v4545_v16, %v1776_v62  ;;  %v6821_v62 = vld [vmem:[#allocation34_spill] sm:$0xff] }
 0x41f   : > { %3837 = vmatmul.mubr.f32.gmra.mrb[8].mxu0 %v1869_v40  ;;  %v6206_v40 = vpop.xlane.xlu0 %1484 }
 0x420   : > { %3839 = vmatprep.mubr.f32.mxu0 %v1870_v51 }
 0x421   : > { %2057 = vadd.xlane.f32.xlu1 %v1871_v5  ;;  %v4547_v4 = vpop.eup %4546 }
 0x422   : > { %2055 = vadd.xlane.f32.xlu0 %v1870_v51  ;;  %v1690_v51 = vadd.f32 %v6077_v21, %v6812_v12 }
 0x423   : > { %3840 = vmatmul.mubr.f32.gmra.mrb[10].mxu0 %v1871_v5  ;;  %v1689_v5 = vadd.f32 %v6075_v3, %v6811_v2  ;;  %v1691_v2 = vadd.f32 %v6079_v0, %v6813_v11  ;;  %v1710_v0 = vmul.f32 0.2, %v1694_v22 }
 0x424   : > { %4182 = vmatpush3.bf16.xpose.msra.mxu0 %v5641_v56  ;;  %3842 = vmatprep.mubr.f32.mxu0 %v1872_v57  ;;  %v6178_v56 = vmul.f32 %v4547_v4, %v1777_v9  ;;  %v1706_v26 = vmul.f32 0.2, %v1690_v51  ;;  %v6822_v4 = vld [vmem:[#allocation48_spill] sm:$0xff] }
 0x425   : > { %2061 = vadd.xlane.f32.xlu1 %v1873_v37  ;;  %4183 = vmatprep.subr.bf16.mxu0 %v6738_v36  ;;  %v1705_v21 = vmul.f32 0.2, %v1689_v5  ;;  %v1693_v9 = vadd.f32 %v6822_v4, %v6821_v62 }
 0x426   : > { %2059 = vadd.xlane.f32.xlu0 %v1872_v57  ;;  %v1722_v3 = vmax.f32 %v1690_v51, %v1706_v26  ;;  %v4757_v51 = vld [vmem:[#allocation2 + $0x88] sm:$0xff] }
 0x427   : > { %3843 = vmatmul.mubr.f32.gmra.mrb[12].mxu0 %v1873_v37 }
 0x428   : > { %3845 = vmatprep.mubr.f32.mxu0 %v1874_v53 }
 0x429   : > { %2065 = vadd.xlane.f32.xlu1 %v1875_v19 }
 0x42a   : > { %2063 = vadd.xlane.f32.xlu0 %v1874_v53 }
 0x42b   : > { %3846 = vmatmul.mubr.f32.gmra.mrb[14].mxu0 %v1875_v19  ;;  %v1707_v19 = vmul.f32 0.2, %v1691_v2 }
 0x42c   : > { %4185 = vmatpush3.bf16.xpose.msra.mxu0 %v6746_v7  ;;  %3848 = vmatprep.mubr.f32.mxu0 %v6174_v55  ;;  %v2191_v7 = vrot.slane %v6045_v35, 2  ;;  %v1686_v35 = vadd.f32 %v6069_v43, %v6808_v48  ;;  %v1687_v43 = vadd.f32 %v6071_v42, %v6809_v38  ;;  %v1692_v42 = vadd.f32 %v6081_v28, %v6814_v14 }
 0x42d   : > { %4186 = vmatprep.subr.bf16.mxu0 %v6738_v36  ;;  %v1721_v28 = vmax.f32 %v1689_v5, %v1705_v21 }
 0x42e   : > { %v1702_v15 = vmul.f32 0.2, %v1686_v35  ;;  %v1703_v10 = vmul.f32 0.2, %v1687_v43  ;;  %v1708_v13 = vmul.f32 0.2, %v1692_v42 }
 0x42f   : > { %3849 = vmatmul.mubr.f32.gmra.mrb[16].mxu0 %v6178_v56  ;;  %v1745_v47 = vmul.f32 1.442695, %v1721_v28  ;;  %v4760_v28 = vld [vmem:[#allocation2 + $0x90] sm:$0xff] }
 0x430   : > { %3883 = vmatprep.mubr.msk.f32.mxu0 %vm5001_vm0, %v6751_v23  ;;  %v1682_v23 = vadd.f32 %v6819_v30, %v6803_v24  ;;  %v1719_v37 = vmax.f32 %v1687_v43, %v1703_v10  ;;  %v1747_v30 = vmul.f32 1.442695, %v1722_v3 }
 0x432   : > { %v1698_v25 = vmul.f32 0.2, %v1682_v23  ;;  %v1741_v16 = vmul.f32 1.442695, %v1719_v37 }
 0x434   : > { %4188 = vmatpush3.bf16.xpose.msra.mxu0 %v6749_v34  ;;  %v6820_v34 = vld [vmem:[#allocation58_spill] sm:$0xff] }
 0x435   : > { %4189 = vmatprep.subr.bf16.mxu0 %v6738_v36  ;;  %v1681_v44 = vadd.f32 %v6820_v34, %v6804_v60  ;;  %v1685_v60 = vadd.f32 %v6067_v29, %v6807_v49  ;;  %v1718_v49 = vmax.f32 %v1686_v35, %v1702_v15 }
 0x437   : > { %v1697_v32 = vmul.f32 0.2, %v1681_v44  ;;  %v1701_v50 = vmul.f32 0.2, %v1685_v60  ;;  %v1739_v57 = vmul.f32 1.442695, %v1718_v49 }
 0x439   : > { %v1713_v31 = vmax.f32 %v1681_v44, %v1697_v32 }
 0x43c   : > { %4191 = vmatpush3.bf16.xpose.msra.mxu0 %v6762_v18  ;;  %v1684_v18 = vadd.f32 %v6065_v54, %v6806_v61 }
 0x43d   : > { %4192 = vmatprep.subr.bf16.mxu0 %v6738_v36 }
 0x43e   : > { %v1700_v1 = vmul.f32 0.2, %v1684_v18 }
 0x440   : > { %v1716_v61 = vmax.f32 %v1684_v18, %v1700_v1  ;;  %v1709_v18 = vmul.f32 0.2, %v1693_v9 }
 0x442   : > { %v1735_v29 = vmul.f32 1.442695, %v1716_v61 }
 0x444   : > { %4194 = vmatpush3.bf16.xpose.msra.mxu0 %v6778_v27  ;;  %v1683_v27 = vadd.f32 %v6063_v6, %v6805_v20  ;;  %v1688_v6 = vadd.f32 %v6073_v59, %v6810_v46  ;;  %v1729_v20 = vmul.f32 1.442695, %v1713_v31  ;;  %v1717_v46 = vmax.f32 %v1685_v60, %v1701_v50 }
 0x445   : > { %4195 = vmatprep.subr.bf16.mxu0 %v6738_v36  ;;  %v6200_v36 = vpop.xlane.xlu1 %1486 }
 0x446   : > { %v1699_v24 = vmul.f32 0.2, %v1683_v27  ;;  %v1704_v52 = vmul.f32 0.2, %v1688_v6  ;;  %v1737_v8 = vmul.f32 1.442695, %v1717_v46 }
 0x448   : > { %v1715_v39 = vmax.f32 %v1683_v27, %v1699_v24  ;;  %v1720_v12 = vmax.f32 %v1688_v6, %v1704_v52 }
 0x44a   : > { %v1733_v59 = vmul.f32 1.442695, %v1715_v39  ;;  %v1743_v53 = vmul.f32 1.442695, %v1720_v12 }
 0x44c   : > { %4197 = vmatpush3.bf16.xpose.msra.mxu0 %v6784_v17  ;;  %v1714_v17 = vmax.f32 %v1682_v23, %v1698_v25  ;;  %v1724_v23 = vmax.f32 %v1692_v42, %v1708_v13  ;;  %v1723_v25 = vmax.f32 %v1691_v2, %v1707_v19  ;;  %v4759_v2 = vld [vmem:[#allocation2 + $0x98] sm:$0xff] }
 0x44e   : > { %v1731_v54 = vmul.f32 1.442695, %v1714_v17  ;;  %v1751_v27 = vmul.f32 1.442695, %v1724_v23  ;;  %v1726_v17 = vmax.f32 %v1694_v22, %v1710_v0  ;;  %v1749_v60 = vmul.f32 1.442695, %v1723_v25 }
 0x450   : > { %4548 = vpow2.f32 %v1731_v54  ;;  %v1755_v61 = vmul.f32 1.442695, %v1726_v17 }
 0x451   : > { %4550 = vpow2.f32 %v1729_v20 }
 0x452   : > { %4552 = vpow2.f32 %v1735_v29 }
 0x453   : > { %3884 = vmatmul.mubr.f32.vlgmr.msra.gmra.mrb[18].mxu0 %v2191_v7  ;;  %4554 = vpow2.f32 %v1733_v59 }
 0x454   : > { %4556 = vpow2.f32 %v1739_v57 }
 0x455   : > { %4558 = vpow2.f32 %v1737_v8 }
 0x456   : > { %4560 = vpow2.f32 %v1743_v53 }
 0x457   : > { %4562 = vpow2.f32 %v1741_v16 }
 0x458   : > { %4564 = vpow2.f32 %v1747_v30 }
 0x45a   : > { %v4549_v14 = vpop.eup %4548 }
 0x45b   : > { %v4551_v11 = vpop.eup %4550  ;;  %v1879_v29 = vmul.f32 %v4757_v51, %v4549_v14 }
 0x45c   : > { %v4553_v32 = vpop.eup %4552 }
 0x45d   : > { %v4555_v1 = vpop.eup %4554  ;;  %v1881_v3 = vmul.f32 %v4759_v2, %v4553_v32 }
 0x45e   : > { %v4557_v54 = vpop.eup %4556 }
 0x45f   : > { %v4559_v6 = vpop.eup %4558 }
 0x49e   : > { %v2042_v45 = vpop.xlane.xlu1 %2041 }
 0x49f   : > { %v2040_v48 = vpop.xlane.xlu0 %2039  ;;  %v2072_v34 = vadd.f32 %v4549_v14, %v2042_v45  ;;  %v1725_v45 = vmax.f32 %v1693_v9, %v1709_v18  ;;  %v1880_v14 = vmul.f32 %v4760_v28, %v4555_v1 }
 0x4a0   : > { %v2071_v44 = vadd.f32 %v4551_v11, %v2040_v48  ;;  %v6224_v48 = vpop.eup %4560 }
 0x4a1   : > { %4566 = vrcp.f32 %v2072_v34  ;;  %v1753_v50 = vmul.f32 1.442695, %v1725_v45  ;;  %v6226_v49 = vpop.eup %4562 }
 0x4a2   : > { %v2046_v41 = vpop.xlane.xlu1 %2045  ;;  %4568 = vrcp.f32 %v2071_v44  ;;  %v6229_v46 = vpop.eup %4564 }
 0x4a3   : > { %v2044_v38 = vpop.xlane.xlu0 %2043  ;;  %v2074_v35 = vadd.f32 %v4553_v32, %v2046_v41  ;;  %4570 = vpow2.f32 %v1745_v47  ;;  %v4758_v41 = vld [vmem:[#allocation2 + $0x80] sm:$0xff] }
 0x4a4   : > { %v2073_v24 = vadd.f32 %v4555_v1, %v2044_v38  ;;  %4572 = vpow2.f32 %v1751_v27  ;;  %v1878_v59 = vmul.f32 %v4758_v41, %v4551_v11  ;;  %v4762_v27 = vld [vmem:[#allocation2 + $0xa0] sm:$0xff] }
 0x4a5   : > { %4574 = vrcp.f32 %v2074_v35  ;;  %v1882_v17 = vmul.f32 %v4762_v27, %v4559_v6 }
 0x4a6   : > { %v2050_v58 = vpop.xlane.xlu1 %2049  ;;  %4576 = vrcp.f32 %v2073_v24 }
 0x4a7   : > { %v2048_v7 = vpop.xlane.xlu0 %2047  ;;  %v2076_v20 = vadd.f32 %v4557_v54, %v2050_v58  ;;  %4578 = vpow2.f32 %v1749_v60 }
 0x4a8   : > { %v2075_v39 = vadd.f32 %v4559_v6, %v2048_v7  ;;  %4580 = vpow2.f32 %v1755_v61  ;;  %v4763_v6 = vld [vmem:[#allocation2 + $0xb8] sm:$0xff] }
 0x4a9   : > { %4582 = vrcp.f32 %v2076_v20 }
 0x4aa   : > { %v2054_v63 = vpop.xlane.xlu1 %2053  ;;  %4584 = vrcp.f32 %v2075_v39 }
 0x4ab   : > { %v2052_v31 = vpop.xlane.xlu0 %2051  ;;  %v2078_v52 = vadd.f32 %v6224_v48, %v2054_v63  ;;  %v4567_v57 = vpop.eup %4566  ;;  %4586 = vpow2.f32 %v1753_v50  ;;  %v4761_v63 = vld [vmem:[#allocation2 + $0xa8] sm:$0xff] }
 0x4ac   : > { %v2077_v10 = vadd.f32 %v6226_v49, %v2052_v31  ;;  %v4569_v8 = vpop.eup %4568  ;;  %v1883_v47 = vmul.f32 %v4761_v63, %v4557_v54 }
 0x4ad   : > { %v6235_v13 = vpop.eup %4570  ;;  %4588 = vrcp.f32 %v2078_v52 }
 0x4ae   : > { %v2058_v15 = vpop.xlane.xlu1 %2057  ;;  %v6239_v16 = vpop.eup %4572  ;;  %4590 = vrcp.f32 %v2077_v10 }
 0x4af   : > { %v2056_v43 = vpop.xlane.xlu0 %2055  ;;  %v2080_v12 = vadd.f32 %v6229_v46, %v2058_v15  ;;  %v4575_v7 = vpop.eup %4574 }
 0x4b0   : > { %v2079_v19 = vadd.f32 %v6235_v13, %v2056_v43  ;;  %v4577_v11 = vpop.eup %4576  ;;  %v1885_v43 = vmul.f32 %v4763_v6, %v6224_v48 }
 0x4b1   : > { %4592 = vrcp.f32 %v2080_v12  ;;  %v4579_v25 = vpop.eup %4578 }
 0x4b2   : > { %v2062_v26 = vpop.xlane.xlu1 %2061  ;;  %v6249_v1 = vpop.eup %4580 }
 0x4b3   : > { %v2060_v22 = vpop.xlane.xlu0 %2059  ;;  %v2082_v30 = vadd.f32 %v6239_v16, %v2062_v26  ;;  %v4583_v45 = vpop.eup %4582 }
 0x4b4   : > { %v2081_v35 = vadd.f32 %v4579_v25, %v2060_v22  ;;  %v4585_v39 = vpop.eup %4584 }
 0x4b5   : > { %v4587_v51 = vpop.eup %4586 }
 0x4b6   : > { %v2066_v34 = vpop.xlane.xlu1 %2065 }
 0x4b7   : > { %v2084_v61 = vadd.f32 %v6249_v1, %v2066_v34  ;;  %v2064_v54 = vpop.xlane.xlu0 %2063 }
 0x4e6   : > { %v3829_v5 = vpop.f32.mrb[2].mxu0 }
 0x4e7   : > { %v1966_v42 = vadd.f32 %v3829_v5, %v1879_v29  ;;  %v1960_v38 = vpop.f32.mrb[3].mxu0  ;;  %v4764_v5 = vld [vmem:[#allocation2 + $0xb0] sm:$0xff] }
 0x4e8   : > { %v1961_v21 = vadd.f32 %v1960_v38, %v1878_v59  ;;  %v1884_v41 = vmul.f32 %v4764_v5, %v6226_v49  ;;  %v2083_v59 = vadd.f32 %v4587_v51, %v2064_v54  ;;  %v4589_v38 = vpop.eup %4588 }
 0x4e9   : > { %v6233_v37 = vmul.f32 %v4567_v57, %v1966_v42  ;;  %v4591_v48 = vpop.eup %4590 }
 0x4ea   : > { %v6237_v58 = vmul.f32 %v4569_v8, %v1961_v21  ;;  %v3832_v53 = vpop.f32.mrb[4].mxu0  ;;  %v4765_v8 = vld [vmem:[#allocation2 + $0xc8] sm:$0xff] }
 0x4eb   : > { %v2879_v62 = vmul.f32 1.442695, %v6233_v37  ;;  %v1976_v4 = vadd.f32 %v3832_v53, %v1881_v3  ;;  %v1970_v9 = vpop.f32.mrb[5].mxu0  ;;  %v1887_v2 = vmul.f32 %v4765_v8, %v6229_v46  ;;  %v4593_v3 = vpop.eup %4592  ;;  %v4766_v53 = vld [vmem:[#allocation2 + $0xc0] sm:$0xff]  ;;  %vm2862_vm1 = vcmp.gt.f32.partialorder %v6233_v37, 0.0 }
 0x4ec   : > { %v2877_v23 = vmul.f32 1.442695, %v6237_v58  ;;  %v1971_v0 = vadd.f32 %v1970_v9, %v1880_v14  ;;  %v1886_v28 = vmul.f32 %v4766_v53, %v6235_v13  ;;  %v4767_v9 = vld [vmem:[#allocation2 + $0xd0] sm:$0xff]  ;;  %vm2861_vm2 = vcmp.gt.f32.partialorder %v6237_v58, 0.0 }
 0x4ed   : > { %4594 = vpow2.f32 %v2879_v62  ;;  %v6245_v44 = vmul.f32 %v4575_v7, %v1976_v4  ;;  %v1888_v7 = vmul.f32 %v4767_v9, %v4579_v25 }
 0x4ee   : > { %4596 = vpow2.f32 %v2877_v23  ;;  %v6247_v18 = vmul.f32 %v4577_v11, %v1971_v0  ;;  %v3835_v32 = vpop.f32.mrb[6].mxu0  ;;  %v4768_v11 = vld [vmem:[#allocation2 + $0xd8] sm:$0xff] }
 0x4ef   : > { %4598 = vrcp.f32 %v2079_v19  ;;  %v2883_v31 = vmul.f32 1.442695, %v6245_v44  ;;  %v1986_v24 = vadd.f32 %v3835_v32, %v1883_v47  ;;  %v1980_v60 = vpop.f32.mrb[7].mxu0  ;;  %v1889_v34 = vmul.f32 %v4768_v11, %v6239_v16 }
 0x4f0   : > { %4600 = vrcp.f32 %v2082_v30  ;;  %v2881_v15 = vmul.f32 1.442695, %v6247_v18  ;;  %v1981_v20 = vadd.f32 %v1980_v60, %v1882_v17  ;;  %vm2864_vm3 = vcmp.gt.f32.partialorder %v6245_v44, 0.0 }
 0x4f1   : > { %4602 = vpow2.f32 %v2883_v31  ;;  %v6254_v50 = vmul.f32 %v4583_v45, %v1986_v24  ;;  %v4769_v45 = vld [vmem:[#allocation2 + $0xe0] sm:$0xff]  ;;  %vm2863_vm4 = vcmp.gt.f32.partialorder %v6247_v18, 0.0 }
 0x4f2   : > { %4604 = vpow2.f32 %v2881_v15  ;;  %v6257_v29 = vmul.f32 %v4585_v39, %v1981_v20  ;;  %v3838_v52 = vpop.f32.mrb[8].mxu0  ;;  %v4770_v39 = vld [vmem:[#allocation2 + $0xe8] sm:$0xff] }
 0x4f3   : > { %4606 = vrcp.f32 %v2081_v35  ;;  %v2887_v10 = vmul.f32 1.442695, %v6254_v50  ;;  %v1996_v26 = vadd.f32 %v3838_v52, %v1885_v43  ;;  %v1990_v42 = vpop.f32.mrb[9].mxu0  ;;  %v1891_v6 = vmul.f32 %v4770_v39, %v6249_v1 }
 0x4f4   : > { %4608 = vrcp.f32 %v2084_v61  ;;  %v2885_v57 = vmul.f32 1.442695, %v6257_v29  ;;  %v1991_v12 = vadd.f32 %v1990_v42, %v1884_v41  ;;  %v1890_v61 = vmul.f32 %v4769_v45, %v4587_v51  ;;  %v6823_v45 = vld [vmem:[#allocation19_spill] sm:$0xff] }
 0x4f5   : > { %4610 = vpow2.f32 %v2887_v10  ;;  %v6262_v21 = vmul.f32 %v4589_v38, %v1996_v26  ;;  %vm2866_vm5 = vcmp.gt.f32.partialorder %v6254_v50, 0.0  ;;  %vm2865_vm6 = vcmp.gt.f32.partialorder %v6257_v29, 0.0 }
 0x4f6   : > { %4612 = vpow2.f32 %v2885_v57  ;;  %v6265_v49 = vmul.f32 %v4591_v48, %v1991_v12  ;;  %v3841_v22 = vpop.f32.mrb[10].mxu0 }
 0x4f7   : > { %v4595_v14 = vpop.eup %4594  ;;  %4614 = vrcp.f32 %v2083_v59  ;;  %v2891_v19 = vmul.f32 1.442695, %v6262_v21  ;;  %v2006_v62 = vadd.f32 %v3841_v22, %v1887_v2  ;;  %v2000_v4 = vpop.f32.mrb[11].mxu0  ;;  %vm2868_vm7 = vcmp.gt.f32.partialorder %v6262_v21, 0.0 }
 0x4f8   : > { %v4597_v30 = vpop.eup %4596  ;;  %v3293_v23 = vadd.f32 -1.0, %v4595_v14  ;;  %v2889_v46 = vmul.f32 1.442695, %v6265_v49  ;;  %v2001_v0 = vadd.f32 %v2000_v4, %v1886_v28  ;;  %vm2867_vm8 = vcmp.gt.f32.partialorder %v6265_v49, 0.0 }
 0x4f9   : > { %v4599_v63 = vpop.eup %4598  ;;  %v3292_v13 = vadd.f32 -1.0, %v4597_v30  ;;  %4616 = vpow2.f32 %v2891_v19  ;;  %v6272_v47 = vmul.f32 %v4593_v3, %v2006_v62 }
 0x4fa   : > { %v4601_v32 = vpop.eup %4600  ;;  %v2926_v27 = vsel %vm2862_vm1, %v6233_v37, %v3293_v23  ;;  %4618 = vpow2.f32 %v2889_v46  ;;  %v6276_v25 = vmul.f32 %v4599_v63, %v2001_v0  ;;  %v3844_v17 = vpop.f32.mrb[12].mxu0 }
 0x4fb   : > { %v4603_v35 = vpop.eup %4602  ;;  %2942 = vst [vmem:[#allocation3 + $0x88] sm:$0xff] %v2926_v27  ;;  %v2925_v16 = vsel %vm2861_vm2, %v6237_v58, %v3292_v13  ;;  %v2895_v31 = vmul.f32 1.442695, %v6272_v47  ;;  %v2016_v24 = vadd.f32 %v3844_v17, %v1889_v34  ;;  %v2010_v60 = vpop.f32.mrb[13].mxu0  ;;  %vm2870_vm9 = vcmp.gt.f32.partialorder %v6272_v47, 0.0 }
 0x4fc   : > { %v4605_v54 = vpop.eup %4604  ;;  %2941 = vst [vmem:[#allocation3 + $0x80] sm:$0xff] %v2925_v16  ;;  %v3295_v15 = vadd.f32 -1.0, %v4603_v35  ;;  %v2893_v37 = vmul.f32 1.442695, %v6276_v25  ;;  %v2011_v20 = vadd.f32 %v2010_v60, %v1888_v7  ;;  %vm2869_vm10 = vcmp.gt.f32.partialorder %v6276_v25, 0.0 }
 0x4fd   : > { %v4607_v43 = vpop.eup %4606  ;;  %v3294_v52 = vadd.f32 -1.0, %v4605_v54  ;;  %4620 = vpow2.f32 %v2895_v31  ;;  %v2852_v58 = vmul.f32 %v4601_v32, %v2016_v24 }
 0x4fe   : > { %v4609_v5 = vpop.eup %4608  ;;  %v2928_v41 = vsel %vm2864_vm3, %v6245_v44, %v3295_v15  ;;  %4622 = vpow2.f32 %v2893_v37  ;;  %v2850_v51 = vmul.f32 %v4607_v43, %v2011_v20  ;;  %v3847_v59 = vpop.f32.mrb[14].mxu0  ;;  %v6824_v15 = vld [vmem:[#allocation39_spill] sm:$0xff]  ;;  %v6825_v20 = vld [vmem:[#allocation40_spill] sm:$0xff] }
 0x4ff   : > { %v4611_v10 = vpop.eup %4610  ;;  %2944 = vst [vmem:[#allocation3 + $0x98] sm:$0xff] %v2928_v41  ;;  %v2927_v26 = vsel %vm2863_vm4, %v6247_v18, %v3294_v52  ;;  %v2899_v42 = vmul.f32 1.442695, %v2852_v58  ;;  %v2026_v1 = vadd.f32 %v3847_v59, %v1891_v6  ;;  %v2020_v38 = vpop.f32.mrb[15].mxu0  ;;  %vm2872_vm11 = vcmp.gt.f32.partialorder %v2852_v58, 0.0  ;;  %v6826_v6 = vld [vmem:[#allocation42_spill] sm:$0xff] }
 0x500   : > { %v4613_v57 = vpop.eup %4612  ;;  %2943 = vst [vmem:[#allocation3 + $0x90] sm:$0xff] %v2927_v26  ;;  %v3297_v12 = vadd.f32 -1.0, %v4611_v10  ;;  %v2897_v48 = vmul.f32 1.442695, %v2850_v51  ;;  %v2021_v8 = vadd.f32 %v2020_v38, %v1890_v61  ;;  %vm2871_vm12 = vcmp.gt.f32.partialorder %v2850_v51, 0.0  ;;  %v6827_v52 = vld [vmem:[#allocation41_spill] sm:$0xff] }
 0x501   : > { %v4615_v2 = vpop.eup %4614  ;;  %v3296_v44 = vadd.f32 -1.0, %v4613_v57  ;;  %4624 = vpow2.f32 %v2899_v42  ;;  %v2856_v3 = vmul.f32 %v4609_v5, %v2026_v1  ;;  %v6828_v5 = vld [vmem:[#allocation45_spill] sm:$0xff]  ;;  %v6830_v10 = vld [vmem:[#allocation47_spill] sm:$0xff]  ;;  %v6831_v42 = vld [vmem:[#allocation46_spill] sm:$0xff] }
 0x502   : > { %v2930_v22 = vsel %vm2866_vm5, %v6254_v50, %v3297_v12  ;;  %4626 = vpow2.f32 %v2897_v48  ;;  %v2854_v18 = vmul.f32 %v4615_v2, %v2021_v8  ;;  %v6289_v53 = vpop.f32.mrb[16].mxu0 }
 0x503   : > { %v4617_v28 = vpop.eup %4616  ;;  %2946 = vst [vmem:[#allocation3 + $0xa8] sm:$0xff] %v2930_v22  ;;  %v2929_v14 = vsel %vm2865_vm6, %v6257_v29, %v3296_v44  ;;  %v2903_v19 = vmul.f32 1.442695, %v2856_v3  ;;  %v6292_v62 = vpop.f32.mrb[17].mxu0  ;;  %vm2874_vm13 = vcmp.gt.f32.partialorder %v2856_v3, 0.0  ;;  %v6832_v44 = vld [vmem:[#allocation50_spill] sm:$0xff] }
 0x504   : > { %v4619_v4 = vpop.eup %4618  ;;  %2945 = vst [vmem:[#allocation3 + $0xa0] sm:$0xff] %v2929_v14  ;;  %v3299_v9 = vadd.f32 -1.0, %v4617_v28  ;;  %v2901_v7 = vmul.f32 1.442695, %v2854_v18  ;;  %vm2873_vm14 = vcmp.gt.f32.partialorder %v2854_v18, 0.0 }
 0x505   : > { %v3298_v50 = vadd.f32 -1.0, %v4619_v4  ;;  %4628 = vpow2.f32 %v2903_v19 }
 0x506   : > { %v2932_v30 = vsel %vm2868_vm7, %v6262_v21, %v3299_v9  ;;  %4630 = vpow2.f32 %v2901_v7  ;;  %v6833_v7 = vld [vmem:[#allocation49_spill] sm:$0xff] }
 0x507   : > { %v4621_v23 = vpop.eup %4620  ;;  %2948 = vst [vmem:[#allocation3 + $0xb8] sm:$0xff] %v2932_v30  ;;  %v2931_v29 = vsel %vm2867_vm8, %v6265_v49, %v3298_v50 }
 0x508   : > { %v4623_v46 = vpop.eup %4622  ;;  %2947 = vst [vmem:[#allocation3 + $0xb0] sm:$0xff] %v2931_v29  ;;  %v3301_v0 = vadd.f32 -1.0, %v4621_v23 }
 0x509   : > { %v3300_v11 = vadd.f32 -1.0, %v4623_v46 }
 0x50a   : > { %v2934_v34 = vsel %vm2870_vm9, %v6272_v47, %v3301_v0 }
 0x50b   : > { %v4625_v63 = vpop.eup %4624  ;;  %2950 = vst [vmem:[#allocation3 + $0xc8] sm:$0xff] %v2934_v34  ;;  %v2933_v21 = vsel %vm2869_vm10, %v6276_v25, %v3300_v11 }
 0x50c   : > { %v4627_v13 = vpop.eup %4626  ;;  %2949 = vst [vmem:[#allocation3 + $0xc0] sm:$0xff] %v2933_v21  ;;  %v3303_v32 = vadd.f32 -1.0, %v4625_v63  ;;  %v6834_v21 = vld [vmem:[#allocation52_spill] sm:$0xff] }
 0x50d   : > { %v3302_v27 = vadd.f32 -1.0, %v4627_v13 }
 0x50e   : > { %v2936_v49 = vsel %vm2872_vm11, %v2852_v58, %v3303_v32  ;;  %v6835_v32 = vld [vmem:[#allocation51_spill] sm:$0xff] }
 0x50f   : > { %v4629_v17 = vpop.eup %4628  ;;  %2952 = vst [vmem:[#allocation3 + $0xd8] sm:$0xff] %v2936_v49  ;;  %v2935_v35 = vsel %vm2871_vm12, %v2850_v51, %v3302_v27  ;;  %v6829_v51 = vld [vmem:[#allocation44_spill] sm:$0xff] }
 0x510   : > { %v4631_v16 = vpop.eup %4630  ;;  %2951 = vst [vmem:[#allocation3 + $0xd0] sm:$0xff] %v2935_v35  ;;  %v3305_v31 = vadd.f32 -1.0, %v4629_v17 }
 0x511   : > { %v3304_v47 = vadd.f32 -1.0, %v4631_v16 }
 0x512   : > { %v2938_v24 = vsel %vm2874_vm13, %v2856_v3, %v3305_v31  ;;  %v6836_v31 = vld [vmem:[#allocation54_spill] sm:$0xff] }
 0x513   : > { %2954 = vst [vmem:[#allocation3 + $0xe8] sm:$0xff] %v2938_v24  ;;  %v2937_v60 = vsel %vm2873_vm14, %v2854_v18, %v3304_v47 }
 0x514   : > { %2953 = vst [vmem:[#allocation3 + $0xe0] sm:$0xff] %v2937_v60 }
 0x526   : > { %v2259_v25 = vpop.f32.mrb[18].mxu0 }
 0x527   : > { %v6303_v61 = vrot.slane %v2259_v25, %v6823_v45  ;;  %v3885_v54 = vpop.f32.mrb[19].mxu0 }
 0x529   : > { %v2365_v37 = vadd.f32 %v6303_v61, %v6824_v15  ;;  %v2364_v39 = vadd.f32 %v6303_v61, %v6825_v20  ;;  %v2366_v43 = vadd.f32 %v6303_v61, %v6826_v6  ;;  %v2367_v58 = vadd.f32 %v6303_v61, %v6827_v52  ;;  %v6837_v15 = vld [vmem:[#allocation53_spill] sm:$0xff]  ;;  %v2345_v20 = vld [vmem:[#allocation9 + $0x108] sm:$0xff] }
 0x52a   : > { %v2368_v41 = vadd.f32 %v6303_v61, %v6828_v5  ;;  %v2369_v59 = vadd.f32 %v6303_v61, %v6829_v51  ;;  %v2370_v26 = vadd.f32 %v6303_v61, %v6830_v10  ;;  %v2371_v1 = vadd.f32 %v6303_v61, %v6831_v42  ;;  %v6838_v5 = vld [vmem:[#allocation56_spill] sm:$0xff] }
 0x52b   : > { %v2381_v38 = vmul.f32 0.2, %v2365_v37  ;;  %v2380_v57 = vmul.f32 0.2, %v2364_v39  ;;  %v2382_v12 = vmul.f32 0.2, %v2366_v43  ;;  %v2372_v3 = vadd.f32 %v6303_v61, %v6832_v44 }
 0x52c   : > { %v2383_v48 = vmul.f32 0.2, %v2367_v58  ;;  %v2384_v8 = vmul.f32 0.2, %v2368_v41  ;;  %v2385_v2 = vmul.f32 0.2, %v2369_v59  ;;  %v2373_v50 = vadd.f32 %v6303_v61, %v6833_v7 }
 0x52d   : > { %v2397_v22 = vmax.f32 %v2365_v37, %v2381_v38  ;;  %v2396_v18 = vmax.f32 %v2364_v39, %v2380_v57  ;;  %v2398_v28 = vmax.f32 %v2366_v43, %v2382_v12  ;;  %v2386_v14 = vmul.f32 0.2, %v2370_v26  ;;  %v2344_v43 = vld [vmem:[#allocation9 + $0x100] sm:$0xff]  ;;  %v2346_v57 = vld [vmem:[#allocation9 + $0x110] sm:$0xff] }
 0x52e   : > { %v2399_v19 = vmax.f32 %v2367_v58, %v2383_v48  ;;  %v2400_v4 = vmax.f32 %v2368_v41, %v2384_v8  ;;  %v2387_v9 = vmul.f32 0.2, %v2371_v1  ;;  %v2401_v46 = vmax.f32 %v2369_v59, %v2385_v2  ;;  %v2347_v8 = vld [vmem:[#allocation9 + $0x118] sm:$0xff] }
 0x52f   : > { %v2414_v30 = vmul.f32 1.442695, %v2397_v22  ;;  %v2412_v23 = vmul.f32 1.442695, %v2396_v18  ;;  %v2416_v29 = vmul.f32 1.442695, %v2398_v28  ;;  %v2402_v11 = vmax.f32 %v2370_v26, %v2386_v14 }
 0x530   : > { %v2418_v0 = vmul.f32 1.442695, %v2399_v19  ;;  %v2388_v34 = vmul.f32 0.2, %v2372_v3  ;;  %v2420_v63 = vmul.f32 1.442695, %v2400_v4  ;;  %v2374_v13 = vadd.f32 %v6303_v61, %v6834_v21 }
 0x531   : > { %4632 = vpow2.f32 %v2414_v30  ;;  %v2375_v27 = vadd.f32 %v6303_v61, %v6835_v32  ;;  %v2422_v49 = vmul.f32 1.442695, %v2401_v46  ;;  %v2403_v17 = vmax.f32 %v2371_v1, %v2387_v9  ;;  %v6839_v26 = vld [vmem:[#allocation55_spill] sm:$0xff]  ;;  %v2348_v9 = vld [vmem:[#allocation9 + $0x120] sm:$0xff] }
 0x532   : > { %4634 = vpow2.f32 %v2412_v23  ;;  %v2389_v35 = vmul.f32 0.2, %v2373_v50  ;;  %v2404_v16 = vmax.f32 %v2372_v3, %v2388_v34  ;;  %v2376_v47 = vadd.f32 %v6303_v61, %v6836_v31 }
 0x533   : > { %4636 = vpow2.f32 %v2416_v29  ;;  %v2424_v24 = vmul.f32 1.442695, %v2402_v11  ;;  %v2390_v60 = vmul.f32 0.2, %v2374_v13  ;;  %v2391_v25 = vmul.f32 0.2, %v2375_v27 }
 0x534   : > { %4638 = vpow2.f32 %v2418_v0  ;;  %v2426_v45 = vmul.f32 1.442695, %v2403_v17  ;;  %v2405_v54 = vmax.f32 %v2373_v50, %v2389_v35  ;;  %v2377_v37 = vadd.f32 %v6303_v61, %v6837_v15  ;;  %v2349_v50 = vld [vmem:[#allocation9 + $0x128] sm:$0xff]  ;;  %v2355_v15 = vld [vmem:[#allocation9 + $0x158] sm:$0xff] }
 0x535   : > { %4640 = vpow2.f32 %v2420_v63  ;;  %v2428_v39 = vmul.f32 1.442695, %v2404_v16  ;;  %v2392_v6 = vmul.f32 0.2, %v2376_v47  ;;  %v2406_v52 = vmax.f32 %v2374_v13, %v2390_v60  ;;  %v2350_v63 = vld [vmem:[#allocation9 + $0x130] sm:$0xff]  ;;  %v2351_v13 = vld [vmem:[#allocation9 + $0x138] sm:$0xff] }
 0x536   : > { %4642 = vpow2.f32 %v2422_v49  ;;  %v2407_v58 = vmax.f32 %v2375_v27, %v2391_v25  ;;  %v2378_v41 = vadd.f32 %v6303_v61, %v6838_v5  ;;  %v2430_v59 = vmul.f32 1.442695, %v2405_v54  ;;  %v2352_v16 = vld [vmem:[#allocation9 + $0x140] sm:$0xff] }
 0x537   : > { %4644 = vpow2.f32 %v2424_v24  ;;  %v2393_v10 = vmul.f32 0.2, %v2377_v37  ;;  %v2379_v42 = vadd.f32 %v6303_v61, %v6839_v26  ;;  %v2408_v2 = vmax.f32 %v2376_v47, %v2392_v6  ;;  %v2353_v47 = vld [vmem:[#allocation9 + $0x148] sm:$0xff]  ;;  %v2356_v6 = vld [vmem:[#allocation9 + $0x160] sm:$0xff] }
 0x538   : > { %4646 = vpow2.f32 %v2426_v45  ;;  %v2432_v3 = vmul.f32 1.442695, %v2406_v52  ;;  %v2434_v22 = vmul.f32 1.442695, %v2407_v58  ;;  %v2394_v18 = vmul.f32 0.2, %v2378_v41 }
 0x539   : > { %4648 = vpow2.f32 %v2428_v39  ;;  %v2409_v14 = vmax.f32 %v2377_v37, %v2393_v10  ;;  %v2395_v19 = vmul.f32 0.2, %v2379_v42  ;;  %v2436_v30 = vmul.f32 1.442695, %v2408_v2  ;;  %v2354_v45 = vld [vmem:[#allocation9 + $0x150] sm:$0xff]  ;;  %v2357_v52 = vld [vmem:[#allocation9 + $0x168] sm:$0xff] }
 0x53a   : > { %4650 = vpow2.f32 %v2430_v59  ;;  %v2410_v23 = vmax.f32 %v2378_v41, %v2394_v18  ;;  %v2359_v10 = vld [vmem:[#allocation9 + $0x178] sm:$0xff]  ;;  %v6842_v2 = vld [vmem:[#allocation92_spill] sm:$0xff] }
 0x53b   : > { %v4633_v51 = vpop.eup %4632  ;;  %4652 = vpow2.f32 %v2432_v3  ;;  %v2438_v46 = vmul.f32 1.442695, %v2409_v14  ;;  %v2411_v0 = vmax.f32 %v2379_v42, %v2395_v19  ;;  %v6843_v3 = vld [vmem:[#allocation91_spill] sm:$0xff] }
 0x53c   : > { %v4635_v1 = vpop.eup %4634  ;;  %v2445_v38 = vmul.f32 %v4633_v51, %v2345_v20  ;;  %4654 = vpow2.f32 %v2434_v22  ;;  %v2440_v32 = vmul.f32 1.442695, %v2410_v23  ;;  %v2358_v51 = vld [vmem:[#allocation9 + $0x170] sm:$0xff] }
 0x53d   : > { %v4637_v12 = vpop.eup %4636  ;;  %v2444_v48 = vmul.f32 %v4635_v1, %v2344_v43  ;;  %4656 = vpow2.f32 %v2436_v30  ;;  %v2442_v49 = vmul.f32 1.442695, %v2411_v0  ;;  %v6849_v30 = vld [vmem:[#allocation94_spill] sm:$0xff] }
 0x53e   : > { %v4639_v44 = vpop.eup %4638  ;;  %2623 = vadd.xlane.f32.xlu1 %v2445_v38  ;;  %v2446_v28 = vmul.f32 %v4637_v12, %v2346_v57  ;;  %4658 = vpow2.f32 %v2438_v46 }
 0x53f   : > { %2621 = vadd.xlane.f32.xlu0 %v2444_v48  ;;  %3918 = vmatprep.mubr.f32.mxu1 %v2444_v48  ;;  %v4641_v61 = vpop.eup %4640  ;;  %v2447_v4 = vmul.f32 %v4639_v44, %v2347_v8  ;;  %4660 = vpow2.f32 %v2440_v32  ;;  %v6841_v48 = vld [vmem:[#allocation32_spill] sm:$0xff] }
 0x540   : > { %3919 = vmatmul.mubr.f32.vlgmr.msra.gmra.mrb[0].mxu1 %v2445_v38  ;;  %v4643_v7 = vpop.eup %4642  ;;  %v2448_v29 = vmul.f32 %v4641_v61, %v2348_v9  ;;  %4662 = vpow2.f32 %v2442_v49  ;;  %v6840_v38 = vld [vmem:[#allocation63_spill] sm:$0xff]  ;;  %v6847_v9 = vld [vmem:[#allocation36_spill] sm:$0xff] }
 0x541   : > { %3921 = vmatprep.mubr.f32.mxu1 %v2446_v28  ;;  %v4645_v11 = vpop.eup %4644  ;;  %v2449_v34 = vmul.f32 %v4643_v7, %v2349_v50  ;;  %v6848_v7 = vld [vmem:[#allocation89_spill] sm:$0xff] }
 0x542   : > { %2627 = vadd.xlane.f32.xlu1 %v2447_v4  ;;  %v4647_v21 = vpop.eup %4646  ;;  %v2450_v27 = vmul.f32 %v4645_v11, %v2350_v63  ;;  %v1695_v50 = vadd.f32 %v6848_v7, %v6847_v9  ;;  %v6851_v11 = vld [vmem:[#allocation59_spill] sm:$0xff]  ;;  %v6869_v7 = vld [vmem:[#allocation104_spill] sm:$0xff] }
 0x543   : > { %2625 = vadd.xlane.f32.xlu0 %v2446_v28  ;;  %v4649_v17 = vpop.eup %4648  ;;  %v2451_v35 = vmul.f32 %v4647_v21, %v2351_v13  ;;  %v6844_v28 = vld [vmem:[#allocation37_spill] sm:$0xff] }
 0x544   : > { %3922 = vmatmul.mubr.f32.gmra.mrb[2].mxu1 %v2447_v4  ;;  %v4651_v31 = vpop.eup %4650  ;;  %v2452_v24 = vmul.f32 %v4649_v17, %v2352_v16  ;;  %v6852_v13 = vld [vmem:[#allocation65_spill] sm:$0xff]  ;;  %v6854_v17 = vld [vmem:[#allocation95_spill] sm:$0xff] }
 0x545   : > { %3924 = vmatprep.mubr.f32.mxu1 %v2448_v29  ;;  %v4653_v60 = vpop.eup %4652  ;;  %v2453_v25 = vmul.f32 %v4651_v31, %v2353_v47  ;;  %v6855_v31 = vld [vmem:[#allocation68_spill] sm:$0xff] }
 0x546   : > { %2631 = vadd.xlane.f32.xlu1 %v2449_v34  ;;  %v4655_v54 = vpop.eup %4654  ;;  %v2454_v37 = vmul.f32 %v4653_v60, %v2354_v45 }
 0x547   : > { %2629 = vadd.xlane.f32.xlu0 %v2448_v29  ;;  %v4657_v20 = vpop.eup %4656  ;;  %v2455_v39 = vmul.f32 %v4655_v54, %v2355_v15  ;;  %v6850_v29 = vld [vmem:[#allocation93_spill] sm:$0xff]  ;;  %v6857_v15 = vld [vmem:[#allocation98_spill] sm:$0xff] }
 0x548   : > { %3925 = vmatmul.mubr.f32.gmra.mrb[4].mxu1 %v2449_v34  ;;  %v4659_v43 = vpop.eup %4658  ;;  %v2456_v58 = vmul.f32 %v4657_v20, %v2356_v6  ;;  %v6858_v20 = vld [vmem:[#allocation97_spill] sm:$0xff] }
 0x549   : > { %3927 = vmatprep.mubr.f32.mxu1 %v2450_v27  ;;  %v4661_v5 = vpop.eup %4660  ;;  %v2457_v41 = vmul.f32 %v4659_v43, %v2357_v52  ;;  %v6859_v43 = vld [vmem:[#allocation70_spill] sm:$0xff] }
 0x54a   : > { %2635 = vadd.xlane.f32.xlu1 %v2451_v35  ;;  %v4663_v59 = vpop.eup %4662  ;;  %v2458_v26 = vmul.f32 %v4661_v5, %v2358_v51 }
 0x54b   : > { %2633 = vadd.xlane.f32.xlu0 %v2450_v27  ;;  %v2459_v42 = vmul.f32 %v4663_v59, %v2359_v10  ;;  %v1711_v27 = vmul.f32 0.2, %v1695_v50  ;;  %v6861_v10 = vld [vmem:[#allocation100_spill] sm:$0xff] }
 0x54c   : > { %3928 = vmatmul.mubr.f32.gmra.mrb[6].mxu1 %v2451_v35 }
 0x54d   : > { %3930 = vmatprep.mubr.f32.mxu1 %v2452_v24  ;;  %v1727_v54 = vmax.f32 %v1695_v50, %v1711_v27 }
 0x54e   : > { %2639 = vadd.xlane.f32.xlu1 %v2453_v25 }
 0x54f   : > { %2637 = vadd.xlane.f32.xlu0 %v2452_v24  ;;  %v1757_v59 = vmul.f32 1.442695, %v1727_v54 }
 0x550   : > { %3931 = vmatmul.mubr.f32.gmra.mrb[8].mxu1 %v2453_v25  ;;  %v6856_v25 = vld [vmem:[#allocation60_spill] sm:$0xff] }
 0x551   : > { %3933 = vmatprep.mubr.f32.mxu1 %v2454_v37 }
 0x552   : > { %2643 = vadd.xlane.f32.xlu1 %v2455_v39 }
 0x553   : > { %2641 = vadd.xlane.f32.xlu0 %v2454_v37 }
 0x554   : > { %3934 = vmatmul.mubr.f32.gmra.mrb[10].mxu1 %v2455_v39 }
 0x555   : > { %3936 = vmatprep.mubr.f32.mxu1 %v2456_v58 }
 0x556   : > { %2647 = vadd.xlane.f32.xlu1 %v2457_v41 }
 0x557   : > { %2645 = vadd.xlane.f32.xlu0 %v2456_v58 }
 0x558   : > { %3937 = vmatmul.mubr.f32.gmra.mrb[12].mxu1 %v2457_v41  ;;  %v6860_v41 = vld [vmem:[#allocation69_spill] sm:$0xff] }
 0x559   : > { %3939 = vmatprep.mubr.f32.mxu1 %v2458_v26 }
 0x55a   : > { %2651 = vadd.xlane.f32.xlu1 %v2459_v42 }
 0x55b   : > { %2649 = vadd.xlane.f32.xlu0 %v2458_v26 }
 0x55c   : > { %3940 = vmatmul.mubr.f32.gmra.mrb[14].mxu1 %v2459_v42  ;;  %v6862_v42 = vld [vmem:[#allocation99_spill] sm:$0xff] }
 0x55e   : > { %2069 = vadd.xlane.f32.xlu1 %v6178_v56  ;;  %v6845_v56 = vld [vmem:[#allocation90_spill] sm:$0xff] }
 0x55f   : > { %2067 = vadd.xlane.f32.xlu0 %v6174_v55  ;;  %v1696_v61 = vadd.f32 %v6845_v56, %v6818_v33  ;;  %v6846_v55 = vld [vmem:[#allocation64_spill] sm:$0xff]  ;;  %v6867_v56 = vld [vmem:[#allocation78_spill] sm:$0xff] }
 0x560   : > { %v6853_v33 = vld [vmem:[#allocation96_spill] sm:$0xff] }
 0x561   : > { %v1712_v21 = vmul.f32 0.2, %v1696_v61 }
 0x563   : > { %v1728_v60 = vmax.f32 %v1696_v61, %v1712_v21 }
 0x565   : > { %v1759_v5 = vmul.f32 1.442695, %v1728_v60 }
 0x567   : > { %4664 = vpow2.f32 %v1759_v5 }
 0x568   : > { %4666 = vpow2.f32 %v1757_v59 }
 0x5cb   : > { %v2624_v1 = vpop.xlane.xlu1 %2623 }
 0x5cc   : > { %v2654_v57 = vadd.f32 %v6840_v38, %v2624_v1  ;;  %v2622_v12 = vpop.xlane.xlu0 %2621 }
 0x5cd   : > { %v2653_v8 = vadd.f32 %v6841_v48, %v2622_v12 }
 0x5ce   : > { %v6342_v44 = vadd.f32 %v2654_v57, %v6842_v2  ;;  %v6863_v57 = vld [vmem:[#allocation74_spill] sm:$0xff] }
 0x5cf   : > { %v6345_v22 = vadd.f32 %v2653_v8, %v6843_v3  ;;  %v2628_v18 = vpop.xlane.xlu1 %2627  ;;  %v6864_v8 = vld [vmem:[#allocation38_spill] sm:$0xff] }
 0x5d0   : > { %v2656_v14 = vadd.f32 %v6844_v28, %v2628_v18  ;;  %v2626_v19 = vpop.xlane.xlu0 %2625  ;;  %v6865_v3 = vld [vmem:[#allocation102_spill] sm:$0xff]  ;;  %v6866_v28 = vld [vmem:[#allocation101_spill] sm:$0xff] }
 0x5d1   : > { %v2655_v4 = vadd.f32 %v6846_v55, %v2626_v19 }
 0x5d2   : > { %v6354_v23 = vadd.f32 %v2656_v14, %v6849_v30  ;;  %v6870_v30 = vld [vmem:[#allocation103_spill] sm:$0xff] }
 0x5d3   : > { %v6357_v46 = vadd.f32 %v2655_v4, %v6850_v29  ;;  %v2632_v0 = vpop.xlane.xlu1 %2631  ;;  %v6868_v4 = vld [vmem:[#allocation76_spill] sm:$0xff] }
 0x5d4   : > { %v2658_v34 = vadd.f32 %v6851_v11, %v2632_v0  ;;  %v2630_v63 = vpop.xlane.xlu0 %2629  ;;  %v6871_v11 = vld [vmem:[#allocation61_spill] sm:$0xff] }
 0x5d5   : > { %v2657_v32 = vadd.f32 %v6852_v13, %v2630_v63  ;;  %v6872_v63 = vld [vmem:[#allocation79_spill] sm:$0xff] }
 0x5d6   : > { %v6362_v49 = vadd.f32 %v2658_v34, %v6853_v33  ;;  %v1503_v34 = vadd.f32 %v6871_v11, %v6200_v36  ;;  %v6874_v33 = vld [vmem:[#allocation81_spill] sm:$0xff] }
 0x5d7   : > { %v6365_v35 = vadd.f32 %v2657_v32, %v6854_v17  ;;  %v2636_v16 = vpop.xlane.xlu1 %2635  ;;  %v6873_v32 = vld [vmem:[#allocation62_spill] sm:$0xff]  ;;  %v4771_v36 = vld [vmem:[#allocation2 + $0xf8] sm:$0xff] }
 0x5d8   : > { %v2660_v47 = vadd.f32 %v6855_v31, %v2636_v16  ;;  %v2634_v24 = vpop.xlane.xlu0 %2633  ;;  %v1502_v27 = vadd.f32 %v6873_v32, %v6206_v40  ;;  %v4665_v31 = vpop.eup %4664  ;;  %v6880_v32 = vld [vmem:[#allocation75_spill] sm:$0xff] }
 0x5d9   : > { %v2659_v45 = vadd.f32 %v6856_v25, %v2634_v24  ;;  %v4667_v60 = vpop.eup %4666 }
 0x5da   : > { %v6370_v37 = vadd.f32 %v2660_v47, %v6857_v15  ;;  %v1893_v15 = vmul.f32 %v4771_v36, %v4665_v31  ;;  %v6882_v36 = vld [vmem:[#allocation80_spill] sm:$0xff] }
 0x5db   : > { %v6373_v39 = vadd.f32 %v2659_v45, %v6858_v20  ;;  %v2640_v6 = vpop.xlane.xlu1 %2639  ;;  %v4772_v20 = vld [vmem:[#allocation2 + $0xf0] sm:$0xff] }
 0x5dc   : > { %v2662_v52 = vadd.f32 %v6859_v43, %v2640_v6  ;;  %v2638_v58 = vpop.xlane.xlu0 %2637  ;;  %v1892_v6 = vmul.f32 %v4772_v20, %v4667_v60  ;;  %v2036_v40 = vadd.f32 %v6289_v53, %v1893_v15 }
 0x5dd   : > { %v2661_v51 = vadd.f32 %v6860_v41, %v2638_v58 }
 0x5de   : > { %v6378_v26 = vadd.f32 %v2662_v52, %v6861_v10  ;;  %v2031_v52 = vadd.f32 %v6292_v62, %v1892_v6 }
 0x5df   : > { %v6381_v1 = vadd.f32 %v2661_v51, %v6862_v42  ;;  %v2644_v38 = vpop.xlane.xlu1 %2643 }
 0x5e0   : > { %v2664_v12 = vadd.f32 %v6863_v57, %v2644_v38  ;;  %v2642_v48 = vpop.xlane.xlu0 %2641 }
 0x5e1   : > { %v2663_v2 = vadd.f32 %v6864_v8, %v2642_v48  ;;  %v6875_v48 = vld [vmem:[#allocation66_spill] sm:$0xff] }
 0x5e2   : > { %v6386_v18 = vadd.f32 %v2664_v12, %v6865_v3 }
 0x5e3   : > { %v6389_v14 = vadd.f32 %v2663_v2, %v6866_v28  ;;  %v2648_v19 = vpop.xlane.xlu1 %2647  ;;  %v6876_v28 = vld [vmem:[#allocation67_spill] sm:$0xff] }
 0x5e4   : > { %v2666_v61 = vadd.f32 %v6867_v56, %v2648_v19  ;;  %v2646_v55 = vpop.xlane.xlu0 %2645 }
 0x5e5   : > { %v2665_v9 = vadd.f32 %v6868_v4, %v2646_v55 }
 0x5e6   : > { %v6394_v50 = vadd.f32 %v2666_v61, %v6869_v7 }
 0x5e7   : > { %v6397_v29 = vadd.f32 %v2665_v9, %v6870_v30  ;;  %v2652_v0 = vpop.xlane.xlu1 %2651  ;;  %v6878_v9 = vld [vmem:[#allocation72_spill] sm:$0xff] }
 0x5e8   : > { %v2668_v21 = vadd.f32 %v6872_v63, %v2652_v0  ;;  %v2650_v13 = vpop.xlane.xlu0 %2649 }
 0x5e9   : > { %v2667_v17 = vadd.f32 %v6874_v33, %v2650_v13 }
 0x5ea   : > { %v6405_v16 = vadd.f32 %v2668_v21, %v1503_v34  ;;  %v6879_v34 = vld [vmem:[#allocation73_spill] sm:$0xff] }
 0x5eb   : > { %v6407_v47 = vadd.f32 %v2667_v17, %v1502_v27  ;;  %v2070_v24 = vpop.xlane.xlu1 %2069 }
 0x5ec   : > { %v2086_v25 = vadd.f32 %v4665_v31, %v2070_v24  ;;  %v2068_v45 = vpop.xlane.xlu0 %2067 }
 0x5ed   : > { %v2085_v54 = vadd.f32 %v4667_v60, %v2068_v45  ;;  %v6881_v60 = vld [vmem:[#allocation77_spill] sm:$0xff] }
 0x5ee   : > { %4668 = vrcp.f32 %v2086_v25 }
 0x5ef   : > { %4670 = vrcp.f32 %v2085_v54 }
 0x5f8   : > { %v4669_v43 = vpop.eup %4668 }
 0x5f9   : > { %v4671_v58 = vpop.eup %4670  ;;  %v2860_v5 = vmul.f32 %v4669_v43, %v2036_v40 }
 0x5fa   : > { %v2858_v41 = vmul.f32 %v4671_v58, %v2031_v52 }
 0x5fb   : > { %v2907_v51 = vmul.f32 1.442695, %v2860_v5  ;;  %vm2876_vm15 = vcmp.gt.f32.partialorder %v2860_v5, 0.0 }
 0x5fc   : > { %v2905_v59 = vmul.f32 1.442695, %v2858_v41  ;;  %vm2875_vm0 = vcmp.gt.f32.partialorder %v2858_v41, 0.0 }
 0x5fd   : > { %4672 = vpow2.f32 %v2907_v51 }
 0x5fe   : > { %4674 = vpow2.f32 %v2905_v59 }
 0x5ff   : > { %4676 = vrcp.f32 %v6342_v44 }
 0x600   : > { %4678 = vrcp.f32 %v6345_v22 }
 0x601   : > { %4680 = vrcp.f32 %v6354_v23 }
 0x602   : > { %4682 = vrcp.f32 %v6357_v46 }
 0x603   : > { %4684 = vrcp.f32 %v6362_v49  ;;  %v6877_v49 = vld [vmem:[#allocation71_spill] sm:$0xff] }
 0x604   : > { %4686 = vrcp.f32 %v6365_v35 }
 0x605   : > { %4688 = vrcp.f32 %v6370_v37 }
 0x606   : > { %4690 = vrcp.f32 %v6373_v39 }
 0x607   : > { %v4673_v10 = vpop.eup %4672  ;;  %4692 = vrcp.f32 %v6378_v26 }
 0x608   : > { %v4675_v42 = vpop.eup %4674  ;;  %v3307_v38 = vadd.f32 -1.0, %v4673_v10 }
 0x609   : > { %v3306_v57 = vadd.f32 -1.0, %v4675_v42  ;;  %v4677_v3 = vpop.eup %4676  ;;  %v6884_v42 = vld [vmem:[#allocation83_spill] sm:$0xff] }
 0x60a   : > { %v2940_v12 = vsel %vm2876_vm15, %v2860_v5, %v3307_v38  ;;  %v4679_v19 = vpop.eup %4678  ;;  %v6883_v5 = vld [vmem:[#allocation82_spill] sm:$0xff] }
 0x60b   : > { %2956 = vst [vmem:[#allocation3 + $0xf8] sm:$0xff] %v2940_v12  ;;  %v2939_v53 = vsel %vm2875_vm0, %v2858_v41, %v3306_v57  ;;  %v4681_v55 = vpop.eup %4680 }
 0x60c   : > { %2955 = vst [vmem:[#allocation3 + $0xf0] sm:$0xff] %v2939_v53  ;;  %v4683_v30 = vpop.eup %4682 }
 0x60d   : > { %v4685_v26 = vpop.eup %4684 }
 0x60e   : > { %v4687_v33 = vpop.eup %4686 }
 0x613   : > { %v3920_v62 = vpop.f32.mrb[0].mxu1 }
 0x614   : > { %v4263_v8 = vadd.f32 %v6875_v48, %v3920_v62  ;;  %v2542_v2 = vpop.f32.mrb[1].mxu1 }
 0x615   : > { %v4265_v44 = vadd.f32 %v6876_v28, %v2542_v2  ;;  %v6885_v28 = vld [vmem:[#allocation84_spill] sm:$0xff] }
 0x616   : > { %v6419_v56 = vmul.f32 %v4677_v3, %v4263_v8 }
 0x617   : > { %v6422_v22 = vmul.f32 %v4679_v19, %v4265_v44  ;;  %v3923_v23 = vpop.f32.mrb[2].mxu1 }
 0x618   : > { %v2751_v46 = vmul.f32 1.442695, %v6419_v56  ;;  %v4267_v35 = vadd.f32 %v6877_v49, %v3923_v23  ;;  %v2552_v61 = vpop.f32.mrb[3].mxu1  ;;  %vm2734_vm1 = vcmp.gt.f32.partialorder %v6419_v56, 0.0  ;;  %v6886_v49 = vld [vmem:[#allocation43_spill] sm:$0xff] }
 0x619   : > { %v2749_v4 = vmul.f32 1.442695, %v6422_v22  ;;  %v4269_v7 = vadd.f32 %v6878_v9, %v2552_v61  ;;  %vm2733_vm2 = vcmp.gt.f32.partialorder %v6422_v22, 0.0 }
 0x61a   : > { %4694 = vpow2.f32 %v2751_v46  ;;  %v6430_v37 = vmul.f32 %v4681_v55, %v4267_v35 }
 0x61b   : > { %4696 = vpow2.f32 %v2749_v4  ;;  %v6432_v0 = vmul.f32 %v4683_v30, %v4269_v7  ;;  %v3926_v39 = vpop.f32.mrb[4].mxu1 }
 0x61c   : > { %4698 = vrcp.f32 %v6381_v1  ;;  %v2755_v11 = vmul.f32 1.442695, %v6430_v37  ;;  %v4271_v63 = vadd.f32 %v6879_v34, %v3926_v39  ;;  %v2562_v21 = vpop.f32.mrb[5].mxu1  ;;  %vm2736_vm3 = vcmp.gt.f32.partialorder %v6430_v37, 0.0  ;;  %v6887_v34 = vld [vmem:[#allocation85_spill] sm:$0xff] }
 0x61d   : > { %4700 = vrcp.f32 %v6386_v18  ;;  %v2753_v13 = vmul.f32 1.442695, %v6432_v0  ;;  %v4273_v27 = vadd.f32 %v6880_v32, %v2562_v21  ;;  %v4689_v18 = vpop.eup %4688  ;;  %vm2735_vm4 = vcmp.gt.f32.partialorder %v6432_v0, 0.0  ;;  %v6888_v32 = vld [vmem:[#allocation86_spill] sm:$0xff] }
 0x61e   : > { %4702 = vpow2.f32 %v2755_v11  ;;  %v6440_v17 = vmul.f32 %v4685_v26, %v4271_v63  ;;  %v4691_v20 = vpop.eup %4690 }
 0x61f   : > { %4704 = vpow2.f32 %v2753_v13  ;;  %v6442_v31 = vmul.f32 %v4687_v33, %v4273_v27  ;;  %v3929_v1 = vpop.f32.mrb[6].mxu1  ;;  %v4693_v40 = vpop.eup %4692 }
 0x620   : > { %4706 = vrcp.f32 %v6389_v14  ;;  %v2759_v24 = vmul.f32 1.442695, %v6440_v17  ;;  %v4275_v25 = vadd.f32 %v6881_v60, %v3929_v1  ;;  %v2572_v45 = vpop.f32.mrb[7].mxu1  ;;  %vm2738_vm5 = vcmp.gt.f32.partialorder %v6440_v17, 0.0 }
 0x621   : > { %4708 = vrcp.f32 %v6394_v50  ;;  %v2757_v54 = vmul.f32 1.442695, %v6442_v31  ;;  %v4277_v15 = vadd.f32 %v6882_v36, %v2572_v45  ;;  %vm2737_vm6 = vcmp.gt.f32.partialorder %v6442_v31, 0.0 }
 0x622   : > { %4710 = vpow2.f32 %v2759_v24  ;;  %v6450_v6 = vmul.f32 %v4689_v18, %v4275_v25 }
 0x623   : > { %4712 = vpow2.f32 %v2757_v54  ;;  %v6452_v43 = vmul.f32 %v4691_v20, %v4277_v15  ;;  %v3932_v14 = vpop.f32.mrb[8].mxu1  ;;  %v6889_v15 = vld [vmem:[#allocation87_spill] sm:$0xff] }
 0x624   : > { %v4695_v52 = vpop.eup %4694  ;;  %4714 = vrcp.f32 %v6397_v29  ;;  %v2763_v58 = vmul.f32 1.442695, %v6450_v6  ;;  %v4279_v50 = vadd.f32 %v6883_v5, %v3932_v14  ;;  %v2582_v41 = vpop.f32.mrb[9].mxu1  ;;  %vm2740_vm7 = vcmp.gt.f32.partialorder %v6450_v6, 0.0 }
 0x625   : > { %v4697_v51 = vpop.eup %4696  ;;  %4716 = vrcp.f32 %v6405_v16  ;;  %v3277_v59 = vadd.f32 -1.0, %v4695_v52  ;;  %v2761_v10 = vmul.f32 1.442695, %v6452_v43  ;;  %v4281_v38 = vadd.f32 %v6884_v42, %v2582_v41 }
 0x626   : > { %v4699_v57 = vpop.eup %4698  ;;  %v3276_v12 = vadd.f32 -1.0, %v4697_v51  ;;  %4718 = vpow2.f32 %v2763_v58  ;;  %v6461_v53 = vmul.f32 %v4693_v40, %v4279_v50  ;;  %v6890_v58 = vld [vmem:[#allocation88_spill] sm:$0xff]  ;;  %vm2739_vm8 = vcmp.gt.f32.partialorder %v6452_v43, 0.0 }
 0x627   : > { %v4701_v29 = vpop.eup %4700  ;;  %v6464_v62 = vsel %vm2734_vm1, %v6419_v56, %v3277_v59  ;;  %4720 = vpow2.f32 %v2761_v10  ;;  %v6467_v16 = vmul.f32 %v4699_v57, %v4281_v38  ;;  %v3935_v48 = vpop.f32.mrb[10].mxu1 }
 0x628   : > { %v4703_v8 = vpop.eup %4702  ;;  %4722 = vrcp.f32 %v6407_v47  ;;  %2814 = vst [vmem:[#allocation3 + $0x8] sm:$0xff] %v6464_v62  ;;  %v6472_v2 = vsel %vm2733_vm2, %v6422_v22, %v3276_v12  ;;  %v2767_v3 = vmul.f32 1.442695, %v6461_v53  ;;  %v4283_v44 = vadd.f32 %v6885_v28, %v3935_v48  ;;  %v2592_v19 = vpop.f32.mrb[11].mxu1 }
 0x629   : > { %v4705_v56 = vpop.eup %4704  ;;  %2813 = vst [vmem:[#allocation3] sm:$0xff] %v6472_v2  ;;  %v3279_v23 = vadd.f32 -1.0, %v4703_v8  ;;  %v2765_v46 = vmul.f32 1.442695, %v6467_v16  ;;  %v4285_v35 = vadd.f32 %v6886_v49, %v2592_v19  ;;  %vm2742_vm9 = vcmp.gt.f32.partialorder %v6461_v53, 0.0  ;;  %3974 = vmatprep.mubr.f32.mxu0 (!%p3308_p7), %v6472_v2 }
 0x62a   : > { %v4707_v61 = vpop.eup %4706  ;;  %v3278_v47 = vadd.f32 -1.0, %v4705_v56  ;;  %4724 = vpow2.f32 %v2767_v3  ;;  %v6480_v22 = vmul.f32 %v4701_v29, %v4283_v44  ;;  %vm2741_vm10 = vcmp.gt.f32.partialorder %v6467_v16, 0.0 }
 0x62b   : > { %v4709_v55 = vpop.eup %4708  ;;  %v6483_v4 = vsel %vm2736_vm3, %v6430_v37, %v3279_v23  ;;  %4726 = vpow2.f32 %v2765_v46  ;;  %v6486_v9 = vmul.f32 %v4707_v61, %v4285_v35  ;;  %v3938_v7 = vpop.f32.mrb[12].mxu1 }
 0x62c   : > { %v4711_v30 = vpop.eup %4710  ;;  %2816 = vst [vmem:[#allocation3 + $0x18] sm:$0xff] %v6483_v4  ;;  %v6490_v39 = vsel %vm2735_vm4, %v6432_v0, %v3278_v47  ;;  %v2771_v11 = vmul.f32 1.442695, %v6480_v22  ;;  %v4287_v63 = vadd.f32 %v6887_v34, %v3938_v7  ;;  %v2602_v21 = vpop.f32.mrb[13].mxu1  ;;  %vm2744_vm11 = vcmp.gt.f32.partialorder %v6480_v22, 0.0  ;;  %v2963_v34 = vld [vmem:[#allocation12 + $0x10] sm:$0xff] (!%p3308_p7) }
 0x62d   : > { %v4713_v26 = vpop.eup %4712  ;;  %2815 = vst [vmem:[#allocation3 + $0x10] sm:$0xff] %v6490_v39  ;;  %v3281_v37 = vadd.f32 -1.0, %v4711_v30  ;;  %v2769_v13 = vmul.f32 1.442695, %v6486_v9  ;;  %v4289_v27 = vadd.f32 %v6888_v32, %v2602_v21  ;;  %vm2743_vm12 = vcmp.gt.f32.partialorder %v6486_v9, 0.0  ;;  %v2961_v30 = vld [vmem:[#allocation12] sm:$0xff] (!%p3308_p7) }
 0x62e   : > { %v4715_v33 = vpop.eup %4714  ;;  %v3280_v1 = vadd.f32 -1.0, %v4713_v26  ;;  %4728 = vpow2.f32 %v2771_v11  ;;  %v2728_v0 = vmul.f32 %v4709_v55, %v4287_v63  ;;  %v2962_v11 = vld [vmem:[#allocation12 + $0x8] sm:$0xff] (!%p3308_p7)  ;;  %v2964_v21 = vld [vmem:[#allocation12 + $0x18] sm:$0xff] (!%p3308_p7) }
 0x62f   : > { %v4717_v24 = vpop.eup %4716  ;;  %v6499_v60 = vsel %vm2738_vm5, %v6440_v17, %v3281_v37  ;;  %4730 = vpow2.f32 %v2769_v13  ;;  %v2726_v25 = vmul.f32 %v4715_v33, %v4289_v27  ;;  %v3941_v45 = vpop.f32.mrb[14].mxu1  ;;  %v4230_v63 = vpack.c.bf16 (!%p3308_p7), %v2962_v11, %v2961_v30  ;;  %v2965_v37 = vld [vmem:[#allocation12 + $0x20] sm:$0xff] (!%p3308_p7)  ;;  %v2966_v13 = vld [vmem:[#allocation12 + $0x28] sm:$0xff] (!%p3308_p7)  ;;  %v2967_v27 = vld [vmem:[#allocation12 + $0x30] sm:$0xff] (!%p3308_p7) }
 0x630   : > { %v4719_v18 = vpop.eup %4718  ;;  %2818 = vst [vmem:[#allocation3 + $0x28] sm:$0xff] %v6499_v60  ;;  %v6504_v54 = vsel %vm2737_vm6, %v6442_v31, %v3280_v1  ;;  %v2775_v36 = vmul.f32 1.442695, %v2728_v0  ;;  %v4291_v20 = vadd.f32 %v6889_v15, %v3941_v45  ;;  %v2612_v40 = vpop.f32.mrb[15].mxu1  ;;  %vm2746_vm13 = vcmp.gt.f32.partialorder %v2728_v0, 0.0  ;;  %v2968_v33 = vld [vmem:[#allocation12 + $0x38] sm:$0xff] (!%p3308_p7) }
 0x631   : > { %v4721_v14 = vpop.eup %4720  ;;  %2817 = vst [vmem:[#allocation3 + $0x20] sm:$0xff] %v6504_v54  ;;  %v3283_v17 = vadd.f32 -1.0, %v4719_v18  ;;  %v2773_v52 = vmul.f32 1.442695, %v2726_v25  ;;  %v4293_v5 = vadd.f32 %v6890_v58, %v2612_v40  ;;  %vm2745_vm14 = vcmp.gt.f32.partialorder %v2726_v25, 0.0  ;;  %4231 = vmatprep.subr.bf16.mxu0 (!%p3308_p7), %v4230_v63  ;;  %4310 = vmatprep.subr.bf16.mxu1 (!%p3308_p7), %v4230_v63  ;;  %v2969_v1 = vld [vmem:[#allocation12 + $0x40] sm:$0xff] (!%p3308_p7) }
 0x632   : > { %v4723_v50 = vpop.eup %4722  ;;  %v3282_v41 = vadd.f32 -1.0, %v4721_v14  ;;  %4732 = vpow2.f32 %v2775_v36  ;;  %v2732_v51 = vmul.f32 %v4717_v24, %v4291_v20  ;;  %v4234_v26 = vpack.c.bf16 (!%p3308_p7), %v2964_v21, %v2963_v34  ;;  %4233 = vmatpush3.bf16.msra.mxu0 (!%p3308_p7), %v4230_v63  ;;  %4318 = vmatpush3.bf16.msra.mxu1 (!%p3308_p7), %v4230_v63  ;;  %v2972_v45 = vld [vmem:[#allocation12 + $0x58] sm:$0xff] (!%p3308_p7)  ;;  %v2973_v36 = vld [vmem:[#allocation12 + $0x60] sm:$0xff] (!%p3308_p7)  ;;  %v2974_v15 = vld [vmem:[#allocation12 + $0x68] sm:$0xff] (!%p3308_p7) }
 0x633   : > { %v6511_v31 = vsel %vm2740_vm7, %v6450_v6, %v3283_v17  ;;  %4734 = vpow2.f32 %v2773_v52  ;;  %v2730_v59 = vmul.f32 %v4723_v50, %v4293_v5  ;;  %v4238_v32 = vpack.c.bf16 (!%p3308_p7), %v2966_v13, %v2965_v37  ;;  %v2975_v40 = vld [vmem:[#allocation12 + $0x70] sm:$0xff] (!%p3308_p7)  ;;  %v2976_v14 = vld [vmem:[#allocation12 + $0x78] sm:$0xff] (!%p3308_p7) }
 0x634   : > { %v4725_v10 = vpop.eup %4724  ;;  %2820 = vst [vmem:[#allocation3 + $0x38] sm:$0xff] %v6511_v31  ;;  %v6516_v42 = vsel %vm2739_vm8, %v6452_v43, %v3282_v41  ;;  %v2779_v38 = vmul.f32 1.442695, %v2732_v51  ;;  %vm2748_vm15 = vcmp.gt.f32.partialorder %v2732_v51, 0.0  ;;  %4235 = vmatprep.subr.bf16.mxu0 (!%p3308_p7), %v4234_v26  ;;  %4311 = vmatprep.subr.bf16.mxu1 (!%p3308_p7), %v4234_v26  ;;  %v4242_v2 = vpack.c.bf16 (!%p3308_p7), %v2968_v33, %v2967_v27 }
 0x635   : > { %v4727_v57 = vpop.eup %4726  ;;  %2819 = vst [vmem:[#allocation3 + $0x30] sm:$0xff] %v6516_v42  ;;  %v3285_v12 = vadd.f32 -1.0, %v4725_v10  ;;  %v2777_v29 = vmul.f32 1.442695, %v2730_v59  ;;  %vm2747_vm0 = vcmp.gt.f32.partialorder %v2730_v59, 0.0  ;;  %v4254_v20 = vpack.c.bf16 (!%p3308_p7), %v2974_v15, %v2973_v36 }
 0x636   : > { %v3284_v6 = vadd.f32 -1.0, %v4727_v57  ;;  %4736 = vpow2.f32 %v2779_v38  ;;  %4237 = vmatpush3.bf16.msra.mxu0 (!%p3308_p7), %v4234_v26  ;;  %4319 = vmatpush3.bf16.msra.mxu1 (!%p3308_p7), %v4234_v26  ;;  %v4258_v17 = vpack.c.bf16 (!%p3308_p7), %v2976_v14, %v2975_v40 }
 0x637   : > { %v6521_v48 = vsel %vm2742_vm9, %v6461_v53, %v3285_v12  ;;  %4738 = vpow2.f32 %v2777_v29  ;;  %4239 = vmatprep.subr.bf16.mxu0 (!%p3308_p7), %v4238_v32  ;;  %4312 = vmatprep.subr.bf16.mxu1 (!%p3308_p7), %v4238_v32 }
 0x638   : > { %v4729_v8 = vpop.eup %4728  ;;  %2822 = vst [vmem:[#allocation3 + $0x48] sm:$0xff] %v6521_v48  ;;  %v2805_v43 = vsel %vm2741_vm10, %v6467_v16, %v3284_v6 }
 0x639   : > { %v4731_v3 = vpop.eup %4730  ;;  %2821 = vst [vmem:[#allocation3 + $0x40] sm:$0xff] %v2805_v43  ;;  %v3287_v28 = vadd.f32 -1.0, %v4729_v8  ;;  %3986 = vmatprep.mubr.f32.mxu1 (!%p3308_p7), %v2805_v43 }
 0x63a   : > { %v3286_v44 = vadd.f32 -1.0, %v4731_v3  ;;  %4241 = vmatpush3.bf16.msra.mxu0 (!%p3308_p7), %v4238_v32  ;;  %4320 = vmatpush3.bf16.msra.mxu1 (!%p3308_p7), %v4238_v32 }
 0x63b   : > { %v6528_v19 = vsel %vm2744_vm11, %v6480_v22, %v3287_v28  ;;  %4243 = vmatprep.subr.bf16.mxu0 (!%p3308_p7), %v4242_v2  ;;  %4313 = vmatprep.subr.bf16.mxu1 (!%p3308_p7), %v4242_v2 }
 0x63c   : > { %v4733_v53 = vpop.eup %4732  ;;  %2824 = vst [vmem:[#allocation3 + $0x58] sm:$0xff] %v6528_v19  ;;  %v6533_v56 = vsel %vm2743_vm12, %v6486_v9, %v3286_v44 }
 0x63d   : > { %v4735_v23 = vpop.eup %4734  ;;  %2823 = vst [vmem:[#allocation3 + $0x50] sm:$0xff] %v6533_v56  ;;  %v3289_v16 = vadd.f32 -1.0, %v4733_v53 }
 0x63e   : > { %v3288_v46 = vadd.f32 -1.0, %v4735_v23  ;;  %4245 = vmatpush3.bf16.msra.mxu0 (!%p3308_p7), %v4242_v2  ;;  %4321 = vmatpush3.bf16.msra.mxu1 (!%p3308_p7), %v4242_v2 }
 0x63f   : > { %v6536_v49 = vsel %vm2746_vm13, %v2728_v0, %v3289_v16  ;;  %2960 = sbr.rel (%p3308_p7) target bundleno = 1846 (0x736), region = 80  ;;  %v2970_v0 = vld [vmem:[#allocation12 + $0x48] sm:$0xff] (!%p3308_p7) }
 0x640   : > { %v4737_v35 = vpop.eup %4736  ;;  %2826 = vst [vmem:[#allocation3 + $0x68] sm:$0xff] %v6536_v49  ;;  %v6539_v61 = vsel %vm2745_vm14, %v2726_v25, %v3288_v46  ;;  %v4246_v24 = vpack.c.bf16 (!%p3308_p7), %v2970_v0, %v2969_v1  ;;  %v2971_v25 = vld [vmem:[#allocation12 + $0x50] sm:$0xff] (!%p3308_p7) }
 0x641   : > { %v4739_v47 = vpop.eup %4738  ;;  %2825 = vst [vmem:[#allocation3 + $0x60] sm:$0xff] %v6539_v61  ;;  %v3291_v22 = vadd.f32 -1.0, %v4737_v35  ;;  %v4250_v18 = vpack.c.bf16 (!%p3308_p7), %v2972_v45, %v2971_v25 }
 0x642   : > { %v3290_v55 = vadd.f32 -1.0, %v4739_v47  ;;  %4247 = vmatprep.subr.bf16.mxu0 (!%p3308_p7), %v4246_v24  ;;  %4314 = vmatprep.subr.bf16.mxu1 (!%p3308_p7), %v4246_v24 }
 0x643   : > { %v6542_v9 = vsel %vm2748_vm15, %v2732_v51, %v3291_v22  ;;  %4249 = vmatpush3.bf16.msra.mxu0 (!%p3308_p7), %v4246_v24  ;;  %4322 = vmatpush3.bf16.msra.mxu1 (!%p3308_p7), %v4246_v24 }
 0x644   : > { %2828 = vst [vmem:[#allocation3 + $0x78] sm:$0xff] %v6542_v9  ;;  %v6545_v7 = vsel %vm2747_vm0, %v2730_v59, %v3290_v55  ;;  %4251 = vmatprep.subr.bf16.mxu0 (!%p3308_p7), %v4250_v18  ;;  %4315 = vmatprep.subr.bf16.mxu1 (!%p3308_p7), %v4250_v18 }
 0x645   : > { %2827 = vst [vmem:[#allocation3 + $0x70] sm:$0xff] %v6545_v7 }
 0x647   : > { %4253 = vmatpush3.bf16.msra.mxu0 %v4250_v18  ;;  %4323 = vmatpush3.bf16.msra.mxu1 %v4250_v18 }
 0x648   : > { %4255 = vmatprep.subr.bf16.mxu0 %v4254_v20  ;;  %4316 = vmatprep.subr.bf16.mxu1 %v4254_v20 }
 0x64b   : > { %4257 = vmatpush3.bf16.msra.mxu0 %v4254_v20  ;;  %4324 = vmatpush3.bf16.msra.mxu1 %v4254_v20 }
 0x64c   : > { %4259 = vmatprep.subr.bf16.mxu0 %v4258_v17  ;;  %4317 = vmatprep.subr.bf16.mxu1 %v4258_v17 }
 0x64f   : > { %4261 = vmatpush3.bf16.msra.mxu0 %v4258_v17  ;;  %4325 = vmatpush3.bf16.msra.mxu1 %v4258_v17 }
 0x652   : > { %3975 = vmatmul.mubr.f32.vlgmr.msra.gmra.mrb[0].mxu0 %v6464_v62  ;;  %3987 = vmatmul.mubr.f32.vlgmr.msra.gmra.mrb[0].mxu1 %v6521_v48  ;;  %v3309_v62 = vld [vmem:[%s6610_s7] ss:$0 sm:$0xff] }
 0x653   : > { %3977 = vmatprep.mubr.f32.mxu0 %v6490_v39  ;;  %3989 = vmatprep.mubr.f32.mxu1 %v6533_v56 }
 0x656   : > { %3978 = vmatmul.mubr.f32.gmra.mrb[2].mxu0 %v6483_v4  ;;  %3990 = vmatmul.mubr.f32.gmra.mrb[2].mxu1 %v6528_v19 }
 0x657   : > { %3980 = vmatprep.mubr.f32.mxu0 %v6504_v54  ;;  %3992 = vmatprep.mubr.f32.mxu1 %v6539_v61 }
 0x65a   : > { %3981 = vmatmul.mubr.f32.gmra.mrb[4].mxu0 %v6499_v60  ;;  %3993 = vmatmul.mubr.f32.gmra.mrb[4].mxu1 %v6536_v49 }
 0x65b   : > { %3983 = vmatprep.mubr.f32.mxu0 %v6516_v42  ;;  %3995 = vmatprep.mubr.f32.mxu1 %v6545_v7 }
 0x65e   : > { %3984 = vmatmul.mubr.f32.gmra.mrb[6].mxu0 %v6511_v31  ;;  %3996 = vmatmul.mubr.f32.gmra.mrb[6].mxu1 %v6542_v9 }
 0x725   : > { %v3976_v4 = vpop.f32.mrb[0].mxu0  ;;  %v3988_v39 = vpop.f32.mrb[0].mxu1 }
 0x726   : > { %v3056_v54 = vadd.f32 %v3976_v4, %v3309_v62  ;;  %v3096_v52 = vadd.f32 %v3988_v39, %v3309_v62  ;;  %v3050_v58 = vpop.f32.mrb[1].mxu0  ;;  %v3090_v60 = vpop.f32.mrb[1].mxu1 }
 0x727   : > { %v3051_v5 = vadd.f32 %v3309_v62, %v3050_v58  ;;  %v3091_v50 = vadd.f32 %v3309_v62, %v3090_v60 }
 0x728   : > { %3130 = vst [vmem:[#allocation13 + $0x8] sm:$0xff] %v3056_v54  ;;  %3138 = vst [vmem:[#allocation13 + $0x48] sm:$0xff] %v3096_v52 }
 0x729   : > { %3129 = vst [vmem:[#allocation13] sm:$0xff] %v3051_v5  ;;  %3137 = vst [vmem:[#allocation13 + $0x40] sm:$0xff] %v3091_v50  ;;  %v3979_v41 = vpop.f32.mrb[2].mxu0  ;;  %v3991_v51 = vpop.f32.mrb[2].mxu1 }
 0x72a   : > { %v3066_v31 = vadd.f32 %v3979_v41, %v3309_v62  ;;  %v3106_v59 = vadd.f32 %v3991_v51, %v3309_v62  ;;  %v3060_v10 = vpop.f32.mrb[3].mxu0  ;;  %v3100_v42 = vpop.f32.mrb[3].mxu1 }
 0x72b   : > { %v3061_v38 = vadd.f32 %v3309_v62, %v3060_v10  ;;  %v3101_v57 = vadd.f32 %v3309_v62, %v3100_v42 }
 0x72c   : > { %3132 = vst [vmem:[#allocation13 + $0x18] sm:$0xff] %v3066_v31  ;;  %3140 = vst [vmem:[#allocation13 + $0x58] sm:$0xff] %v3106_v59 }
 0x72d   : > { %3131 = vst [vmem:[#allocation13 + $0x10] sm:$0xff] %v3061_v38  ;;  %3139 = vst [vmem:[#allocation13 + $0x50] sm:$0xff] %v3101_v57  ;;  %v3982_v12 = vpop.f32.mrb[4].mxu0  ;;  %v3994_v29 = vpop.f32.mrb[4].mxu1 }
 0x72e   : > { %v3076_v6 = vadd.f32 %v3982_v12, %v3309_v62  ;;  %v3116_v48 = vadd.f32 %v3994_v29, %v3309_v62  ;;  %v3070_v8 = vpop.f32.mrb[5].mxu0  ;;  %v3110_v43 = vpop.f32.mrb[5].mxu1 }
 0x72f   : > { %v3071_v3 = vadd.f32 %v3309_v62, %v3070_v8  ;;  %v3111_v28 = vadd.f32 %v3309_v62, %v3110_v43 }
 0x730   : > { %3134 = vst [vmem:[#allocation13 + $0x28] sm:$0xff] %v3076_v6  ;;  %3142 = vst [vmem:[#allocation13 + $0x68] sm:$0xff] %v3116_v48 }
 0x731   : > { %3133 = vst [vmem:[#allocation13 + $0x20] sm:$0xff] %v3071_v3  ;;  %3141 = vst [vmem:[#allocation13 + $0x60] sm:$0xff] %v3111_v28  ;;  %v3985_v44 = vpop.f32.mrb[6].mxu0  ;;  %v3997_v19 = vpop.f32.mrb[6].mxu1 }
 0x732   : > { %v3086_v53 = vadd.f32 %v3985_v44, %v3309_v62  ;;  %v3126_v56 = vadd.f32 %v3997_v19, %v3309_v62  ;;  %v3080_v23 = vpop.f32.mrb[7].mxu0  ;;  %v3120_v16 = vpop.f32.mrb[7].mxu1 }
 0x733   : > { %v3081_v46 = vadd.f32 %v3309_v62, %v3080_v23  ;;  %v3121_v49 = vadd.f32 %v3309_v62, %v3120_v16 }
 0x734   : > { %3136 = vst [vmem:[#allocation13 + $0x38] sm:$0xff] %v3086_v53  ;;  %3144 = vst [vmem:[#allocation13 + $0x78] sm:$0xff] %v3126_v56 }
 0x735   : > { %3135 = vst [vmem:[#allocation13 + $0x30] sm:$0xff] %v3081_v46  ;;  %3143 = vst [vmem:[#allocation13 + $0x70] sm:$0xff] %v3121_v49 }
 0x736 PF: > { %p4374_p10 = scmp.eq.s32.totalorder %s5072_s9, 2  ;;  %s5003_s25 = smov [#allocation13]  }
 0x737   : > { %s3151_s27 = sshll.u32 %s5003_s25, 4  ;;  %s3152_s27 = int_to_ptr.vmem [resolvable:$true] %s3151_s27 }
 0x738   : > { %s4915_s26 = scalar_lea.vmem %s3152_s27, 2048  ;;  %p4922_p11 = scmp.lt.s32.totalorder %s3152_s27, %s3152_s27 }
 0x739   : > { %p4916_p12 = scmp.ne.s32.totalorder %s3152_s27, %s4915_s26  ;;  %p4923_p3 = scmp.lt.s32.totalorder %s4915_s26, %s4915_s26 }
 0x73b   : > { %p4917_p1 = pnand %p4916_p12, %p4374_p10  ;;  %p4924_p8 = por %p4923_p3, %p4922_p11 }
 0x73d   : > { %p4918_p4 = pneg %p4917_p1 }
 0x73f   : > { %p4925_p13 = pnand %p4924_p8, %p4918_p4 }
 0x741   : > { %4928 = shalt.err (!%p4925_p13)
}
 0x742   : > { %s4929_s17 = scalar_lea.hbm %s6611_s8, 2048 }
 0x743   : > { %p4930_p0 = scmp.ne.s32.totalorder %s6611_s8, %s4929_s17  ;;  %p4935_p5 = scmp.lt.u32.totalorder %s4929_s17, %s6611_s8 }
 0x745   : > { %p4931_p6 = pnand %p4930_p0, %p4374_p10 }
 0x747   : > { %p4932_p2 = pneg %p4931_p6 }
 0x749   : > { %p4937_p9 = pnand %p4935_p5, %p4932_p2 }
 0x74b   : > { %4940 = shalt.err (!%p4937_p9)
}
 0x74c   : > { %s5004_s18 = smov 128   ;;  %s5005_s21 = smov 8  }
 0x74d   : > { %4345 = dma.vmem_to_hbm [thread:$0]  (%p4374_p10), %s3152_s27, 2048, %s6611_s8, [#allocation6], %s5004_s18, %s5004_s18, %s5005_s21  }
 0x74e   : > { %4974 = dma.done.wait (%p4374_p10), [#allocation6], 2048  }
 0x74f   : > { %4976 = vsyncadd (%p4374_p10), [#allocation6], 4294965248 }
 0x750 PF: > { %p21_p7 = scmp.ge.s32.totalorder %s5202_s15, 5   ;;  %s6891_s27 = smov %s4983_s28 }
 0x751   : > { %s6892_s28 = smov %s4987_s29  ;;  %s6893_s29 = smov %s5214_s20 }
 0x752   : > { %s6894_s30 = smov %s5202_s15  ;;  %23 = sbr.rel (!%p21_p7) target bundleno = 6 (0x6), region = 126 }
 0x759   :  { %3167 = vsyncpa [#allocation5], 1 }
 0x75a   :  { %3169 = vsyncpa [#allocation5 + $0x1], 1 }
 0x75b   :  { %3170 = vsyncpa [#allocation8], 1 }
 0x75c   :  { %3171 = vsyncpa [#allocation11], 1 }
 0x75d   :  { %3173 = vsyncpa [#allocation11 + $0x1], 1 }
 0x75e   :  { %3174 = vsyncpa [#allocation6], 1 }
 0x75f   :  { %3176 = vsyncpa [#allocation6 + $0x1], 1 }

</bundles_post_ra>
